<compile_context>
chip_gen: v5e
topology: v5e:2x2
jax: 0.10.0
libtpu: 0.0.40
codegen_flags: <defaults>
</compile_context>

<pallas_src>
import jax
import jax.numpy as jnp
from jax import lax
from jax.experimental import pallas as pl
from jax.experimental.pallas import tpu as pltpu


def bert_classifier_kernel(
    x_ref,                                # (Bt, S, H) f32 embeddings block
    vl_ref,                               # (Bt, 1) int32 valid lengths block
    wqkv_ref, bqkv_ref,                   # (H, 3H) bf16, (1, 3H) f32 (scale folded into Q cols)
    wo_ref, bo_ref,                       # (H, H) bf16, (1, H) f32
    ln1_g_ref, ln1_b_ref,                 # (1, H) f32
    w1_ref, b1_ref,                       # (H, FF) bf16, (1, FF) f32
    w2_ref, b2_ref,                       # (FF, H) bf16, (1, H) f32
    ln2_g_ref, ln2_b_ref,                 # (1, H) f32
    pw_ref, pb_ref,                       # (H, H) bf16, (1, H) f32
    cw_ref, cb_ref,                       # (H, Cpad) bf16, (1, Cpad) f32
    out_ref,                              # (Bt, Cpad) f32 logits block
):
    Bt, S, H = x_ref.shape
    M = Bt * S
    bf16 = jnp.bfloat16

    def mm(a, w_ref):                     # bf16 MXU matmul, f32 accumulate
        return jnp.dot(a.astype(bf16), w_ref[...],
                       preferred_element_type=jnp.float32)

    def layer_norm(h, g_ref, b_ref):
        # One-pass stats: E[h] and E[h^2] are independent XLU reductions.
        mean = jnp.mean(h, axis=-1, keepdims=True)
        mean_sq = jnp.mean(h * h, axis=-1, keepdims=True)
        var = mean_sq - mean * mean
        return (h - mean) * lax.rsqrt(var + 1e-12) * g_ref[...] + b_ref[...]

    x2 = x_ref[...].reshape(M, H)         # f32 [Bt*S, H] slab

    # ---- fused QKV projection (one [M,H] x [H,3H] MXU pass) -----------------
    # 1/sqrt(H) was folded into the Q columns of wqkv/bqkv at weight prep, so
    # q/k/v need no further scaling and are consumed only as bf16 MXU operands.
    qkv = mm(x2, wqkv_ref) + bqkv_ref[...]                 # [M, 3H] f32
    q = qkv[:, 0 * H:1 * H].astype(bf16).reshape(Bt, S, H)
    k = qkv[:, 1 * H:2 * H].astype(bf16).reshape(Bt, S, H)
    v = qkv[:, 2 * H:3 * H].astype(bf16).reshape(Bt, S, H)

    # ---- gen_attention_mask: key position s valid iff s < valid_length[b] ---
    key_pos = lax.broadcasted_iota(jnp.int32, (Bt, 1, S), 2)
    bias = jnp.where(key_pos < vl_ref[...][:, :, None],
                     jnp.float32(0.0), jnp.float32(-1e9))  # (Bt, 1, S) additive mask

    # ---- attention: contract H directly (no k transpose), masked softmax ----
    scores = jnp.einsum("bqh,bkh->bqk", q, k,
                        preferred_element_type=jnp.float32) + bias
    scores = scores - jnp.max(scores, axis=-1, keepdims=True)
    p = jnp.exp(scores)
    p = p * pl.reciprocal(jnp.sum(p, axis=-1, keepdims=True), approx=True)

    ctx = jnp.einsum("bqk,bkh->bqh", p.astype(bf16), v,
                     preferred_element_type=jnp.float32)   # [Bt, S, H]
    attn = mm(ctx.reshape(M, H), wo_ref) + bo_ref[...]

    # ---- residual + LayerNorm 1 (f32 stats) ---------------------------------
    h = layer_norm(x2 + attn, ln1_g_ref, ln1_b_ref)

    # ---- feed-forward + residual + LayerNorm 2 -------------------------------
    f = jax.nn.gelu(mm(h, w1_ref) + b1_ref[...])
    f = mm(f, w2_ref) + b2_ref[...]
    h2 = layer_norm(h + f, ln2_g_ref, ln2_b_ref)

    # ---- BERT pooler: tanh(Linear(h2[CLS])) ----------------------------------
    # TODO(synk): for this 1-layer synthetic backbone the whole post-attention
    # path could be restricted to the CLS rows (S x fewer FLOPs), but that does
    # not generalize to the real multi-layer kobert encoder, so the full
    # sequence is kept.
    cls = h2.reshape(Bt, S, H)[:, 0, :]                    # [Bt, H]
    pooled = jnp.tanh(mm(cls, pw_ref) + pb_ref[...])

    # dropout=None in the reference module -> identity (eval semantics).
    # classifier: lane-dense padded output (Cpad multiple of 128), sliced later.
    logits = mm(pooled, cw_ref) + cb_ref[...]              # [Bt, Cpad]
    out_ref[...] = logits.astype(out_ref.dtype)


def prepare_params(params):
    """One-time weight prep (hoisted out of the per-call forward wrapper)."""
    bf16 = jnp.bfloat16
    H = params["word_emb"].shape[1]
    C = params["cw"].shape[1]
    inv_scale = jnp.float32(1.0 / (H ** 0.5))

    # Fused QKV with 1/sqrt(H) folded into the Q columns (weight and bias).
    wqkv = jnp.concatenate(
        [params["wq"] * inv_scale, params["wk"], params["wv"]], axis=1).astype(bf16)
    bqkv = jnp.concatenate(
        [params["bq"] * inv_scale, params["bk"], params["bv"]], axis=1).astype(jnp.float32)

    # Lane-dense classifier output: pad num_classes up to a multiple of 128.
    Cpad = pl.cdiv(C, 128) * 128
    cw = jnp.zeros((H, Cpad), bf16).at[:, :C].set(params["cw"].astype(bf16))
    cb = jnp.zeros((1, Cpad), jnp.float32).at[:, :C].set(params["cb"])

    weights = [
        wqkv, bqkv,
        params["wo"].astype(bf16), params["bo"].astype(jnp.float32),
        params["ln1_g"], params["ln1_b"],
        params["w1"].astype(bf16), params["b1"].astype(jnp.float32),
        params["w2"].astype(bf16), params["b2"].astype(jnp.float32),
        params["ln2_g"], params["ln2_b"],
        params["pw"].astype(bf16), params["pb"].astype(jnp.float32),
        cw, cb,
    ]
    return {
        "word_emb": params["word_emb"],
        "type_emb": params["type_emb"],
        "pos_emb": params["pos_emb"],
        "weights": weights,
        "num_classes": C,
        "num_classes_padded": Cpad,
    }


def bert_classifier_forward(token_ids, valid_length, segment_ids, prep,
                            *, block_b=None):
    B, S = token_ids.shape
    H = prep["word_emb"].shape[1]
    C, Cpad = prep["num_classes"], prep["num_classes_padded"]
    weights = prep["weights"]
    FF = weights[6].shape[1]                       # w1 is weights[6]

    # Embedding gathers (glue, plain JAX).
    x = (prep["word_emb"][token_ids]
         + prep["type_emb"][segment_ids]
         + prep["pos_emb"][None, :S, :]).astype(jnp.float32)

    # ---- batch blocking: Bt elements / grid step -> Bt*S MXU rows ------------
    # Generation note: v6e (128 MiB VMEM) can profitably grow this so M is
    # 1024+; v7x (64 MiB/TC) should stay near M=512 at real BERT sizes.
    if block_b is None:
        block_b = max(1, 128 // S)                 # aim for >=128 rows per matmul
        if B >= 2:
            block_b = min(block_b, max(1, B // 2))  # keep >=2 parallel steps (v7x 2 TCs)
    block_b = min(block_b, B)
    if block_b % 8 != 0:
        # logits / valid_length blocks use block_b as the sublane dim; keep it
        # a multiple of 8 or fall back to a single full-batch step.
        block_b = B
    Bp = pl.cdiv(B, block_b) * block_b

    vl = valid_length.astype(jnp.int32).reshape(B, 1)
    if Bp != B:
        x = jnp.pad(x, ((0, Bp - B), (0, 0), (0, 0)))
        vl = jnp.pad(vl, ((0, Bp - B), (0, 0)), constant_values=S)

    # ---- specs ---------------------------------------------------------------
    # Grid-invariant weights: whole-array VMEM residents (single-buffered,
    # fetched once) instead of double-buffered per-step blocks.
    wspec = pl.BlockSpec(memory_space=pltpu.MemorySpace.VMEM)
    in_specs = [pl.BlockSpec((block_b, S, H), lambda i: (i, 0, 0)),
                pl.BlockSpec((block_b, 1), lambda i: (i, 0))]
    in_specs += [wspec] * len(weights)

    # ---- explicit VMEM budget -------------------------------------------------
    def nbytes(a):
        return a.size * a.dtype.itemsize

    M = block_b * S
    weight_bytes = sum(nbytes(w) for w in weights)          # single-buffered
    act_bytes = (2 * block_b * S * H * 4                     # double-buffered x blocks
                 + 2 * block_b * Cpad * 4                    # double-buffered logits blocks
                 + 2 * block_b * 128 * 4                     # valid_length blocks (lane-padded)
                 + M * 3 * H * 4 + 3 * M * H * 2             # qkv f32 + q/k/v bf16
                 + 2 * block_b * S * S * 4                   # scores + probs f32
                 + M * FF * 4 + M * FF * 2                   # FFN hidden f32 + bf16
                 + 8 * M * H * 4)                            # misc f32 temporaries
    try:
        phys_vmem = pltpu.get_tpu_info().vmem_capacity_bytes
    except Exception:
        phys_vmem = 64 * 1024 * 1024                         # v7x per-TC size: safe floor
    vmem_limit = int(min(max(1.5 * (weight_bytes + act_bytes), 32 << 20),
                         phys_vmem - (4 << 20)))

    # TODO(synk): at real BERT sizes on v7x, if the FFN intermediates still do
    # not fit, stream w1/w2 over an FF-chunk axis (nested pltpu.emit_pipeline)
    # rather than shrinking the M (row) dimension below 128.
    out = pl.pallas_call(
        bert_classifier_kernel,
        out_shape=jax.ShapeDtypeStruct((Bp, Cpad), jnp.float32),
        grid=(Bp // block_b,),
        in_specs=in_specs,
        out_specs=pl.BlockSpec((block_b, Cpad), lambda i: (i, 0)),
        compiler_params=pltpu.CompilerParams(
            dimension_semantics=("parallel",),
            vmem_limit_bytes=vmem_limit),
    )(x, vl, *weights)

    return out[:B, :C]


def reference_forward(token_ids, valid_length, segment_ids, params):
    """Pure-JAX reference with the same bf16-matmul / f32-stats semantics."""
    B, S = token_ids.shape
    H = params["word_emb"].shape[1]
    x = (params["word_emb"][token_ids]
         + params["type_emb"][segment_ids]
         + params["pos_emb"][None, :S, :]).astype(jnp.float32)

    bf16 = jnp.bfloat16

    def mm(a, w):
        return jnp.dot(a.astype(bf16), w.astype(bf16),
                       preferred_element_type=jnp.float32)

    def ln(h, g, bb):
        mu = h.mean(-1, keepdims=True)
        var = ((h - mu) ** 2).mean(-1, keepdims=True)
        return (h - mu) * lax.rsqrt(var + 1e-12) * g + bb

    mask = jnp.arange(S)[None, :] < valid_length[:, None]              # [B, S]
    bias = jnp.where(mask, 0.0, -1e9).astype(jnp.float32)[:, None, :]  # [B,1,S]

    inv_scale = jnp.float32(1.0 / (H ** 0.5))
    q = (mm(x, params["wq"]) + params["bq"]) * inv_scale
    k = mm(x, params["wk"]) + params["bk"]
    v = mm(x, params["wv"]) + params["bv"]
    scores = jnp.einsum("bqh,bkh->bqk", q.astype(bf16), k.astype(bf16),
                        preferred_element_type=jnp.float32) + bias
    p = jax.nn.softmax(scores, axis=-1)
    ctx = jnp.einsum("bqk,bkh->bqh", p.astype(bf16), v.astype(bf16),
                     preferred_element_type=jnp.float32)
    attn = mm(ctx, params["wo"]) + params["bo"]
    h = ln(x + attn, params["ln1_g"], params["ln1_b"])
    f = jax.nn.gelu(mm(h, params["w1"]) + params["b1"])
    f = mm(f, params["w2"]) + params["b2"]
    h2 = ln(h + f, params["ln2_g"], params["ln2_b"])
    pooled = jnp.tanh(mm(h2[:, 0, :], params["pw"]) + params["pb"])
    return mm(pooled, params["cw"]) + params["cb"]


def init_params(key, vocab=50, H=32, S=8, C=16):
    FF = 4 * H
    ks = jax.random.split(key, 16)
    s = 0.02
    return {
        "word_emb": s * jax.random.normal(ks[0], (vocab, H), jnp.float32),
        "type_emb": s * jax.random.normal(ks[1], (2, H), jnp.float32),
        "pos_emb":  s * jax.random.normal(ks[2], (S, H), jnp.float32),
        "wq": s * jax.random.normal(ks[3], (H, H), jnp.float32),
        "wk": s * jax.random.normal(ks[4], (H, H), jnp.float32),
        "wv": s * jax.random.normal(ks[5], (H, H), jnp.float32),
        "wo": s * jax.random.normal(ks[6], (H, H), jnp.float32),
        "w1": s * jax.random.normal(ks[7], (H, FF), jnp.float32),
        "w2": s * jax.random.normal(ks[8], (FF, H), jnp.float32),
        "pw": s * jax.random.normal(ks[9], (H, H), jnp.float32),
        "cw": s * jax.random.normal(ks[10], (H, C), jnp.float32),
        "bq": jnp.zeros((1, H), jnp.float32),
        "bk": jnp.zeros((1, H), jnp.float32),
        "bv": jnp.zeros((1, H), jnp.float32),
        "bo": jnp.zeros((1, H), jnp.float32),
        "b1": jnp.zeros((1, FF), jnp.float32),
        "b2": jnp.zeros((1, H), jnp.float32),
        "pb": jnp.zeros((1, H), jnp.float32),
        "cb": s * jax.random.normal(ks[11], (1, C), jnp.float32),
        "ln1_g": jnp.ones((1, H), jnp.float32),
        "ln1_b": jnp.zeros((1, H), jnp.float32),
        "ln2_g": jnp.ones((1, H), jnp.float32),
        "ln2_b": jnp.zeros((1, H), jnp.float32),
    }


if __name__ == "__main__":
    # Small synthetic shapes; B=32 so the batch-blocked kernel runs with
    # Bt=16 (Bt*S = 128 MXU rows) over 2 parallel grid steps.
    # (Real kobert dims H=768/FF=3072/S=512 are already 256-multiples.)
    B, S, H, C, VOCAB = 32, 8, 32, 16, 50
    key = jax.random.PRNGKey(0)
    kp, kt, kv = jax.random.split(key, 3)

    params = init_params(kp, vocab=VOCAB, H=H, S=S, C=C)
    prep = prepare_params(params)      # one-time weight prep, hoisted out of forward

    token_ids = jax.random.randint(kt, (B, S), 0, VOCAB, dtype=jnp.int32)
    segment_ids = jnp.zeros((B, S), jnp.int32)
    valid_length = jax.random.randint(kv, (B,), 1, S + 1, dtype=jnp.int32)

    logits = bert_classifier_forward(token_ids, valid_length, segment_ids, prep)
    logits = jax.block_until_ready(logits)

    ref = reference_forward(token_ids, valid_length, segment_ids, params)
    assert logits.shape == (B, C)
    # Tolerance covers f32 accumulation-order differences, the approximate
    # (EUP) reciprocal in the softmax, and the bf16 rounding of the folded
    # 1/sqrt(H) scale; bf16 matmul rounding is mirrored in the reference.
    err = float(jnp.max(jnp.abs(logits - ref)))
    assert jnp.allclose(logits, ref, atol=1e-3, rtol=1e-3), f"mismatch vs reference: {err}"

    print("KERNEL_OK")
</pallas_src>

<mosaic_0001>
module attributes {stable_mosaic.version = 11 : i64} {
  func.func @bert_classifier_kernel(%arg0: i32, %arg1: memref<16x8x32xf32, #tpu.memory_space<vmem>>, %arg2: memref<16x1xi32, #tpu.memory_space<vmem>>, %arg3: memref<32x96xbf16, #tpu.memory_space<vmem>>, %arg4: memref<1x96xf32, #tpu.memory_space<vmem>>, %arg5: memref<32x32xbf16, #tpu.memory_space<vmem>>, %arg6: memref<1x32xf32, #tpu.memory_space<vmem>>, %arg7: memref<1x32xf32, #tpu.memory_space<vmem>>, %arg8: memref<1x32xf32, #tpu.memory_space<vmem>>, %arg9: memref<32x128xbf16, #tpu.memory_space<vmem>>, %arg10: memref<1x128xf32, #tpu.memory_space<vmem>>, %arg11: memref<128x32xbf16, #tpu.memory_space<vmem>>, %arg12: memref<1x32xf32, #tpu.memory_space<vmem>>, %arg13: memref<1x32xf32, #tpu.memory_space<vmem>>, %arg14: memref<1x32xf32, #tpu.memory_space<vmem>>, %arg15: memref<32x32xbf16, #tpu.memory_space<vmem>>, %arg16: memref<1x32xf32, #tpu.memory_space<vmem>>, %arg17: memref<32x128xbf16, #tpu.memory_space<vmem>>, %arg18: memref<1x128xf32, #tpu.memory_space<vmem>>, %arg19: memref<16x128xf32, #tpu.memory_space<vmem>>) attributes {dimension_semantics = [#tpu.dimension_semantics<parallel>], iteration_bounds = array<i64: 2>, scalar_prefetch = 0 : i64, scratch_operands = 0 : i64, tpu.core_type = #tpu.core_type<tc>, window_params = [{transform_indices = @transform_0, window_bounds = array<i64: 16, 8, 32>}, {transform_indices = @transform_1, window_bounds = array<i64: 16, 1>}, {pipeline_mode = #tpu.pipeline_mode<synchronous>, transform_indices = @transform_2, window_bounds = array<i64: 32, 96>}, {pipeline_mode = #tpu.pipeline_mode<synchronous>, transform_indices = @transform_3, window_bounds = array<i64: 1, 96>}, {pipeline_mode = #tpu.pipeline_mode<synchronous>, transform_indices = @transform_4, window_bounds = array<i64: 32, 32>}, {pipeline_mode = #tpu.pipeline_mode<synchronous>, transform_indices = @transform_5, window_bounds = array<i64: 1, 32>}, {pipeline_mode = #tpu.pipeline_mode<synchronous>, transform_indices = @transform_6, window_bounds = array<i64: 1, 32>}, {pipeline_mode = #tpu.pipeline_mode<synchronous>, transform_indices = @transform_7, window_bounds = array<i64: 1, 32>}, {pipeline_mode = #tpu.pipeline_mode<synchronous>, transform_indices = @transform_8, window_bounds = array<i64: 32, 128>}, {pipeline_mode = #tpu.pipeline_mode<synchronous>, transform_indices = @transform_9, window_bounds = array<i64: 1, 128>}, {pipeline_mode = #tpu.pipeline_mode<synchronous>, transform_indices = @transform_10, window_bounds = array<i64: 128, 32>}, {pipeline_mode = #tpu.pipeline_mode<synchronous>, transform_indices = @transform_11, window_bounds = array<i64: 1, 32>}, {pipeline_mode = #tpu.pipeline_mode<synchronous>, transform_indices = @transform_12, window_bounds = array<i64: 1, 32>}, {pipeline_mode = #tpu.pipeline_mode<synchronous>, transform_indices = @transform_13, window_bounds = array<i64: 1, 32>}, {pipeline_mode = #tpu.pipeline_mode<synchronous>, transform_indices = @transform_14, window_bounds = array<i64: 32, 32>}, {pipeline_mode = #tpu.pipeline_mode<synchronous>, transform_indices = @transform_15, window_bounds = array<i64: 1, 32>}, {pipeline_mode = #tpu.pipeline_mode<synchronous>, transform_indices = @transform_16, window_bounds = array<i64: 32, 128>}, {pipeline_mode = #tpu.pipeline_mode<synchronous>, transform_indices = @transform_17, window_bounds = array<i64: 1, 128>}, {transform_indices = @transform_18, window_bounds = array<i64: 16, 128>}]} {
    %c0 = arith.constant 0 : index
    %c0_0 = arith.constant 0 : index
    %c0_1 = arith.constant 0 : index
    %0 = vector.load %arg1[%c0, %c0_0, %c0_1] : memref<16x8x32xf32, #tpu.memory_space<vmem>>, vector<16x8x32xf32>
    %1 = vector.shape_cast %0 : vector<16x8x32xf32> to vector<128x32xf32>
    %2 = arith.truncf %1 : vector<128x32xf32> to vector<128x32xbf16>
    %c0_2 = arith.constant 0 : index
    %c0_3 = arith.constant 0 : index
    %3 = vector.load %arg3[%c0_2, %c0_3] : memref<32x96xbf16, #tpu.memory_space<vmem>>, vector<32x96xbf16>
    %cst = arith.constant dense<0.000000e+00> : vector<128x96xf32>
    %4 = tpu.matmul %2, %3, %cst {dimension_numbers = #tpu.dot_dimension_numbers<[1], [0], [0], [1], [0, 0, 1, 1], [], []>} : vector<128x32xbf16>, vector<32x96xbf16>, vector<128x96xf32> -> vector<128x96xf32>
    %c0_4 = arith.constant 0 : index
    %c0_5 = arith.constant 0 : index
    %5 = vector.load %arg4[%c0_4, %c0_5] : memref<1x96xf32, #tpu.memory_space<vmem>>, vector<1x96xf32>
    %6 = vector.broadcast %5 : vector<1x96xf32> to vector<128x96xf32>
    %7 = arith.addf %4, %6 : vector<128x96xf32>
    %8 = vector.extract_strided_slice %7 {offsets = [0, 0], sizes = [128, 32], strides = [1, 1]} : vector<128x96xf32> to vector<128x32xf32>
    %9 = arith.truncf %8 : vector<128x32xf32> to vector<128x32xbf16>
    %10 = vector.shape_cast %9 : vector<128x32xbf16> to vector<16x8x32xbf16>
    %11 = vector.extract_strided_slice %7 {offsets = [0, 32], sizes = [128, 32], strides = [1, 1]} : vector<128x96xf32> to vector<128x32xf32>
    %12 = arith.truncf %11 : vector<128x32xf32> to vector<128x32xbf16>
    %13 = vector.shape_cast %12 : vector<128x32xbf16> to vector<16x8x32xbf16>
    %14 = vector.extract_strided_slice %7 {offsets = [0, 64], sizes = [128, 32], strides = [1, 1]} : vector<128x96xf32> to vector<128x32xf32>
    %15 = arith.truncf %14 : vector<128x32xf32> to vector<128x32xbf16>
    %16 = vector.shape_cast %15 : vector<128x32xbf16> to vector<16x8x32xbf16>
    %17 = tpu.iota {dimensions = array<i32: 2>} : vector<16x1x8xi32>
    %c0_6 = arith.constant 0 : index
    %c0_7 = arith.constant 0 : index
    %18 = vector.load %arg2[%c0_6, %c0_7] : memref<16x1xi32, #tpu.memory_space<vmem>>, vector<16x1xi32>
    %19 = vector.shape_cast %18 : vector<16x1xi32> to vector<16x1x1xi32>
    %20 = vector.broadcast %19 : vector<16x1x1xi32> to vector<16x1x8xi32>
    %21 = arith.cmpi slt, %17, %20 : vector<16x1x8xi32>
    %cst_8 = arith.constant 0.000000e+00 : f32
    %cst_9 = arith.constant -1.000000e+09 : f32
    %22 = vector.broadcast %cst_8 : f32 to vector<16x1x8xf32>
    %23 = vector.broadcast %cst_9 : f32 to vector<16x1x8xf32>
    %24 = arith.select %21, %22, %23 : vector<16x1x8xi1>, vector<16x1x8xf32>
    "tpu.trace_start"() <{level = 10 : i32, message = "bqh,bkh->bqk"}> : () -> ()
    %cst_10 = arith.constant dense<0.000000e+00> : vector<16x8x8xf32>
    %25 = tpu.matmul %10, %13, %cst_10 {dimension_numbers = #tpu.dot_dimension_numbers<[2], [2], [1], [1], [0, 0, 0, 1, 1, 1], [0], [0]>} : vector<16x8x32xbf16>, vector<16x8x32xbf16>, vector<16x8x8xf32> -> vector<16x8x8xf32>
    "tpu.trace_stop"() : () -> ()
    %26 = vector.broadcast %24 : vector<16x1x8xf32> to vector<16x8x8xf32>
    %27 = arith.addf %25, %26 : vector<16x8x8xf32>
    %cst_11 = arith.constant dense<0xFF800000> : vector<16x8xf32>
    %28 = vector.multi_reduction <maximumf>, %27, %cst_11 [2] : vector<16x8x8xf32> to vector<16x8xf32>
    %29 = vector.shape_cast %28 : vector<16x8xf32> to vector<16x8x1xf32>
    %30 = vector.broadcast %29 : vector<16x8x1xf32> to vector<16x8x8xf32>
    %31 = arith.subf %27, %30 : vector<16x8x8xf32>
    %32 = math.exp %31 : vector<16x8x8xf32>
    %cst_12 = arith.constant dense<0.000000e+00> : vector<16x8xf32>
    %33 = vector.multi_reduction <add>, %32, %cst_12 [2] : vector<16x8x8xf32> to vector<16x8xf32>
    %34 = vector.shape_cast %33 : vector<16x8xf32> to vector<16x8x1xf32>
    %35 = tpu.reciprocal %34 {approx = true} : vector<16x8x1xf32> -> vector<16x8x1xf32>
    %36 = vector.broadcast %35 : vector<16x8x1xf32> to vector<16x8x8xf32>
    %37 = arith.mulf %32, %36 : vector<16x8x8xf32>
    %38 = arith.truncf %37 : vector<16x8x8xf32> to vector<16x8x8xbf16>
    "tpu.trace_start"() <{level = 10 : i32, message = "bqk,bkh->bqh"}> : () -> ()
    %cst_13 = arith.constant dense<0.000000e+00> : vector<16x8x32xf32>
    %39 = tpu.matmul %38, %16, %cst_13 {dimension_numbers = #tpu.dot_dimension_numbers<[2], [1], [1], [2], [0, 0, 0, 1, 1, 2], [0], [0]>} : vector<16x8x8xbf16>, vector<16x8x32xbf16>, vector<16x8x32xf32> -> vector<16x8x32xf32>
    "tpu.trace_stop"() : () -> ()
    %40 = vector.shape_cast %39 : vector<16x8x32xf32> to vector<128x32xf32>
    %41 = arith.truncf %40 : vector<128x32xf32> to vector<128x32xbf16>
    %c0_14 = arith.constant 0 : index
    %c0_15 = arith.constant 0 : index
    %42 = vector.load %arg5[%c0_14, %c0_15] : memref<32x32xbf16, #tpu.memory_space<vmem>>, vector<32x32xbf16>
    %cst_16 = arith.constant dense<0.000000e+00> : vector<128x32xf32>
    %43 = tpu.matmul %41, %42, %cst_16 {dimension_numbers = #tpu.dot_dimension_numbers<[1], [0], [0], [1], [0, 0, 1, 1], [], []>} : vector<128x32xbf16>, vector<32x32xbf16>, vector<128x32xf32> -> vector<128x32xf32>
    %c0_17 = arith.constant 0 : index
    %c0_18 = arith.constant 0 : index
    %44 = vector.load %arg6[%c0_17, %c0_18] : memref<1x32xf32, #tpu.memory_space<vmem>>, vector<1x32xf32>
    %45 = vector.broadcast %44 : vector<1x32xf32> to vector<128x32xf32>
    %46 = arith.addf %43, %45 : vector<128x32xf32>
    %47 = arith.addf %1, %46 : vector<128x32xf32>
    %cst_19 = arith.constant dense<0.000000e+00> : vector<128xf32>
    %48 = vector.multi_reduction <add>, %47, %cst_19 [1] : vector<128x32xf32> to vector<128xf32>
    %49 = vector.shape_cast %48 : vector<128xf32> to vector<128x1xf32>
    %cst_20 = arith.constant 3.200000e+01 : f32
    %50 = vector.broadcast %cst_20 : f32 to vector<128x1xf32>
    %51 = arith.divf %49, %50 : vector<128x1xf32>
    %52 = arith.mulf %47, %47 : vector<128x32xf32>
    %cst_21 = arith.constant dense<0.000000e+00> : vector<128xf32>
    %53 = vector.multi_reduction <add>, %52, %cst_21 [1] : vector<128x32xf32> to vector<128xf32>
    %54 = vector.shape_cast %53 : vector<128xf32> to vector<128x1xf32>
    %cst_22 = arith.constant 3.200000e+01 : f32
    %55 = vector.broadcast %cst_22 : f32 to vector<128x1xf32>
    %56 = arith.divf %54, %55 : vector<128x1xf32>
    %57 = arith.mulf %51, %51 : vector<128x1xf32>
    %58 = arith.subf %56, %57 : vector<128x1xf32>
    %59 = vector.broadcast %51 : vector<128x1xf32> to vector<128x32xf32>
    %60 = arith.subf %47, %59 : vector<128x32xf32>
    %cst_23 = arith.constant 9.99999996E-13 : f32
    %61 = vector.broadcast %cst_23 : f32 to vector<128x1xf32>
    %62 = arith.addf %58, %61 : vector<128x1xf32>
    %63 = math.rsqrt %62 : vector<128x1xf32>
    %64 = vector.broadcast %63 : vector<128x1xf32> to vector<128x32xf32>
    %65 = arith.mulf %60, %64 : vector<128x32xf32>
    %c0_24 = arith.constant 0 : index
    %c0_25 = arith.constant 0 : index
    %66 = vector.load %arg7[%c0_24, %c0_25] : memref<1x32xf32, #tpu.memory_space<vmem>>, vector<1x32xf32>
    %67 = vector.broadcast %66 : vector<1x32xf32> to vector<128x32xf32>
    %68 = arith.mulf %65, %67 : vector<128x32xf32>
    %c0_26 = arith.constant 0 : index
    %c0_27 = arith.constant 0 : index
    %69 = vector.load %arg8[%c0_26, %c0_27] : memref<1x32xf32, #tpu.memory_space<vmem>>, vector<1x32xf32>
    %70 = vector.broadcast %69 : vector<1x32xf32> to vector<128x32xf32>
    %71 = arith.addf %68, %70 : vector<128x32xf32>
    %72 = arith.truncf %71 : vector<128x32xf32> to vector<128x32xbf16>
    %c0_28 = arith.constant 0 : index
    %c0_29 = arith.constant 0 : index
    %73 = vector.load %arg9[%c0_28, %c0_29] : memref<32x128xbf16, #tpu.memory_space<vmem>>, vector<32x128xbf16>
    %cst_30 = arith.constant dense<0.000000e+00> : vector<128x128xf32>
    %74 = tpu.matmul %72, %73, %cst_30 {dimension_numbers = #tpu.dot_dimension_numbers<[1], [0], [0], [1], [0, 0, 1, 1], [], []>} : vector<128x32xbf16>, vector<32x128xbf16>, vector<128x128xf32> -> vector<128x128xf32>
    %c0_31 = arith.constant 0 : index
    %c0_32 = arith.constant 0 : index
    %75 = vector.load %arg10[%c0_31, %c0_32] : memref<1x128xf32, #tpu.memory_space<vmem>>, vector<1x128xf32>
    %76 = vector.broadcast %75 : vector<1x128xf32> to vector<128x128xf32>
    %77 = arith.addf %74, %76 : vector<128x128xf32>
    %78 = arith.mulf %77, %77 : vector<128x128xf32>
    %79 = arith.mulf %77, %78 : vector<128x128xf32>
    %cst_33 = arith.constant 4.471500e-02 : f32
    %80 = vector.broadcast %cst_33 : f32 to vector<128x128xf32>
    %81 = arith.mulf %80, %79 : vector<128x128xf32>
    %82 = arith.addf %77, %81 : vector<128x128xf32>
    %cst_34 = arith.constant 0.797884583 : f32
    %83 = vector.broadcast %cst_34 : f32 to vector<128x128xf32>
    %84 = arith.mulf %83, %82 : vector<128x128xf32>
    %85 = math.tanh %84 : vector<128x128xf32>
    %cst_35 = arith.constant 1.000000e+00 : f32
    %86 = vector.broadcast %cst_35 : f32 to vector<128x128xf32>
    %87 = arith.addf %86, %85 : vector<128x128xf32>
    %cst_36 = arith.constant 5.000000e-01 : f32
    %88 = vector.broadcast %cst_36 : f32 to vector<128x128xf32>
    %89 = arith.mulf %88, %87 : vector<128x128xf32>
    %90 = arith.mulf %77, %89 : vector<128x128xf32>
    %91 = arith.truncf %90 : vector<128x128xf32> to vector<128x128xbf16>
    %c0_37 = arith.constant 0 : index
    %c0_38 = arith.constant 0 : index
    %92 = vector.load %arg11[%c0_37, %c0_38] : memref<128x32xbf16, #tpu.memory_space<vmem>>, vector<128x32xbf16>
    %cst_39 = arith.constant dense<0.000000e+00> : vector<128x32xf32>
    %93 = tpu.matmul %91, %92, %cst_39 {dimension_numbers = #tpu.dot_dimension_numbers<[1], [0], [0], [1], [0, 0, 1, 1], [], []>} : vector<128x128xbf16>, vector<128x32xbf16>, vector<128x32xf32> -> vector<128x32xf32>
    %c0_40 = arith.constant 0 : index
    %c0_41 = arith.constant 0 : index
    %94 = vector.load %arg12[%c0_40, %c0_41] : memref<1x32xf32, #tpu.memory_space<vmem>>, vector<1x32xf32>
    %95 = vector.broadcast %94 : vector<1x32xf32> to vector<128x32xf32>
    %96 = arith.addf %93, %95 : vector<128x32xf32>
    %97 = arith.addf %71, %96 : vector<128x32xf32>
    %cst_42 = arith.constant dense<0.000000e+00> : vector<128xf32>
    %98 = vector.multi_reduction <add>, %97, %cst_42 [1] : vector<128x32xf32> to vector<128xf32>
    %99 = vector.shape_cast %98 : vector<128xf32> to vector<128x1xf32>
    %cst_43 = arith.constant 3.200000e+01 : f32
    %100 = vector.broadcast %cst_43 : f32 to vector<128x1xf32>
    %101 = arith.divf %99, %100 : vector<128x1xf32>
    %102 = arith.mulf %97, %97 : vector<128x32xf32>
    %cst_44 = arith.constant dense<0.000000e+00> : vector<128xf32>
    %103 = vector.multi_reduction <add>, %102, %cst_44 [1] : vector<128x32xf32> to vector<128xf32>
    %104 = vector.shape_cast %103 : vector<128xf32> to vector<128x1xf32>
    %cst_45 = arith.constant 3.200000e+01 : f32
    %105 = vector.broadcast %cst_45 : f32 to vector<128x1xf32>
    %106 = arith.divf %104, %105 : vector<128x1xf32>
    %107 = arith.mulf %101, %101 : vector<128x1xf32>
    %108 = arith.subf %106, %107 : vector<128x1xf32>
    %109 = vector.broadcast %101 : vector<128x1xf32> to vector<128x32xf32>
    %110 = arith.subf %97, %109 : vector<128x32xf32>
    %cst_46 = arith.constant 9.99999996E-13 : f32
    %111 = vector.broadcast %cst_46 : f32 to vector<128x1xf32>
    %112 = arith.addf %108, %111 : vector<128x1xf32>
    %113 = math.rsqrt %112 : vector<128x1xf32>
    %114 = vector.broadcast %113 : vector<128x1xf32> to vector<128x32xf32>
    %115 = arith.mulf %110, %114 : vector<128x32xf32>
    %c0_47 = arith.constant 0 : index
    %c0_48 = arith.constant 0 : index
    %116 = vector.load %arg13[%c0_47, %c0_48] : memref<1x32xf32, #tpu.memory_space<vmem>>, vector<1x32xf32>
    %117 = vector.broadcast %116 : vector<1x32xf32> to vector<128x32xf32>
    %118 = arith.mulf %115, %117 : vector<128x32xf32>
    %c0_49 = arith.constant 0 : index
    %c0_50 = arith.constant 0 : index
    %119 = vector.load %arg14[%c0_49, %c0_50] : memref<1x32xf32, #tpu.memory_space<vmem>>, vector<1x32xf32>
    %120 = vector.broadcast %119 : vector<1x32xf32> to vector<128x32xf32>
    %121 = arith.addf %118, %120 : vector<128x32xf32>
    %122 = vector.shape_cast %121 : vector<128x32xf32> to vector<16x8x32xf32>
    %123 = vector.extract_strided_slice %122 {offsets = [0, 0, 0], sizes = [16, 1, 32], strides = [1, 1, 1]} : vector<16x8x32xf32> to vector<16x1x32xf32>
    %124 = vector.shape_cast %123 : vector<16x1x32xf32> to vector<16x32xf32>
    %125 = arith.truncf %124 : vector<16x32xf32> to vector<16x32xbf16>
    %c0_51 = arith.constant 0 : index
    %c0_52 = arith.constant 0 : index
    %126 = vector.load %arg15[%c0_51, %c0_52] : memref<32x32xbf16, #tpu.memory_space<vmem>>, vector<32x32xbf16>
    %cst_53 = arith.constant dense<0.000000e+00> : vector<16x32xf32>
    %127 = tpu.matmul %125, %126, %cst_53 {dimension_numbers = #tpu.dot_dimension_numbers<[1], [0], [0], [1], [0, 0, 1, 1], [], []>} : vector<16x32xbf16>, vector<32x32xbf16>, vector<16x32xf32> -> vector<16x32xf32>
    %c0_54 = arith.constant 0 : index
    %c0_55 = arith.constant 0 : index
    %128 = vector.load %arg16[%c0_54, %c0_55] : memref<1x32xf32, #tpu.memory_space<vmem>>, vector<1x32xf32>
    %129 = vector.broadcast %128 : vector<1x32xf32> to vector<16x32xf32>
    %130 = arith.addf %127, %129 : vector<16x32xf32>
    %131 = math.tanh %130 : vector<16x32xf32>
    %132 = arith.truncf %131 : vector<16x32xf32> to vector<16x32xbf16>
    %c0_56 = arith.constant 0 : index
    %c0_57 = arith.constant 0 : index
    %133 = vector.load %arg17[%c0_56, %c0_57] : memref<32x128xbf16, #tpu.memory_space<vmem>>, vector<32x128xbf16>
    %cst_58 = arith.constant dense<0.000000e+00> : vector<16x128xf32>
    %134 = tpu.matmul %132, %133, %cst_58 {dimension_numbers = #tpu.dot_dimension_numbers<[1], [0], [0], [1], [0, 0, 1, 1], [], []>} : vector<16x32xbf16>, vector<32x128xbf16>, vector<16x128xf32> -> vector<16x128xf32>
    %c0_59 = arith.constant 0 : index
    %c0_60 = arith.constant 0 : index
    %135 = vector.load %arg18[%c0_59, %c0_60] : memref<1x128xf32, #tpu.memory_space<vmem>>, vector<1x128xf32>
    %136 = vector.broadcast %135 : vector<1x128xf32> to vector<16x128xf32>
    %137 = arith.addf %134, %136 : vector<16x128xf32>
    %c0_61 = arith.constant 0 : index
    %c0_62 = arith.constant 0 : index
    %138 = vector.load %arg19[%c0_61, %c0_62] : memref<16x128xf32, #tpu.memory_space<vmem>>, vector<16x128xf32>
    tpu.vector_store %arg19[%c0_61, %c0_62], %137 {strides = array<i32>} : memref<16x128xf32, #tpu.memory_space<vmem>>, vector<16x128xf32>,
    return
  }
  func.func @transform_0(%arg0: i32) -> (i32, i32, i32) {
    %c0_i32 = arith.constant 0 : i32
    %c0_i32_0 = arith.constant 0 : i32
    %c0_i32_1 = arith.constant 0 : i32
    return %arg0, %c0_i32, %c0_i32_0 : i32, i32, i32
  }
  func.func @transform_1(%arg0: i32) -> (i32, i32) {
    %c0_i32 = arith.constant 0 : i32
    %c0_i32_0 = arith.constant 0 : i32
    return %arg0, %c0_i32 : i32, i32
  }
  func.func @transform_2(%arg0: i32) -> (i32, i32) {
    %c0_i32 = arith.constant 0 : i32
    %c0_i32_0 = arith.constant 0 : i32
    %c0_i32_1 = arith.constant 0 : i32
    return %c0_i32, %c0_i32_0 : i32, i32
  }
  func.func @transform_3(%arg0: i32) -> (i32, i32) {
    %c0_i32 = arith.constant 0 : i32
    %c0_i32_0 = arith.constant 0 : i32
    %c0_i32_1 = arith.constant 0 : i32
    return %c0_i32, %c0_i32_0 : i32, i32
  }
  func.func @transform_4(%arg0: i32) -> (i32, i32) {
    %c0_i32 = arith.constant 0 : i32
    %c0_i32_0 = arith.constant 0 : i32
    %c0_i32_1 = arith.constant 0 : i32
    return %c0_i32, %c0_i32_0 : i32, i32
  }
  func.func @transform_5(%arg0: i32) -> (i32, i32) {
    %c0_i32 = arith.constant 0 : i32
    %c0_i32_0 = arith.constant 0 : i32
    %c0_i32_1 = arith.constant 0 : i32
    return %c0_i32, %c0_i32_0 : i32, i32
  }
  func.func @transform_6(%arg0: i32) -> (i32, i32) {
    %c0_i32 = arith.constant 0 : i32
    %c0_i32_0 = arith.constant 0 : i32
    %c0_i32_1 = arith.constant 0 : i32
    return %c0_i32, %c0_i32_0 : i32, i32
  }
  func.func @transform_7(%arg0: i32) -> (i32, i32) {
    %c0_i32 = arith.constant 0 : i32
    %c0_i32_0 = arith.constant 0 : i32
    %c0_i32_1 = arith.constant 0 : i32
    return %c0_i32, %c0_i32_0 : i32, i32
  }
  func.func @transform_8(%arg0: i32) -> (i32, i32) {
    %c0_i32 = arith.constant 0 : i32
    %c0_i32_0 = arith.constant 0 : i32
    %c0_i32_1 = arith.constant 0 : i32
    return %c0_i32, %c0_i32_0 : i32, i32
  }
  func.func @transform_9(%arg0: i32) -> (i32, i32) {
    %c0_i32 = arith.constant 0 : i32
    %c0_i32_0 = arith.constant 0 : i32
    %c0_i32_1 = arith.constant 0 : i32
    return %c0_i32, %c0_i32_0 : i32, i32
  }
  func.func @transform_10(%arg0: i32) -> (i32, i32) {
    %c0_i32 = arith.constant 0 : i32
    %c0_i32_0 = arith.constant 0 : i32
    %c0_i32_1 = arith.constant 0 : i32
    return %c0_i32, %c0_i32_0 : i32, i32
  }
  func.func @transform_11(%arg0: i32) -> (i32, i32) {
    %c0_i32 = arith.constant 0 : i32
    %c0_i32_0 = arith.constant 0 : i32
    %c0_i32_1 = arith.constant 0 : i32
    return %c0_i32, %c0_i32_0 : i32, i32
  }
  func.func @transform_12(%arg0: i32) -> (i32, i32) {
    %c0_i32 = arith.constant 0 : i32
    %c0_i32_0 = arith.constant 0 : i32
    %c0_i32_1 = arith.constant 0 : i32
    return %c0_i32, %c0_i32_0 : i32, i32
  }
  func.func @transform_13(%arg0: i32) -> (i32, i32) {
    %c0_i32 = arith.constant 0 : i32
    %c0_i32_0 = arith.constant 0 : i32
    %c0_i32_1 = arith.constant 0 : i32
    return %c0_i32, %c0_i32_0 : i32, i32
  }
  func.func @transform_14(%arg0: i32) -> (i32, i32) {
    %c0_i32 = arith.constant 0 : i32
    %c0_i32_0 = arith.constant 0 : i32
    %c0_i32_1 = arith.constant 0 : i32
    return %c0_i32, %c0_i32_0 : i32, i32
  }
  func.func @transform_15(%arg0: i32) -> (i32, i32) {
    %c0_i32 = arith.constant 0 : i32
    %c0_i32_0 = arith.constant 0 : i32
    %c0_i32_1 = arith.constant 0 : i32
    return %c0_i32, %c0_i32_0 : i32, i32
  }
  func.func @transform_16(%arg0: i32) -> (i32, i32) {
    %c0_i32 = arith.constant 0 : i32
    %c0_i32_0 = arith.constant 0 : i32
    %c0_i32_1 = arith.constant 0 : i32
    return %c0_i32, %c0_i32_0 : i32, i32
  }
  func.func @transform_17(%arg0: i32) -> (i32, i32) {
    %c0_i32 = arith.constant 0 : i32
    %c0_i32_0 = arith.constant 0 : i32
    %c0_i32_1 = arith.constant 0 : i32
    return %c0_i32, %c0_i32_0 : i32, i32
  }
  func.func @transform_18(%arg0: i32) -> (i32, i32) {
    %c0_i32 = arith.constant 0 : i32
    %c0_i32_0 = arith.constant 0 : i32
    return %arg0, %c0_i32 : i32, i32
  }
}

</mosaic_0001>

<bundles_post_ra>
// kernel: tpu_custom_call.1
= control target key start
LH: loop header
LB: loop body
LE: loop exit
PB: predicated region body
PF: predicated region fallthrough
CT: control target
= control target key end

     0   :  { %s5725_s0 = inlined_call_operand.hbm [shape: f32[32,8,32], index: 0, kind: input, shape index: {}]   ;;  %s5726_s1 = inlined_call_operand.vmem [shape: s32[32,1], index: 1, kind: input, shape index: {}]   ;;  %s5727_s2 = inlined_call_operand.vmem [shape: bf16[32,96], index: 2, kind: input, shape index: {}]   ;;  %s5728_s3 = inlined_call_operand.vmem [shape: f32[1,96], index: 3, kind: input, shape index: {}]   ;;  %s5729_s4 = inlined_call_operand.vmem [shape: bf16[32,32], index: 4, kind: input, shape index: {}]   ;;  %s5730_s5 = inlined_call_operand.vmem [shape: f32[1,32], index: 5, kind: input, shape index: {}]   ;;  %s5731_s6 = inlined_call_operand.vmem [shape: f32[1,32], index: 6, kind: input, shape index: {}]   ;;  %s5732_s7 = inlined_call_operand.vmem [shape: f32[1,32], index: 7, kind: input, shape index: {}]   ;;  %s5733_s8 = inlined_call_operand.vmem [shape: bf16[32,128], index: 8, kind: input, shape index: {}]   ;;  %s5734_s9 = inlined_call_operand.vmem [shape: f32[1,128], index: 9, kind: input, shape index: {}]   ;;  %s5735_s10 = inlined_call_operand.vmem [shape: bf16[128,32], index: 10, kind: input, shape index: {}]   ;;  %s5736_s11 = inlined_call_operand.vmem [shape: f32[1,32], index: 11, kind: input, shape index: {}]   ;;  %s5737_s12 = inlined_call_operand.vmem [shape: f32[1,32], index: 12, kind: input, shape index: {}]   ;;  %s5738_s13 = inlined_call_operand.vmem [shape: f32[1,32], index: 13, kind: input, shape index: {}]   ;;  %s5739_s14 = inlined_call_operand.vmem [shape: bf16[32,32], index: 14, kind: input, shape index: {}]   ;;  %s5740_s15 = inlined_call_operand.vmem [shape: f32[1,32], index: 15, kind: input, shape index: {}]   ;;  %s5741_s16 = inlined_call_operand.vmem [shape: bf16[32,128], index: 16, kind: input, shape index: {}]   ;;  %s5742_s17 = inlined_call_operand.vmem [shape: f32[1,128], index: 17, kind: input, shape index: {}]   ;;  %s5743_s18 = inlined_call_operand.hbm [shape: f32[32,128], index: 18, kind: output, shape index: {}]  }
   0x1   :  { %5756 = sst [smem:[#allocation14_spill]] %s5725_s0 }
   0x2   :  { %5757 = sst [smem:[#allocation15_spill]] %s5726_s1 }
   0x3   :  { %5758 = sst [smem:[#allocation16_spill]] %s5727_s2 }
   0x4   :  { %5759 = sst [smem:[#allocation17_spill]] %s5728_s3 }
   0x5   :  { %5760 = sst [smem:[#allocation18_spill]] %s5729_s4 }
   0x6   :  { %5761 = sst [smem:[#allocation19_spill]] %s5730_s5 }
   0x7   :  { %5762 = sst [smem:[#allocation20_spill]] %s5739_s14 }
   0x8   :  { %5763 = sst [smem:[#allocation21_spill]] %s5740_s15 }
   0x9   :  { %5764 = sst [smem:[#allocation22_spill]] %s5741_s16 }
   0xa   :  { %5765 = sst [smem:[#allocation23_spill]] %s5742_s17 }
   0xb   :  { %5766 = sst [smem:[#allocation24_spill]] %s5743_s18 }
   0xc   :  { %23 = vsyncpa [#allocation3], 0 }
   0xd   :  { %25 = vsyncpa [#allocation3 + $0x1], 0 }
   0xe   :  { %26 = vsyncpa [#allocation4], 0 }
   0xf   :  { %28 = vsyncpa [#allocation4 + $0x1], 0  ;;  %s4033_s27 = smov 0   ;;  %s4035_s28 = smov 0  }
  0x10   :  { %s4037_s29 = smov 0   ;;  %s4039_s30 = smov 0  }
  0x11 LB: > { %5767 = sst [smem:[#allocation8_spill]] %s3915_s27  ;;  %s4054_s0 = sadd.s32 4294967295, %s3927_s30   ;;  %s3927_s30 = sphi %s4039_s30, %s5808_s30   ;;  %s3923_s29 = sphi %s4037_s29, %s5810_s29   ;;  %s3919_s28 = sphi %s4035_s28, %s5812_s28   ;;  %s3915_s27 = sphi %s4033_s27, %s5811_s27  }
  0x12   : > { %5768 = sst [smem:[#allocation9_spill]] %s3923_s29  ;;  %s3405_s19 = sadd.s32 4294967294, %s3927_s30  }
  0x13   : > { %s4058_s1 = sadd.s32 1, %s3927_s30   ;;  %s41_s20 = sadd.s32 1, %s3923_s29 }
  0x14   : > { %5769 = sst [smem:[#allocation10_spill]] %s4058_s1  ;;  %s38_s21 = ssub.s32 %s3927_s30, %s4058_s1 }
  0x15   : > { %p48_p0 = scmp.ne.s32.totalorder %s3923_s29, %s3919_s28  ;;  %p39_p1 = scmp.eq.s32.totalorder %s38_s21, 0 }
  0x16   : > { %p49_p2 = scmp.eq.s32.totalorder %s3927_s30, 0  ;;  %p54_p3 = scmp.ne.s32.totalorder %s3919_s28, %s3915_s27 }
  0x17   : > { %p55_p4 = scmp.eq.s32.totalorder %s4054_s0, 0  ;;  %p440_p7 = scmp.eq.s32.totalorder %s4054_s0, 1 }
  0x18   : > { %s4070_s22 = scalar_select %p39_p1, %s3923_s29, %s41_s20  }
  0x19   : > { %p4072_p5 = por %p49_p2, %p48_p0  ;;  %p4076_p6 = por %p55_p4, %p54_p3 }
  0x1a   : > { %5770 = sst [smem:[#allocation11_spill]] %s4070_s22  ;;  %p446_p8 = scmp.eq.s32.totalorder %s3405_s19, 1 }
  0x1b   : > { %p3593_p10 = scmp.lt.s32.totalorder %s3927_s30, 2  ;;  %p4083_p11 = por %p440_p7, %p48_p0 }
  0x1c   : > { %p4087_p12 = por %p446_p8, %p54_p3  ;;  %s514_s26 = sand.u32 1, %s3923_s29  }
  0x1d   : > { %s5773_s24 = scalar_select %p4083_p11, 1, 0 }
  0x1e   : > { %s5775_s25 = scalar_select %p4087_p12, 1, 0 }
  0x1f   : > { %5774 = sst [smem:[#allocation12_spill]] %s5773_s24  ;;  %s3551_s20 = sshll.u32 %s3927_s30, 7 }
  0x20   : > { %5776 = sst [smem:[#allocation13_spill]] %s5775_s25  ;;  %s3408_s21 = sshll.u32 %s514_s26, 7 }
  0x21   : > { %s5777_s27 = sld [smem:[#allocation14_spill]]  ;;  %s518_s19 = scalar_lea.vmem [#allocation2], %s3408_s21 }
  0x22   : > { %s526_s16 = sshll.u32 %s518_s19, 4  ;;  %p4098_p13 = pnand %p3593_p10, %p4072_p5  ;;  %s527_s16 = int_to_ptr.vmem [resolvable:$true] %s526_s16 }
  0x23   : > { %p3411_p0 = scmp.ge.s32.totalorder %s3927_s30, 1  ;;  %p543_p1 = scmp.lt.s32.totalorder %s3927_s30, 3 }
  0x24   : > { %s515_s29 = scalar_lea.sflag [#allocation3], %s514_s26  ;;  %p3835_p3 = pneg %p4098_p13 }
  0x27   : > { %s5778_s18 = smov %s5777_s27  ;;  %s523_s17 = scalar_lea.hbm %s5777_s27, %s3551_s20 }
  0x28   : > { %s524_s15 = sshll.u32 %s523_s17, 4  ;;  %s3838_s1 = scalar_lea.hbm %s5778_s18, 256  ;;  %s525_s15 = int_to_ptr.hbm [resolvable:$true] %s524_s15 }
  0x29   : > { %s3831_s25 = sshra.s32 %s525_s15, 4  ;;  %s3832_s25 = int_to_ptr.hbm [resolvable:$true] %s3831_s25 }
  0x2a   : > { %s3833_s24 = scalar_lea.hbm %s3832_s25, 128  ;;  %p3839_p5 = scmp.lt.s32.totalorder %s3832_s25, %s5778_s18 }
  0x2b   : > { %p3834_p2 = scmp.ne.s32.totalorder %s3832_s25, %s3833_s24  ;;  %p3840_p8 = scmp.lt.s32.totalorder %s3838_s1, %s3833_s24 }
  0x2d   : > { %p3836_p4 = pnand %p3835_p3, %p3834_p2  ;;  %p3841_p10 = por %p3840_p8, %p3839_p5 }
  0x2f   : > { %p3837_p7 = pneg %p3836_p4 }
  0x31   : > { %p3842_p9 = pnand %p3841_p10, %p3837_p7 }
  0x33   : > { %3845 = shalt.err (!%p3842_p9)
}
  0x34   : > { %s3929_s26 = smov 128   ;;  %s3930_s20 = smov 8  }
  0x35   : > { %3588 = dma.hbm_to_vmem [thread:$0]  (!%p4098_p13), %s525_s15, 2048, %s527_s16, %s515_s29, %s3929_s26, %s3929_s26, %s3930_s20  }
  0x36   : > { %p544_p2 = pnand %p3411_p0, %p543_p1 }
  0x37   : > { %s4119_s21 = sand.u32 (!%p544_p2), 1, %s3919_s28  }
  0x38   : > { %547 = sbr.rel (%p544_p2) target bundleno = 2095 (0x82f), region = 92  ;;  %s3412_s24 = sshll.u32 (!%p544_p2), %s4119_s21, 7 }
  0x39   : > { %s550_s25 = scalar_lea.sflag (!%p544_p2), [#allocation3], %s4119_s21  ;;  %s4123_s19 = scalar_lea.vmem (!%p544_p2), [#allocation2], %s3412_s24 }
  0x3d   : > { %3906 = dma.done.wait (%p4076_p6), %s550_s25, 2048  }
  0x3e   : > { %3908 = vsyncadd (%p4076_p6), %s550_s25, 4294965248  ;;  %s5780_s16 = sld [smem:[#allocation16_spill]]  ;;  %v621_v2 = vld [vmem:[%s4123_s19] sm:$0xff]  ;;  %v622_v3 = vld [vmem:[%s4123_s19 + $0x8] sm:$0xff]  ;;  %vm665_vm0 = vcmask 261120   ;;  %s3931_s1 = smov 96  }
  0x3f   : > { %v635_v4 = vld [vmem:[%s4123_s19 + $0x70] sm:$0xff]  ;;  %v636_v5 = vld [vmem:[%s4123_s19 + $0x78] sm:$0xff]  ;;  %v637_v6 = vpack.c.bf16 %v622_v3, %v621_v2  ;;  %v625_v11 = vld [vmem:[%s4123_s19 + $0x20] sm:$0xff]  ;;  %s5781_s3 = sld [smem:[#allocation17_spill]]  ;;  %v3932_v51 = vmov 0   ;;  %s3414_s22 = sshll.u32 %s4054_s0, 1 }
  0x40   : > { %v644_v7 = vpack.c.bf16 %v636_v5, %v635_v4  ;;  %v623_v8 = vld [vmem:[%s4123_s19 + $0x10] sm:$0xff]  ;;  %v624_v9 = vld [vmem:[%s4123_s19 + $0x18] sm:$0xff]  ;;  %v626_v12 = vld [vmem:[%s4123_s19 + $0x28] sm:$0xff]  ;;  %3637 = vset.pattern.permute.xlu2 %v3932_v51  ;;  %3636 = vset.pattern.permute.xlu1 %v3932_v51  ;;  %p614_p6 = scmp.lt.s32.totalorder %s3414_s22, 3  ;;  %s5782_s24 = sld [smem:[#allocation15_spill]]  ;;  %vm1451_vm1 = vcmask 1043456  }
  0x41   : > { %v638_v10 = vpack.c.bf16 %v624_v9, %v623_v8  ;;  %v639_v13 = vpack.c.bf16 %v626_v12, %v625_v11  ;;  %v627_v14 = vld [vmem:[%s4123_s19 + $0x30] sm:$0xff]  ;;  %v628_v15 = vld [vmem:[%s4123_s19 + $0x38] sm:$0xff]  ;;  %v629_v17 = vld [vmem:[%s4123_s19 + $0x40] sm:$0xff]  ;;  %3638 = vset.pattern.permute.xlu0 %v3932_v51  ;;  %s3933_s14 = smov 64   ;;  %vm1253_vm3 = vcmask 64512   ;;  %s5783_s4 = sld [smem:[#allocation18_spill]] }
  0x42   : > { %v640_v16 = vpack.c.bf16 %v628_v15, %v627_v14  ;;  %v630_v18 = vld [vmem:[%s4123_s19 + $0x48] sm:$0xff]  ;;  %v631_v20 = vld [vmem:[%s4123_s19 + $0x50] sm:$0xff]  ;;  %v632_v21 = vld [vmem:[%s4123_s19 + $0x58] sm:$0xff]  ;;  %s5814_s22 = smov (!%p614_p6, %s3414_s22), 3  ;;  %s5784_s5 = sld [smem:[#allocation19_spill]] }
  0x43   : > { %v641_v19 = vpack.c.bf16 %v630_v18, %v629_v17  ;;  %v642_v22 = vpack.c.bf16 %v632_v21, %v631_v20  ;;  %v633_v23 = vld [vmem:[%s4123_s19 + $0x60] sm:$0xff]  ;;  %v634_v24 = vld [vmem:[%s4123_s19 + $0x68] sm:$0xff]  ;;  %s3415_s2 = sshll.u32 %s5814_s22, 3  ;;  %s5800_s23 = sld [smem:[#allocation22_spill]] }
  0x44   : > { %v3553_v0 = vld [vmem:[%s5780_s16 + $0x8] sm:$0xff]  ;;  %v3552_v1 = vld [vmem:[%s5780_s16] sm:$0xff]  ;;  %v643_v25 = vpack.c.bf16 %v634_v24, %v633_v23  ;;  %s5801_s26 = sld [smem:[#allocation21_spill]]  ;;  %s3413_s20 = sshll.u32 %s4119_s21, 4 }
  0x45   : > { %696 = vmatpush.bf16.msra.mxu0 %v3553_v0  ;;  %3571 = vmatpush.bf16.msra.mxu3 %v3553_v0  ;;  %v4162_v26 = vld [vmem:[%s5781_s3] ss:$0 sm:$0xff]  ;;  %s3570_s15 = sshll.u32 %s4054_s0, 4  ;;  %s611_s17 = scalar_lea.vmem [#allocation5], %s3413_s20 }
  0x46   : > { %s4222_s25 = scalar_lea.vmem %s5782_s24, %s3415_s2  ;;  %s5804_s22 = sld [smem:[#allocation24_spill]] }
  0x49   : > { %697 = vmatpush.bf16.msra.mxu0 %v3552_v1  ;;  %3572 = vmatpush.bf16.msra.mxu3 %v3552_v1  ;;  %v4228_v1 = vld [vmem:[%s4222_s25] sm:$0xff] }
  0x4a   : > { %v759_v4 = vrot.slane %v4228_v1, 1  ;;  %v760_v21 = vrot.slane %v4228_v1, 2 }
  0x4c   : > { %3424 = vmatmul.msk.bf16.vlgmr.msra.gmra.mxu0 %vm665_vm0, %v637_v6  ;;  %3431 = vmatmul.msk.bf16.vlgmr.msra.gmra.mxu3 %vm665_vm0, %v644_v7  ;;  %s3316_s2 = scalar_lea.hbm %s5804_s22, %s3570_s15 }
  0x4d   : > { %s3319_s3 = sshll.u32 %s3316_s2, 4  ;;  %s3320_s3 = int_to_ptr.hbm [resolvable:$true] %s3319_s3 }
  0x4e   : > { %s3875_s24 = sshra.s32 %s3320_s3, 4  ;;  %s3876_s24 = int_to_ptr.hbm [resolvable:$true] %s3875_s24 }
  0x4f   : > { %p3882_p1 = scmp.lt.s32.totalorder %s3876_s24, %s5804_s22 }
  0x5c   : > { %3425 = vmatmul.msk.bf16.gmra.mxu0 %vm665_vm0, %v638_v10 }
  0x6c   : > { %3426 = vmatmul.msk.bf16.gmra.mxu0 %vm665_vm0, %v639_v13  ;;  %v762_v13 = vrot.slane %v4228_v1, 4 }
  0x7c   : > { %3427 = vmatmul.msk.bf16.gmra.mxu0 %vm665_vm0, %v640_v16 }
  0x8c   : > { %3428 = vmatmul.msk.bf16.gmra.mxu0 %vm665_vm0, %v641_v19 }
  0x9c   : > { %3429 = vmatmul.msk.bf16.gmra.mxu0 %vm665_vm0, %v642_v22 }
  0xac   : > { %3430 = vmatmul.msk.bf16.gmra.mxu0 %vm665_vm0, %v643_v25 }
  0xc9   : > { %v699_v27 = vpop.f32.mrf.mxu0 }
  0xca   : > { %v700_v28 = vadd.f32 %v4162_v26, %v699_v27  ;;  %v761_v27 = vrot.slane %v4228_v1, 3 }
  0xcc   : > { %v4165_v29 = vpack.c.bf16 %v700_v28, %v700_v28 }
  0xce   : > { %v870_v30 = vunpack.c.l.b16 %v4165_v29 }
  0xcf   : > { %v734_v31 = vpop.f32.mrf.mxu3 }
  0xd0   : > { %v4168_v32 = vpack.c.b16 %v870_v30, %v870_v30  ;;  %v735_v33 = vadd.f32 %v4162_v26, %v734_v31 }
  0xd1   : > { %v701_v34 = vpop.f32.mrf.mxu0 }
  0xd2   : > { %v702_v35 = vadd.f32 %v4162_v26, %v701_v34  ;;  %872 = vrot.lane.b32.xlu0 %v4168_v32, %s3931_s1  ;;  %v4174_v36 = vpack.c.bf16 %v735_v33, %v735_v33 }
  0xd4   : > { %v4176_v37 = vpack.c.bf16 %v702_v35, %v702_v35  ;;  %v1206_v38 = vunpack.c.l.b16 %v4174_v36 }
  0xd6   : > { %v894_v39 = vunpack.c.l.b16 %v4176_v37  ;;  %v4180_v40 = vpack.c.b16 %v1206_v38, %v1206_v38 }
  0xd7   : > { %v736_v5 = vpop.f32.mrf.mxu3 }
  0xd8   : > { %v4182_v41 = vpack.c.b16 %v894_v39, %v894_v39  ;;  %1208 = vrot.lane.b32.xlu2 %v4180_v40, %s3931_s1  ;;  %v737_v9 = vadd.f32 %v4162_v26, %v736_v5 }
  0xd9   : > { %v704_v42 = vpop.f32.mrf.mxu0 }
  0xda   : > { %v705_v43 = vadd.f32 %v4162_v26, %v704_v42  ;;  %896 = vrot.lane.b32.xlu0 %v4182_v41, %s3931_s1  ;;  %v4243_v12 = vpack.c.bf16 %v737_v9, %v737_v9 }
  0xdc   : > { %v4189_v44 = vpack.c.bf16 %v705_v43, %v705_v43  ;;  %v1230_v17 = vunpack.c.l.b16 %v4243_v12 }
  0xde   : > { %v918_v45 = vunpack.c.l.b16 %v4189_v44  ;;  %v4256_v20 = vpack.c.b16 %v1230_v17, %v1230_v17 }
  0xe0   : > { %v4192_v46 = vpack.c.b16 %v918_v45, %v918_v45 }
  0xe1   : > { %v706_v47 = vpop.f32.mrf.mxu0 }
  0xe2   : > { %v707_v48 = vadd.f32 %v4162_v26, %v706_v47  ;;  %920 = vrot.lane.b32.xlu1 %v4192_v46, %s3931_s1  ;;  %v763_v47 = vrot.slane %v4228_v1, 5 }
  0xe4   : > { %v4197_v49 = vpack.c.bf16 %v707_v48, %v707_v48 }
  0xe6   : > { %v942_v50 = vunpack.c.l.b16 %v4197_v49 }
  0xe8   : > { %v4200_v52 = vpack.c.b16 %v942_v50, %v942_v50 }
  0xe9   : > { %v709_v53 = vpop.f32.mrf.mxu0 }
  0xea   : > { %v710_v54 = vadd.f32 %v4162_v26, %v709_v53  ;;  %944 = vrot.lane.b32.xlu1 %v4200_v52, %s3931_s1 }
  0xec   : > { %v4206_v55 = vpack.c.bf16 %v710_v54, %v710_v54 }
  0xee   : > { %v966_v56 = vunpack.c.l.b16 %v4206_v55 }
  0xf0   : > { %v4209_v57 = vpack.c.b16 %v966_v56, %v966_v56  ;;  %v764_v56 = vrot.slane %v4228_v1, 6 }
  0xf1   : > { %v711_v58 = vpop.f32.mrf.mxu0 }
  0xf2   : > { %v712_v59 = vadd.f32 %v4162_v26, %v711_v58  ;;  %968 = vrot.lane.b32.xlu2 %v4209_v57, %s3931_s1  ;;  %v758_v58 = vld [vmem:[%s4222_s25 + $0x8] sm:$0xff]  ;;  %s3877_s25 = scalar_lea.hbm %s3876_s24, 16 }
  0xf3   : > { %v766_v5 = vrot.slane %v758_v58, 1  ;;  %p3878_p9 = scmp.ne.s32.totalorder %s3876_s24, %s3877_s25 }
  0xf4   : > { %v4214_v60 = vpack.c.bf16 %v712_v59, %v712_v59 }
  0xf5   : > { %p3879_p13 = pnand %p3878_p9, %p4083_p11 }
  0xf6   : > { %v990_v61 = vunpack.c.l.b16 %v4214_v60 }
  0xf7   : > { %p3880_p0 = pneg %p3879_p13 }
  0xf8   : > { %v4217_v62 = vpack.c.b16 %v990_v61, %v990_v61 }
  0xf9   : > { %v714_v63 = vpop.f32.mrf.mxu0 }
  0xfa   : > { %v715_v0 = vadd.f32 %v4162_v26, %v714_v63  ;;  %992 = vrot.lane.b32.xlu2 %v4217_v62, %s3931_s1 }
  0xfc   : > { %v4230_v2 = vpack.c.bf16 %v715_v0, %v715_v0 }
  0xfe   : > { %v1014_v3 = vunpack.c.l.b16 %v4230_v2 }
 0x100   : > { %v4234_v6 = vpack.c.b16 %v1014_v3, %v1014_v3 }
 0x101   : > { %v716_v7 = vpop.f32.mrf.mxu0 }
 0x102   : > { %v717_v8 = vadd.f32 %v4162_v26, %v716_v7  ;;  %1016 = vrot.lane.b32.xlu1 %v4234_v6, %s3931_s1  ;;  %778 = vperm.xlu2 %3637, %v759_v4   ;;  %v768_v4 = vrot.slane %v758_v58, 3 }
 0x104   : > { %v4240_v10 = vpack.c.bf16 %v717_v8, %v717_v8  ;;  %v767_v8 = vrot.slane %v758_v58, 2 }
 0x106   : > { %v1038_v11 = vunpack.c.l.b16 %v4240_v10 }
 0x108   : > { %v4246_v14 = vpack.c.b16 %v1038_v11, %v1038_v11 }
 0x109   : > { %v719_v15 = vpop.f32.mrf.mxu0 }
 0x10a   : > { %v720_v16 = vadd.f32 %v4162_v26, %v719_v15  ;;  %1040 = vrot.lane.b32.xlu0 %v4246_v14, %s3931_s1  ;;  %790 = vperm.xlu2 %3637, %v762_v13   ;;  %v769_v15 = vrot.slane %v758_v58, 4 }
 0x10b   : > { %774 = vperm.xlu1 %3636, %v4228_v1  }
 0x10c   : > { %v4253_v18 = vpack.c.bf16 %v720_v16, %v720_v16  ;;  %v770_v16 = vrot.slane %v758_v58, 5 }
 0x10e   : > { %v1062_v19 = vunpack.c.l.b16 %v4253_v18 }
 0x110   : > { %v4259_v22 = vpack.c.b16 %v1062_v19, %v1062_v19 }
 0x111   : > { %v721_v23 = vpop.f32.mrf.mxu0 }
 0x112   : > { %v722_v24 = vadd.f32 %v4162_v26, %v721_v23  ;;  %1232 = vrot.lane.b32.xlu0 %v4256_v20, %s3931_s1  ;;  %1064 = vrot.lane.b32.xlu2 %v4259_v22, %s3931_s1 }
 0x113   : > { %782 = vperm.xlu1 %3636, %v760_v21  }
 0x114   : > { %v4266_v25 = vpack.c.bf16 %v722_v24, %v722_v24  ;;  %v771_v24 = vrot.slane %v758_v58, 6 }
 0x116   : > { %v1086_v30 = vunpack.c.l.b16 %v4266_v25 }
 0x118   : > { %v4274_v35 = vpack.c.b16 %v1086_v30, %v1086_v30 }
 0x119   : > { %v724_v28 = vpop.f32.mrf.mxu0 }
 0x11a   : > { %v725_v31 = vadd.f32 %v4162_v26, %v724_v28  ;;  %786 = vperm.xlu0 %3638, %v761_v27   ;;  %v772_v27 = vrot.slane %v758_v58, 7 }
 0x11c   : > { %v4271_v33 = vpack.c.bf16 %v725_v31, %v725_v31 }
 0x11e   : > { %v1110_v34 = vunpack.c.l.b16 %v4271_v33 }
 0x120   : > { %v4276_v38 = vpack.c.b16 %v1110_v34, %v1110_v34 }
 0x121   : > { %v726_v39 = vpop.f32.mrf.mxu0 }
 0x122   : > { %v727_v42 = vadd.f32 %v4162_v26, %v726_v39  ;;  %1112 = vrot.lane.b32.xlu1 %v4276_v38, %s3931_s1  ;;  %1088 = vrot.lane.b32.xlu0 %v4274_v35, %s3931_s1 }
 0x124   : > { %v4283_v43 = vpack.c.bf16 %v727_v42, %v727_v42 }
 0x126   : > { %v1134_v45 = vunpack.c.l.b16 %v4283_v43 }
 0x128   : > { %v4287_v48 = vpack.c.b16 %v1134_v45, %v1134_v45 }
 0x129   : > { %v729_v50 = vpop.f32.mrf.mxu0 }
 0x12a   : > { %v730_v51 = vadd.f32 %v4162_v26, %v729_v50  ;;  %1136 = vrot.lane.b32.xlu2 %v4287_v48, %s3931_s1  ;;  %794 = vperm.xlu1 %3636, %v763_v47  }
 0x12c   : > { %v4292_v53 = vpack.c.bf16 %v730_v51, %v730_v51 }
 0x12e   : > { %v1158_v54 = vunpack.c.l.b16 %v4292_v53 }
 0x130   : > { %v4297_v59 = vpack.c.b16 %v1158_v54, %v1158_v54 }
 0x131   : > { %v731_v61 = vpop.f32.mrf.mxu0 }
 0x132   : > { %v732_v63 = vadd.f32 %v4162_v26, %v731_v61  ;;  %806 = vperm.xlu2 %3637, %v758_v58   ;;  %798 = vperm.xlu1 %3636, %v764_v56   ;;  %v765_v26 = vrot.slane %v4228_v1, 7  ;;  %v1209_v9 = vpop.permute.xlu2 %1208 }
 0x133   : > { %1160 = vrot.lane.b32.xlu0 %v4297_v59, %s3931_s1 }
 0x134   : > { %v4302_v0 = vpack.c.bf16 %v732_v63, %v732_v63 }
 0x136   : > { %v1182_v3 = vunpack.c.l.b16 %v4302_v0 }
 0x138   : > { %v4305_v7 = vpack.c.b16 %v1182_v3, %v1182_v3 }
 0x13a   : > { %818 = vperm.xlu2 %3637, %v768_v4   ;;  %1184 = vrot.lane.b32.xlu1 %v4305_v7, %s3931_s1 }
 0x13b   : > { %810 = vperm.xlu0 %3638, %v766_v5  }
 0x142   : > { %802 = vperm.xlu1 %3636, %v765_v26   ;;  %1446 = vrot.lane.b32.xlu2 %v4168_v32, %s3933_s14 }
 0x143   : > { %814 = vperm.xlu0 %3638, %v767_v8  }
 0x144   : > { %v873_v11 = vpop.permute.xlu0 %872 }
 0x145   : > { %v878_v13 = vsel %vm665_vm0, %v873_v11, 0  ;;  %v755_v11 = vlaneseq }
 0x146   : > { %887 = vmatpush.bf16.xpose.msrb.mxu3 %v878_v13 }
 0x14a   : > { %822 = vperm.xlu1 %3636, %v769_v15   ;;  %1510 = vrot.lane.b32.xlu2 %v4200_v52, %s3933_s14 }
 0x14b   : > { %826 = vperm.xlu0 %3638, %v770_v16   ;;  %v4402_v16 = vand.u32 127, %v755_v11 }
 0x14c   : > { %v897_v1 = vpop.permute.xlu0 %896  ;;  %v969_v17 = vpop.permute.xlu2 %968 }
 0x14d   : > { %3432 = vmatmul.msk.bf16.vlgmr.msrb.gmra.mxu3 %vm665_vm0, %v4165_v29  ;;  %v902_v32 = vsel %vm665_vm0, %v897_v1, 0  ;;  %v974_v19 = vsel %vm665_vm0, %v969_v17, 0  ;;  %v3934_v17 = vmov -1e+09  }
 0x14e   : > { %911 = vmatpush.bf16.xpose.msra.mxu2 %v902_v32 }
 0x152   : > { %1468 = vrot.lane.b32.xlu1 %v4182_v41, %s3933_s14  ;;  %1531 = vrot.lane.b32.xlu2 %v4209_v57, %s3933_s14 }
 0x153   : > { %1552 = vrot.lane.b32.xlu0 %v4217_v62, %s3933_s14 }
 0x154   : > { %v921_v52 = vpop.permute.xlu1 %920  ;;  %v993_v21 = vpop.permute.xlu2 %992 }
 0x155   : > { %v926_v23 = vsel %vm665_vm0, %v921_v52, 0  ;;  %3433 = vmatmul.msk.bf16.vlgmr.msra.gmra.mxu2 %vm665_vm0, %v4176_v37  ;;  %v998_v29 = vsel %vm665_vm0, %v993_v21, 0 }
 0x156   : > { %983 = vmatpush.bf16.xpose.msrb.mxu2 %v974_v19  ;;  %935 = vmatpush.bf16.xpose.msra.mxu3 %v926_v23 }
 0x15a   : > { %830 = vperm.xlu1 %3636, %v771_v24   ;;  %1594 = vrot.lane.b32.xlu2 %v4246_v14, %s3933_s14 }
 0x15c   : > { %v945_v41 = vpop.permute.xlu1 %944  ;;  %v4331_v57 = vpop.permute.xlu2 %778 }
 0x15d   : > { %3434 = vmatmul.msk.bf16.vlgmr.msra.gmra.mxu3 %vm665_vm0, %v4189_v44  ;;  %v950_v62 = vsel %vm665_vm0, %v945_v41, 0  ;;  %v780_v19 = vperm.slane %v4331_v57, 0 }
 0x15e   : > { %1007 = vmatpush.bf16.xpose.msrb.mxu3 %v998_v29  ;;  %959 = vmatpush.bf16.xpose.msra.mxu1 %v950_v62 }
 0x15f   : > { %vm838_vm4 = vcmp.lt.s32.totalorder %v4402_v16, %v780_v19 }
 0x160   : > { %v854_v41 = vsel %vm838_vm4, 0.0, %v3934_v17 }
 0x162   : > { %834 = vperm.xlu1 %3636, %v772_v27  }
 0x164   : > { %v4336_v37 = vpop.permute.xlu2 %790 }
 0x165   : > { %3435 = vmatmul.msk.bf16.vlgmr.msra.gmra.mxu1 %vm665_vm0, %v4197_v49  ;;  %3436 = vmatmul.msk.bf16.vlgmr.msrb.gmra.mxu2 %vm665_vm0, %v4206_v55 }
 0x16a   : > { %1489 = vrot.lane.b32.xlu1 %v4192_v46, %s3933_s14 }
 0x16c   : > { %v1065_v14 = vpop.permute.xlu2 %1064 }
 0x16d   : > { %3437 = vmatmul.msk.bf16.vlgmr.msrb.gmra.mxu3 %vm665_vm0, %v4214_v60  ;;  %v1070_v44 = vsel %vm665_vm0, %v1065_v14, 0 }
 0x16e   : > { %1079 = vmatpush.bf16.xpose.msra.mxu3 %v1070_v44 }
 0x172   : > { %1573 = vrot.lane.b32.xlu1 %v4234_v6, %s3933_s14  ;;  %v1214_v6 = vsel %vm665_vm0, %v1209_v9, 0 }
 0x174   : > { %v1017_v28 = vpop.permute.xlu1 %1016 }
 0x175   : > { %v1022_v30 = vsel %vm665_vm0, %v1017_v28, 0 }
 0x176   : > { %1031 = vmatpush.bf16.xpose.msrb.mxu1 %v1022_v30 }
 0x17c   : > { %v1041_v49 = vpop.permute.xlu0 %1040 }
 0x17d   : > { %v1046_v55 = vsel %vm665_vm0, %v1041_v49, 0  ;;  %3438 = vmatmul.msk.bf16.vlgmr.msrb.gmra.mxu1 %vm665_vm0, %v4230_v2  ;;  %3440 = vmatmul.msk.bf16.vlgmr.msra.gmra.mxu3 %vm665_vm0, %v4253_v18  ;;  %v775_v46 = vpop.permute.xlu1 %774 }
 0x17e   : > { %1055 = vmatpush.bf16.xpose.msra.mxu2 %v1046_v55 }
 0x184   : > { %v1137_v60 = vpop.permute.xlu2 %1136  ;;  %v1233_v31 = vpop.permute.xlu0 %1232 }
 0x185   : > { %v1142_v34 = vsel %vm665_vm0, %v1137_v60, 0  ;;  %3439 = vmatmul.msk.bf16.vlgmr.msra.gmra.mxu2 %vm665_vm0, %v4240_v10  ;;  %v4359_v39 = vpop.permute.xlu1 %782  ;;  %v1238_v58 = vsel %vm665_vm0, %v1233_v31, 0  ;;  %v792_v60 = vperm.slane %v4336_v37, 0 }
 0x186   : > { %1151 = vmatpush.bf16.xpose.msrb.mxu3 %v1142_v34 }
 0x187   : > { %vm841_vm6 = vcmp.lt.s32.totalorder %v4402_v16, %v792_v60 }
 0x18c   : > { %v4361_v42 = vpop.permute.xlu0 %786  ;;  %v4365_v2 = vpop.permute.xlu2 %806 }
 0x18d   : > { %3443 = vmatmul.msk.bf16.vlgmr.msrb.gmra.mxu3 %vm665_vm0, %v4283_v43  ;;  %v788_v57 = vperm.slane %v4361_v42, 0 }
 0x18e   : > { %1223 = vmatpush.bf16.xpose.msra.mxu3 %v1214_v6 }
 0x18f   : > { %vm840_vm5 = vcmp.lt.s32.totalorder %v4402_v16, %v788_v57 }
 0x190   : > { %v856_v31 = vsel %vm840_vm5, 0.0, %v3934_v17 }
 0x194   : > { %v1113_v18 = vpop.permute.xlu1 %1112  ;;  %v1089_v47 = vpop.permute.xlu0 %1088 }
 0x195   : > { %v1118_v45 = vsel %vm665_vm0, %v1113_v18, 0  ;;  %v1094_v50 = vsel %vm665_vm0, %v1089_v47, 0  ;;  %v4375_v51 = vpop.permute.xlu2 %818 }
 0x196   : > { %1127 = vmatpush.bf16.xpose.msrb.mxu2 %v1118_v45  ;;  %1103 = vmatpush.bf16.xpose.msra.mxu1 %v1094_v50  ;;  %v857_v45 = vsel %vm841_vm6, 0.0, %v3934_v17 }
 0x19c   : > { %v4369_v10 = vpop.permute.xlu1 %794 }
 0x19d   : > { %3442 = vmatmul.msk.bf16.vlgmr.msrb.gmra.mxu2 %vm665_vm0, %v4271_v33  ;;  %3446 = vmatmul.msk.bf16.vlgmr.msra.gmra.mxu3 %vm665_vm0, %v4174_v36  ;;  %v1447_v61 = vpop.permute.xlu2 %1446  ;;  %v796_v50 = vperm.slane %v4369_v10, 0 }
 0x19e   : > { %3441 = vmatmul.msk.bf16.vlgmr.msra.gmra.mxu1 %vm665_vm0, %v4266_v25  ;;  %v1453_v36 = vsel %vm1451_vm1, %v1447_v61, 0 }
 0x19f   : > { %vm842_vm7 = vcmp.lt.s32.totalorder %v4402_v16, %v796_v50 }
 0x1a0   : > { %v858_v61 = vsel %vm842_vm7, 0.0, %v3934_v17 }
 0x1a4   : > { %v4379_v43 = vpop.permute.xlu1 %798 }
 0x1a5   : > { %v1161_v54 = vpop.permute.xlu0 %1160  ;;  %v1511_v25 = vpop.permute.xlu2 %1510  ;;  %v800_v11 = vperm.slane %v4379_v43, 0  ;;  %v820_v43 = vperm.slane %v4375_v51, 0 }
 0x1a6   : > { %v1166_v56 = vsel %vm665_vm0, %v1161_v54, 0  ;;  %v1516_v4 = vsel %vm1451_vm1, %v1511_v25, 0 }
 0x1a7   : > { %1175 = vmatpush.bf16.xpose.msrb.mxu1 %v1166_v56  ;;  %vm843_vm9 = vcmp.lt.s32.totalorder %v4402_v16, %v800_v11  ;;  %vm848_vm12 = vcmp.lt.s32.totalorder %v4402_v16, %v820_v43 }
 0x1ac   : > { %v1185_v33 = vpop.permute.xlu1 %1184 }
 0x1ad   : > { %v1190_v63 = vsel %vm665_vm0, %v1185_v33, 0  ;;  %v4394_v26 = vpop.permute.xlu0 %810  ;;  %v1532_v8 = vpop.permute.xlu2 %1531 }
 0x1ae   : > { %3444 = vmatmul.msk.bf16.vlgmr.msrb.gmra.mxu1 %vm665_vm0, %v4292_v53  ;;  %1199 = vmatpush.bf16.xpose.msra.mxu2 %v1190_v63  ;;  %v1537_v13 = vsel %vm1451_vm1, %v1532_v8, 0  ;;  %v784_v8 = vperm.slane %v4359_v39, 0  ;;  %v812_v19 = vperm.slane %v4394_v26, 0  ;;  %v859_v39 = vsel %vm843_vm9, 0.0, %v3934_v17 }
 0x1af   : > { %1247 = vmatpush.bf16.xpose.msra.mxu1 %v1238_v58 }
 0x1b0   : > { %vm839_vm8 = vcmp.lt.s32.totalorder %v4402_v16, %v784_v8  ;;  %vm846_vm11 = vcmp.lt.s32.totalorder %v4402_v16, %v812_v19 }
 0x1b1   : > { %v862_v51 = vsel %vm846_vm11, 0.0, %v3934_v17 }
 0x1b4   : > { %v4387_v3 = vpop.permute.xlu1 %802 }
 0x1b5   : > { %3445 = vmatmul.msk.bf16.vlgmr.msra.gmra.mxu2 %vm665_vm0, %v4302_v0  ;;  %v4400_v15 = vpop.permute.xlu0 %814  ;;  %v776_v0 = vperm.slane %v775_v46, 0  ;;  %v4527_v19 = vpop.permute.xlu2 %1594 }
 0x1b6   : > { %1462 = vmatpush.bf16.msrb.mxu2 %v1453_v36 }
 0x1b7   : > { %vm837_vm2 = vcmp.lt.s32.totalorder %v4402_v16, %v776_v0 }
 0x1ba   : > { %1525 = vmatpush.bf16.msra.mxu2 %v1516_v4 }
 0x1bc   : > { %v4392_v5 = vpop.permute.xlu1 %822 }
 0x1bd   : > { %v4409_v52 = vpop.permute.xlu0 %826 }
 0x1be   : > { %3447 = vmatmul.msk.bf16.vlgmr.msra.gmra.mxu1 %vm665_vm0, %v4243_v12  ;;  %v853_v12 = vsel %vm837_vm2, 0.0, %v3934_v17 }
 0x1c4   : > { %v1469_v53 = vpop.permute.xlu1 %1468 }
 0x1c5   : > { %v1474_v9 = vsel %vm1451_vm1, %v1469_v53, 0  ;;  %v1553_v14 = vpop.permute.xlu0 %1552 }
 0x1c6   : > { %1483 = vmatpush.bf16.msrb.mxu3 %v1474_v9  ;;  %v1558_v49 = vsel %vm1451_vm1, %v1553_v14, 0  ;;  %v816_v14 = vperm.slane %v4400_v15, 0 }
 0x1c8   : > { %vm847_vm14 = vcmp.lt.s32.totalorder %v4402_v16, %v816_v14 }
 0x1ca   : > { %1546 = vmatpush.bf16.msra.mxu3 %v1537_v13  ;;  %v804_v13 = vperm.slane %v4387_v3, 0 }
 0x1cc   : > { %v4404_v1 = vpop.permute.xlu1 %830  ;;  %vm844_vm10 = vcmp.lt.s32.totalorder %v4402_v16, %v804_v13 }
 0x1cd   : > { %v860_v3 = vsel %vm844_vm10, 0.0, %v3934_v17 }
 0x1d0   : > { %v889_v32 = vpop.f32.mrf.mxu3 }
 0x1d1   : > { %v4411_v21 = vadd.f32 %v889_v32, %v853_v12 }
 0x1d3   : > { %v1254_v23 = vsel %vm1253_vm3, %v4411_v21, -inf }
 0x1d4   : > { %v4415_v29 = vpop.permute.xlu1 %834  ;;  %1255 = vmax.xlane.f32.xlu2 %v1254_v23 }
 0x1d8   : > { %v891_v24 = vpop.f32.mrf.mxu3  ;;  %v913_v62 = vpop.f32.mrf.mxu2 }
 0x1d9   : > { %v4419_v27 = vadd.f32 %v913_v62, %v854_v41  ;;  %v808_v41 = vperm.slane %v4365_v2, 0  ;;  %v864_v2 = vsel %vm848_vm12, 0.0, %v3934_v17 }
 0x1db   : > { %v1257_v44 = vsel %vm1253_vm3, %v4419_v27, -inf  ;;  %vm845_vm13 = vcmp.lt.s32.totalorder %v4402_v16, %v808_v41 }
 0x1dc   : > { %v1490_v28 = vpop.permute.xlu1 %1489  ;;  %1258 = vmax.xlane.f32.xlu0 %v1257_v44  ;;  %v861_v15 = vsel %vm845_vm13, 0.0, %v3934_v17 }
 0x1dd   : > { %v1495_v30 = vsel %vm1451_vm1, %v1490_v28, 0 }
 0x1de   : > { %1504 = vmatpush.bf16.msrb.mxu1 %v1495_v30 }
 0x1e0   : > { %v915_v55 = vpop.f32.mrf.mxu2  ;;  %v937_v46 = vpop.f32.mrf.mxu3 }
 0x1e2   : > { %1567 = vmatpush.bf16.msra.mxu1 %v1558_v49  ;;  %v961_v34 = vpop.f32.mrf.mxu1 }
 0x1e3   : > { %v4429_v6 = vadd.f32 %v961_v34, %v856_v31  ;;  %v863_v34 = vsel %vm847_vm14, 0.0, %v3934_v17 }
 0x1e5   : > { %v1263_v42 = vsel %vm1253_vm3, %v4429_v6, -inf }
 0x1e6   : > { %1264 = vmax.xlane.f32.xlu1 %v1263_v42 }
 0x1e8   : > { %v939_v18 = vpop.f32.mrf.mxu3  ;;  %v985_v47 = vpop.f32.mrf.mxu2 }
 0x1e9   : > { %v4436_v54 = vadd.f32 %v985_v47, %v857_v45  ;;  %v824_v47 = vperm.slane %v4392_v5, 0 }
 0x1ea   : > { %v963_v37 = vpop.f32.mrf.mxu1 }
 0x1eb   : > { %v1266_v56 = vsel %vm1253_vm3, %v4436_v54, -inf  ;;  %vm849_vm15 = vcmp.lt.s32.totalorder %v4402_v16, %v824_v47 }
 0x1ec   : > { %1615 = vrot.lane.b32.xlu2 %v4259_v22, %s3933_s14 }
 0x1ee   : > { %1267 = vmax.xlane.f32.xlu1 %v1266_v56 }
 0x1f0   : > { %v987_v58 = vpop.f32.mrf.mxu2  ;;  %v1009_v33 = vpop.f32.mrf.mxu3  ;;  %1636 = vrot.lane.b32.xlu0 %v4274_v35, %s3933_s14  ;;  %v855_v35 = vsel %vm839_vm8, 0.0, %v3934_v17 }
 0x1f1   : > { %v4446_v10 = vadd.f32 %v1009_v33, %v858_v61  ;;  %v4455_v0 = vadd.f32 %v937_v46, %v855_v35  ;;  %v832_v61 = vperm.slane %v4404_v1, 0  ;;  %v865_v33 = vsel %vm849_vm15, 0.0, %v3934_v17 }
 0x1f2   : > { %v836_v1 = vperm.slane %v4415_v29, 0 }
 0x1f3   : > { %v1269_v63 = vsel %vm1253_vm3, %v4446_v10, -inf  ;;  %v1260_v23 = vsel %vm1253_vm3, %v4455_v0, -inf  ;;  %vm851_vm2 = vcmp.lt.s32.totalorder %v4402_v16, %v832_v61 }
 0x1f4   : > { %vm852_vm5 = vcmp.lt.s32.totalorder %v4402_v16, %v836_v1 }
 0x1f6   : > { %1270 = vmax.xlane.f32.xlu1 %v1269_v63 }
 0x1f8   : > { %v1011_v22 = vpop.f32.mrf.mxu3 }
 0x1fa   : > { %v1033_v36 = vpop.f32.mrf.mxu1 }
 0x1fb   : > { %v4464_v24 = vadd.f32 %v1033_v36, %v859_v39  ;;  %v828_v36 = vperm.slane %v4409_v52, 0  ;;  %v868_v52 = vsel %vm852_vm5, 0.0, %v3934_v17 }
 0x1fd   : > { %v1272_v26 = vsel %vm1253_vm3, %v4464_v24, -inf  ;;  %vm850_vm4 = vcmp.lt.s32.totalorder %v4402_v16, %v828_v36 }
 0x200   : > { %v1081_v25 = vpop.f32.mrf.mxu3 }
 0x201   : > { %v4488_v46 = vadd.f32 %v1081_v25, %v861_v15  ;;  %v867_v25 = vsel %vm851_vm2, 0.0, %v3934_v17 }
 0x202   : > { %v1035_v4 = vpop.f32.mrf.mxu1 }
 0x203   : > { %v1278_v50 = vsel %vm1253_vm3, %v4488_v46, -inf }
 0x208   : > { %v1057_v53 = vpop.f32.mrf.mxu2  ;;  %v1083_v9 = vpop.f32.mrf.mxu3 }
 0x209   : > { %v4468_v62 = vadd.f32 %v1057_v53, %v860_v3  ;;  %v866_v9 = vsel %vm850_vm4, 0.0, %v3934_v17 }
 0x20b   : > { %v1275_v30 = vsel %vm1253_vm3, %v4468_v62, -inf }
 0x210   : > { %v1059_v12 = vpop.f32.mrf.mxu2  ;;  %v1153_v32 = vpop.f32.mrf.mxu3 }
 0x211   : > { %v4482_v49 = vadd.f32 %v1153_v32, %v864_v2 }
 0x213   : > { %v1287_v42 = vsel %vm1253_vm3, %v4482_v49, -inf }
 0x215   : > { %1261 = vmax.xlane.f32.xlu2 %v1260_v23 }
 0x218   : > { %v1155_v57 = vpop.f32.mrf.mxu3 }
 0x21a   : > { %1273 = vmax.xlane.f32.xlu0 %v1272_v26 }
 0x21b   : > { %v1105_v44 = vpop.f32.mrf.mxu1 }
 0x21c   : > { %v4478_v28 = vadd.f32 %v1105_v44, %v862_v51 }
 0x21d   : > { %1276 = vmax.xlane.f32.xlu2 %v1275_v30  ;;  %v4540_v30 = vpop.permute.xlu1 %1573 }
 0x21e   : > { %v1281_v55 = vsel %vm1253_vm3, %v4478_v28, -inf }
 0x21f   : > { %1282 = vmax.xlane.f32.xlu1 %v1281_v55 }
 0x220   : > { %v1129_v60 = vpop.f32.mrf.mxu2  ;;  %v1225_v31 = vpop.f32.mrf.mxu3 }
 0x221   : > { %v4493_v18 = vadd.f32 %v1129_v60, %v863_v34  ;;  %v4510_v4 = vadd.f32 %v1225_v31, %v867_v25 }
 0x222   : > { %1288 = vmax.xlane.f32.xlu0 %v1287_v42 }
 0x223   : > { %v1107_v45 = vpop.f32.mrf.mxu1  ;;  %v1284_v37 = vsel %vm1253_vm3, %v4493_v18, -inf  ;;  %v1296_v53 = vsel %vm1253_vm3, %v4510_v4, -inf }
 0x225   : > { %1279 = vmax.xlane.f32.xlu2 %v1278_v50 }
 0x227   : > { %1285 = vmax.xlane.f32.xlu1 %v1284_v37 }
 0x228   : > { %v1131_v56 = vpop.f32.mrf.mxu2  ;;  %v1227_v58 = vpop.f32.mrf.mxu3 }
 0x22b   : > { %v1177_v63 = vpop.f32.mrf.mxu1 }
 0x22c   : > { %v4503_v22 = vadd.f32 %v1177_v63, %v865_v33 }
 0x22e   : > { %v1290_v5 = vsel %vm1253_vm3, %v4503_v22, -inf }
 0x22f   : > { %1291 = vmax.xlane.f32.xlu0 %v1290_v5 }
 0x233   : > { %v1179_v8 = vpop.f32.mrf.mxu1 }
 0x237   : > { %1297 = vmax.xlane.f32.xlu0 %v1296_v53 }
 0x238   : > { %v1201_v11 = vpop.f32.mrf.mxu2 }
 0x239   : > { %v4518_v35 = vadd.f32 %v1201_v11, %v866_v9 }
 0x23b   : > { %v1249_v13 = vpop.f32.mrf.mxu1  ;;  %v1293_v12 = vsel %vm1253_vm3, %v4518_v35, -inf }
 0x23c   : > { %v4523_v29 = vadd.f32 %v1249_v13, %v868_v52  ;;  %1294 = vmax.xlane.f32.xlu2 %v1293_v12 }
 0x23e   : > { %v1299_v32 = vsel %vm1253_vm3, %v4523_v29, -inf }
 0x23f   : > { %1300 = vmax.xlane.f32.xlu0 %v1299_v32 }
 0x240   : > { %v1203_v39 = vpop.f32.mrf.mxu2 }
 0x243   : > { %v1251_v23 = vpop.f32.mrf.mxu1 }
 0x247   : > { %v1256_v16 = vpop.xlane.xlu2 %1255 }
 0x248   : > { %v1302_v43 = vsub.f32 %v4411_v21, %v1256_v16 }
 0x24a   : > { %v1318_v3 = vmul.f32 1.442695, %v1302_v43 }
 0x24c   : > { %3649 = vpow2.f32 %v1318_v3 }
 0x24f   : > { %v1616_v17 = vpop.permute.xlu2 %1615  ;;  %v1259_v41 = vpop.xlane.xlu0 %1258 }
 0x250   : > { %v1303_v57 = vsub.f32 %v4419_v27, %v1259_v41  ;;  %v1621_v26 = vsel %vm1451_vm1, %v1616_v17, 0 }
 0x251   : > { %1630 = vmatpush.bf16.msrb.mxu0 %v1621_v26 }
 0x252   : > { %v4532_v14 = vpop.eup %3649  ;;  %v1320_v51 = vmul.f32 1.442695, %v1303_v57 }
 0x253   : > { %v1350_v44 = vsel %vm1253_vm3, %v4532_v14, 0.0 }
 0x254   : > { %3651 = vpow2.f32 %v1320_v51  ;;  %1351 = vadd.xlane.f32.xlu1 %v1350_v44 }
 0x259   : > { %v1265_v27 = vpop.xlane.xlu1 %1264 }
 0x25a   : > { %v4536_v2 = vpop.eup %3651  ;;  %v1305_v31 = vsub.f32 %v4429_v6, %v1265_v27 }
 0x25b   : > { %v1353_v21 = vsel %vm1253_vm3, %v4536_v2, 0.0 }
 0x25c   : > { %1354 = vadd.xlane.f32.xlu1 %v1353_v21  ;;  %v1324_v50 = vmul.f32 1.442695, %v1305_v31 }
 0x261   : > { %v1268_v45 = vpop.xlane.xlu1 %1267 }
 0x262   : > { %v4542_v55 = vpop.permute.xlu0 %1636  ;;  %v1306_v33 = vsub.f32 %v4436_v54, %v1268_v45 }
 0x264   : > { %v1326_v63 = vmul.f32 1.442695, %v1306_v33 }
 0x288   : > { %v1262_v15 = vpop.xlane.xlu2 %1261 }
 0x289   : > { %v1304_v60 = vsub.f32 %v4455_v0, %v1262_v15 }
 0x28b   : > { %v1322_v34 = vmul.f32 1.442695, %v1304_v60 }
 0x28d   : > { %3653 = vpow2.f32 %v1322_v34  ;;  %v1274_v42 = vpop.xlane.xlu0 %1273 }
 0x28e   : > { %v1308_v47 = vsub.f32 %v4464_v24, %v1274_v42  ;;  %v1271_v24 = vpop.xlane.xlu1 %1270  ;;  %v1579_v42 = vsel %vm1451_vm1, %v4540_v30, 0  ;;  %v1600_v30 = vsel %vm1451_vm1, %v4527_v19, 0 }
 0x28f   : > { %v1307_v54 = vsub.f32 %v4446_v10, %v1271_v24 }
 0x290   : > { %v1330_v37 = vmul.f32 1.442695, %v1308_v47  ;;  %v1277_v56 = vpop.xlane.xlu2 %1276 }
 0x291   : > { %v1309_v58 = vsub.f32 %v4468_v62, %v1277_v56  ;;  %v1328_v53 = vmul.f32 1.442695, %v1307_v54 }
 0x292   : > { %3655 = vpow2.f32 %v1330_v37 }
 0x293   : > { %v4548_v61 = vpop.eup %3653  ;;  %3657 = vpow2.f32 %v1324_v50  ;;  %v1332_v0 = vmul.f32 1.442695, %v1309_v58 }
 0x294   : > { %v1356_v6 = vsel %vm1253_vm3, %v4548_v61, 0.0 }
 0x295   : > { %3659 = vpow2.f32 %v1332_v0  ;;  %1357 = vadd.xlane.f32.xlu0 %v1356_v6  ;;  %v1289_v12 = vpop.xlane.xlu0 %1288 }
 0x296   : > { %3661 = vpow2.f32 %v1326_v63  ;;  %v1283_v9 = vpop.xlane.xlu1 %1282  ;;  %v1313_v23 = vsub.f32 %v4482_v49, %v1289_v12 }
 0x297   : > { %3663 = vpow2.f32 %v1328_v53  ;;  %v1311_v52 = vsub.f32 %v4478_v28, %v1283_v9 }
 0x298   : > { %v4553_v5 = vpop.eup %3655  ;;  %v1280_v32 = vpop.xlane.xlu2 %1279  ;;  %v1340_v43 = vmul.f32 1.442695, %v1313_v23 }
 0x299   : > { %v4555_v36 = vpop.eup %3657  ;;  %v1368_v62 = vsel %vm1253_vm3, %v4553_v5, 0.0  ;;  %v1336_v10 = vmul.f32 1.442695, %v1311_v52  ;;  %v1310_v27 = vsub.f32 %v4488_v46, %v1280_v32 }
 0x29a   : > { %1369 = vadd.xlane.f32.xlu2 %v1368_v62  ;;  %v1359_v8 = vsel %vm1253_vm3, %v4555_v36, 0.0 }
 0x29b   : > { %v4559_v25 = vpop.eup %3659  ;;  %3665 = vpow2.f32 %v1336_v10  ;;  %v1334_v34 = vmul.f32 1.442695, %v1310_v27  ;;  %v1642_v10 = vsel %vm1451_vm1, %v4542_v55, 0 }
 0x29c   : > { %v1371_v1 = vsel %vm1253_vm3, %v4559_v25, 0.0  ;;  %v4566_v11 = vpop.eup %3661  ;;  %3667 = vpow2.f32 %v1340_v43 }
 0x29d   : > { %1360 = vadd.xlane.f32.xlu0 %v1359_v8  ;;  %1372 = vadd.xlane.f32.xlu1 %v1371_v1  ;;  %v1362_v13 = vsel %vm1253_vm3, %v4566_v11, 0.0  ;;  %v4571_v39 = vpop.eup %3663 }
 0x29e   : > { %v1365_v16 = vsel %vm1253_vm3, %v4571_v39, 0.0  ;;  %v1286_v26 = vpop.xlane.xlu1 %1285 }
 0x29f   : > { %v1312_v60 = vsub.f32 %v4493_v18, %v1286_v26 }
 0x2a1   : > { %v4576_v17 = vpop.eup %3665  ;;  %v1338_v45 = vmul.f32 1.442695, %v1312_v60 }
 0x2a2   : > { %v1377_v41 = vsel %vm1253_vm3, %v4576_v17, 0.0  ;;  %v4585_v57 = vpop.eup %3667 }
 0x2a5   : > { %1363 = vadd.xlane.f32.xlu0 %v1362_v13 }
 0x2ad   : > { %1366 = vadd.xlane.f32.xlu0 %v1365_v16 }
 0x2af   : > { %v1295_v3 = vpop.xlane.xlu2 %1294 }
 0x2b0   : > { %v1315_v28 = vsub.f32 %v4518_v35, %v1295_v3 }
 0x2b2   : > { %1678 = vrot.lane.b32.xlu2 %v4287_v48, %s3933_s14  ;;  %v1344_v49 = vmul.f32 1.442695, %v1315_v28  ;;  %v1383_v48 = vsel %vm1253_vm3, %v4585_v57, 0.0 }
 0x2b4   : > { %3669 = vpow2.f32 %v1344_v49 }
 0x2b5   : > { %1378 = vadd.xlane.f32.xlu0 %v1377_v41 }
 0x2b6   : > { %1657 = vrot.lane.b32.xlu1 %v4276_v38, %s3933_s14  ;;  %v1292_v38 = vpop.xlane.xlu0 %1291 }
 0x2b7   : > { %v1314_v50 = vsub.f32 %v4503_v22, %v1292_v38 }
 0x2b9   : > { %v1342_v56 = vmul.f32 1.442695, %v1314_v50 }
 0x2ba   : > { %1699 = vrot.lane.b32.xlu2 %v4297_v59, %s3933_s14  ;;  %v4591_v35 = vpop.eup %3669 }
 0x2bb   : > { %v1389_v51 = vsel %vm1253_vm3, %v4591_v35, 0.0 }
 0x2bd   : > { %1384 = vadd.xlane.f32.xlu0 %v1383_v48 }
 0x2be   : > { %v1298_v46 = vpop.xlane.xlu0 %1297 }
 0x2bf   : > { %v1316_v37 = vsub.f32 %v4510_v4, %v1298_v46 }
 0x2c1   : > { %v1346_v22 = vmul.f32 1.442695, %v1316_v37 }
 0x2c5   : > { %1390 = vadd.xlane.f32.xlu0 %v1389_v51 }
 0x2c6   : > { %v1301_v63 = vpop.xlane.xlu0 %1300 }
 0x2c7   : > { %v1352_v44 = vpop.xlane.xlu1 %1351  ;;  %v1317_v24 = vsub.f32 %v4523_v29, %v1301_v63 }
 0x2c8   : > { %3671 = vrcp.f32 %v1352_v44 }
 0x2c9   : > { %v1348_v62 = vmul.f32 1.442695, %v1317_v24 }
 0x2ce   : > { %v3672_v21 = vpop.eup %3671 }
 0x2cf   : > { %v1414_v59 = vmul.f32 %v3672_v21, %v4532_v14  ;;  %v1355_v15 = vpop.xlane.xlu1 %1354 }
 0x2d0   : > { %3673 = vrcp.f32 %v1355_v15 }
 0x2d1   : > { %v1430_v31 = vpack.c.bf16 %v1414_v59, %v1414_v59  ;;  %3675 = vpow2.f32 %v1334_v34 }
 0x2d2   : > { %3677 = vpow2.f32 %v1338_v45 }
 0x2d3   : > { %3448 = vmatmul.msk.bf16.vlgmr.msrb.gmra.mxu2 %vm1253_vm3, %v1430_v31  ;;  %3679 = vpow2.f32 %v1342_v56 }
 0x2d4   : > { %1588 = vmatpush.bf16.msrb.mxu2 %v1579_v42  ;;  %3681 = vpow2.f32 %v1346_v22 }
 0x2d5   : > { %3683 = vpow2.f32 %v1348_v62 }
 0x2d6   : > { %v3674_v47 = vpop.eup %3673 }
 0x2d7   : > { %v1415_v14 = vmul.f32 %v3674_v47, %v4536_v2  ;;  %v4609_v58 = vpop.eup %3675 }
 0x2d8   : > { %v4611_v33 = vpop.eup %3677  ;;  %v1374_v4 = vsel %vm1253_vm3, %v4609_v58, 0.0 }
 0x2d9   : > { %v1431_v18 = vpack.c.bf16 %v1415_v14, %v1415_v14  ;;  %1720 = vrot.lane.b32.xlu0 %v4305_v7, %s3933_s14  ;;  %v1380_v7 = vsel %vm1253_vm3, %v4611_v33, 0.0  ;;  %v4617_v2 = vpop.eup %3679 }
 0x2da   : > { %v4619_v19 = vpop.eup %3681  ;;  %v1386_v0 = vsel %vm1253_vm3, %v4617_v2, 0.0 }
 0x2db   : > { %3449 = vmatmul.msk.bf16.vlgmr.msrb.gmra.mxu3 %vm1253_vm3, %v1431_v18  ;;  %v1392_v6 = vsel %vm1253_vm3, %v4619_v19, 0.0  ;;  %v4626_v54 = vpop.eup %3683 }
 0x2dc   : > { %1609 = vmatpush.bf16.msrb.mxu3 %v1600_v30  ;;  %v1395_v8 = vsel %vm1253_vm3, %v4626_v54, 0.0 }
 0x2e0   : > { %1375 = vadd.xlane.f32.xlu1 %v1374_v4  ;;  %v3555_v4 = vld [vmem:[%s5783_s4 + $0x8] sm:$0xff] }
 0x2e3   : > { %1381 = vadd.xlane.f32.xlu2 %v1380_v7 }
 0x2e8   : > { %1387 = vadd.xlane.f32.xlu1 %v1386_v0 }
 0x2eb   : > { %1393 = vadd.xlane.f32.xlu2 %v1392_v6 }
 0x301   : > { %1741 = vrot.lane.b32.xlu1 %v4180_v40, %s3933_s14 }
 0x303   : > { %1762 = vrot.lane.b32.xlu2 %v4256_v20, %s3933_s14  ;;  %1396 = vadd.xlane.f32.xlu0 %v1395_v8  ;;  %s5802_s14 = sld [smem:[#allocation23_spill]] }
 0x308   : > { %v1358_v1 = vpop.xlane.xlu0 %1357 }
 0x309   : > { %3685 = vrcp.f32 %v1358_v1 }
 0x30d   : > { %v1370_v53 = vpop.xlane.xlu2 %1369 }
 0x30f   : > { %v3686_v9 = vpop.eup %3685 }
 0x310   : > { %v1416_v29 = vmul.f32 %v3686_v9, %v4548_v61  ;;  %v1361_v52 = vpop.xlane.xlu0 %1360  ;;  %v1373_v3 = vpop.xlane.xlu1 %1372 }
 0x311   : > { %3687 = vrcp.f32 %v1361_v52 }
 0x312   : > { %v1432_v13 = vpack.c.bf16 %v1416_v29, %v1416_v29 }
 0x314   : > { %3450 = vmatmul.msk.bf16.vlgmr.msrb.gmra.mxu1 %vm1253_vm3, %v1432_v13 }
 0x315   : > { %1651 = vmatpush.bf16.msrb.mxu1 %v1642_v10  ;;  %v1679_v40 = vpop.permute.xlu2 %1678 }
 0x316   : > { %v1684_v48 = vsel %vm1451_vm1, %v1679_v40, 0 }
 0x317   : > { %v3688_v12 = vpop.eup %3687 }
 0x318   : > { %v1364_v32 = vpop.xlane.xlu0 %1363  ;;  %v1417_v20 = vmul.f32 %v3688_v12, %v4555_v36 }
 0x319   : > { %3689 = vrcp.f32 %v1364_v32 }
 0x31a   : > { %v1433_v23 = vpack.c.bf16 %v1417_v20, %v1417_v20  ;;  %3691 = vrcp.f32 %v1370_v53 }
 0x31c   : > { %3451 = vmatmul.msk.bf16.vlgmr.msra.gmra.mxu2 %vm1253_vm3, %v1433_v23 }
 0x31d   : > { %v1700_v16 = vpop.permute.xlu2 %1699 }
 0x31e   : > { %v1705_v61 = vsel %vm1451_vm1, %v1700_v16, 0 }
 0x31f   : > { %v3690_v43 = vpop.eup %3689  ;;  %1714 = vmatpush.bf16.msra.mxu0 %v1705_v61 }
 0x320   : > { %v1418_v55 = vmul.f32 %v3690_v43, %v4566_v11  ;;  %v1367_v28 = vpop.xlane.xlu0 %1366  ;;  %v3692_v49 = vpop.eup %3691 }
 0x321   : > { %3693 = vrcp.f32 %v1367_v28  ;;  %v1420_v26 = vmul.f32 %v3692_v49, %v4553_v5 }
 0x322   : > { %v1434_v41 = vpack.c.bf16 %v1418_v55, %v1418_v55  ;;  %3695 = vrcp.f32 %v1373_v3 }
 0x323   : > { %v1436_v59 = vpack.c.bf16 %v1420_v26, %v1420_v26 }
 0x324   : > { %3452 = vmatmul.msk.bf16.vlgmr.msra.gmra.mxu3 %vm1253_vm3, %v1434_v41 }
 0x325   : > { %1693 = vmatpush.bf16.msra.mxu3 %v1684_v48 }
 0x327   : > { %v3694_v36 = vpop.eup %3693 }
 0x328   : > { %v1419_v51 = vmul.f32 %v3694_v36, %v4571_v39  ;;  %v1658_v44 = vpop.permute.xlu1 %1657  ;;  %v1379_v38 = vpop.xlane.xlu0 %1378 }
 0x329   : > { %v1663_v21 = vsel %vm1451_vm1, %v1658_v44, 0  ;;  %v3696_v27 = vpop.eup %3695  ;;  %3697 = vrcp.f32 %v1379_v38 }
 0x32a   : > { %v1435_v11 = vpack.c.bf16 %v1419_v51, %v1419_v51  ;;  %1672 = vmatpush.bf16.msra.mxu2 %v1663_v21  ;;  %v1421_v15 = vmul.f32 %v3696_v27, %v4559_v25 }
 0x32c   : > { %3453 = vmatmul.msk.bf16.vlgmr.msra.gmra.mxu1 %vm1253_vm3, %v1435_v11  ;;  %3454 = vmatmul.msk.bf16.vlgmr.msrb.gmra.mxu2 %vm1253_vm3, %v1436_v59  ;;  %v1437_v60 = vpack.c.bf16 %v1421_v15, %v1421_v15 }
 0x32f   : > { %v3698_v5 = vpop.eup %3697 }
 0x330   : > { %v1385_v31 = vpop.xlane.xlu0 %1384  ;;  %v1423_v39 = vmul.f32 %v3698_v5, %v4576_v17 }
 0x331   : > { %3699 = vrcp.f32 %v1385_v31 }
 0x332   : > { %v1439_v34 = vpack.c.bf16 %v1423_v39, %v1423_v39 }
 0x334   : > { %3455 = vmatmul.msk.bf16.vlgmr.msrb.gmra.mxu3 %vm1253_vm3, %v1437_v60 }
 0x337   : > { %v3700_v42 = vpop.eup %3699 }
 0x338   : > { %v1425_v45 = vmul.f32 %v3700_v42, %v4585_v57  ;;  %v1391_v47 = vpop.xlane.xlu0 %1390 }
 0x339   : > { %3701 = vrcp.f32 %v1391_v47 }
 0x33a   : > { %v1441_v50 = vpack.c.bf16 %v1425_v45, %v1425_v45 }
 0x33c   : > { %3457 = vmatmul.msk.bf16.vlgmr.msrb.gmra.mxu1 %vm1253_vm3, %v1439_v34 }
 0x33f   : > { %v3702_v25 = vpop.eup %3701 }
 0x340   : > { %v1427_v46 = vmul.f32 %v3702_v25, %v4591_v35 }
 0x342   : > { %v1443_v18 = vpack.c.bf16 %v1427_v46, %v1427_v46  ;;  %v4685_v46 = vld [vmem:[%s5784_s5] ss:$0 sm:$0xff] }
 0x344   : > { %3459 = vmatmul.msk.bf16.vlgmr.msra.gmra.mxu3 %vm1253_vm3, %v1441_v50 }
 0x34b   : > { %v1721_v14 = vpop.permute.xlu0 %1720 }
 0x34c   : > { %v1726_v37 = vsel %vm1451_vm1, %v1721_v14, 0 }
 0x34d   : > { %1735 = vmatpush.bf16.msra.mxu1 %v1726_v37 }
 0x350   : > { %3461 = vmatmul.msk.bf16.vlgmr.msra.gmra.mxu1 %vm1253_vm3, %v1443_v18 }
 0x353   : > { %v1376_v17 = vpop.xlane.xlu1 %1375 }
 0x354   : > { %3703 = vrcp.f32 %v1376_v17 }
 0x356   : > { %v1464_v56 = vpop.f32.mrf.mxu2  ;;  %v1382_v30 = vpop.xlane.xlu2 %1381 }
 0x357   : > { %3705 = vrcp.f32 %v1382_v30 }
 0x35a   : > { %v3704_v57 = vpop.eup %3703 }
 0x35b   : > { %v1422_v22 = vmul.f32 %v3704_v57, %v4609_v58  ;;  %v1388_v7 = vpop.xlane.xlu1 %1387  ;;  %v3554_v58 = vld [vmem:[%s5783_s4] sm:$0xff]  ;;  %s3305_s4 = scalar_lea.sflag [#allocation4], %s4119_s21 }
 0x35c   : > { %3707 = vrcp.f32 %v1388_v7 }
 0x35d   : > { %v3706_v35 = vpop.eup %3705  ;;  %v1438_v0 = vpack.c.bf16 %v1422_v22, %v1422_v22 }
 0x35e   : > { %v1424_v6 = vmul.f32 %v3706_v35, %v4611_v33  ;;  %v1466_v63 = vpop.f32.mrf.mxu2  ;;  %v1485_v24 = vpop.f32.mrf.mxu3 }
 0x35f   : > { %v1394_v62 = vpop.xlane.xlu2 %1393  ;;  %3456 = vmatmul.msk.bf16.vlgmr.msrb.gmra.mxu0 %vm1253_vm3, %v1438_v0  ;;  %v1783_v16 = vpack.c.bf16 %v1485_v24, %v1464_v56  ;;  %v3815_v56 = vld [vmem:[%s4123_s19] sm:$0xff]  ;;  %v3816_v63 = vld [vmem:[%s4123_s19 + $0x8] sm:$0xff] }
 0x360   : > { %v1440_v8 = vpack.c.bf16 %v1424_v6, %v1424_v6  ;;  %1841 = vmatpush.bf16.msrb.mxu0 %v3555_v4  ;;  %3709 = vrcp.f32 %v1394_v62 }
 0x362   : > { %3458 = vmatmul.msk.bf16.vlgmr.msra.gmra.mxu2 %vm1253_vm3, %v1440_v8  ;;  %v3708_v1 = vpop.eup %3707 }
 0x363   : > { %v1426_v29 = vmul.f32 %v3708_v1, %v4617_v2 }
 0x364   : > { %1842 = vmatpush.bf16.msrb.mxu0 %v3554_v58 }
 0x365   : > { %v1442_v52 = vpack.c.bf16 %v1426_v29, %v1426_v29  ;;  %v3817_v29 = vld [vmem:[%s4123_s19 + $0x10] sm:$0xff] }
 0x366   : > { %v1487_v53 = vpop.f32.mrf.mxu3  ;;  %v3710_v13 = vpop.eup %3709 }
 0x367   : > { %v1763_v9 = vpop.permute.xlu2 %1762  ;;  %v1428_v10 = vmul.f32 %v3710_v13, %v4619_v19 }
 0x368   : > { %v1768_v33 = vsel %vm1451_vm1, %v1763_v9, 0 }
 0x369   : > { %1777 = vmatpush.bf16.msrb.mxu3 %v1768_v33  ;;  %v1444_v32 = vpack.c.bf16 %v1428_v10, %v1428_v10 }
 0x36f   : > { %3460 = vmatmul.msk.bf16.vlgmr.msra.gmra.mxu0 %vm1253_vm3, %v1442_v52 }
 0x373   : > { %v1742_v40 = vpop.permute.xlu1 %1741 }
 0x374   : > { %v1747_v12 = vsel %vm1451_vm1, %v1742_v40, 0 }
 0x375   : > { %1756 = vmatpush.bf16.msrb.mxu2 %v1747_v12  ;;  %v3818_v12 = vld [vmem:[%s4123_s19 + $0x18] sm:$0xff] }
 0x376   : > { %v1397_v20 = vpop.xlane.xlu0 %1396 }
 0x377   : > { %3711 = vrcp.f32 %v1397_v20 }
 0x378   : > { %3462 = vmatmul.msk.bf16.vlgmr.msrb.gmra.mxu2 %vm1253_vm3, %v1444_v32 }
 0x37d   : > { %v3712_v23 = vpop.eup %3711 }
 0x37e   : > { %v1429_v2 = vmul.f32 %v3712_v23, %v4626_v54 }
 0x37f   : > { %3472 = vmatmul.msk.bf16.vlgmr.msrb.gmra.mxu0 %vm665_vm0, %v1783_v16 }
 0x380   : > { %v1445_v61 = vpack.c.bf16 %v1429_v2, %v1429_v2 }
 0x382   : > { %3463 = vmatmul.msk.bf16.vlgmr.msrb.gmra.mxu3 %vm1253_vm3, %v1445_v61 }
 0x391   : > { %v1506_v43 = vpop.f32.mrf.mxu1 }
 0x399   : > { %v1508_v19 = vpop.f32.mrf.mxu1 }
 0x39a   : > { %v3819_v19 = vld [vmem:[%s4123_s19 + $0x20] sm:$0xff] }
 0x39f   : > { %v1527_v3 = vpop.f32.mrf.mxu2 }
 0x3a0   : > { %v1784_v55 = vpack.c.bf16 %v1527_v3, %v1506_v43 }
 0x3a2   : > { %3473 = vmatmul.msk.bf16.gmra.mxu0 %vm665_vm0, %v1784_v55 }
 0x3a7   : > { %v1548_v28 = vpop.f32.mrf.mxu3  ;;  %v1529_v41 = vpop.f32.mrf.mxu2 }
 0x3a9   : > { %v1569_v49 = vpop.f32.mrf.mxu1 }
 0x3aa   : > { %v1785_v26 = vpack.c.bf16 %v1569_v49, %v1548_v28 }
 0x3af   : > { %v1550_v48 = vpop.f32.mrf.mxu3  ;;  %v1590_v36 = vpop.f32.mrf.mxu2 }
 0x3b1   : > { %v1571_v51 = vpop.f32.mrf.mxu1 }
 0x3b2   : > { %3474 = vmatmul.msk.bf16.gmra.mxu0 %vm665_vm0, %v1785_v26 }
 0x3b7   : > { %v1611_v54 = vpop.f32.mrf.mxu3  ;;  %v1592_v44 = vpop.f32.mrf.mxu2 }
 0x3b8   : > { %v1786_v11 = vpack.c.bf16 %v1611_v54, %v1590_v36  ;;  %v3820_v36 = vld [vmem:[%s4123_s19 + $0x28] sm:$0xff] }
 0x3b9   : > { %v1653_v38 = vpop.f32.mrf.mxu1 }
 0x3bf   : > { %v1613_v21 = vpop.f32.mrf.mxu3 }
 0x3c1   : > { %v1655_v27 = vpop.f32.mrf.mxu1 }
 0x3c2   : > { %3475 = vmatmul.msk.bf16.gmra.mxu0 %vm665_vm0, %v1786_v11  ;;  %v3821_v11 = vld [vmem:[%s4123_s19 + $0x30] sm:$0xff] }
 0x3c7   : > { %v1695_v59 = vpop.f32.mrf.mxu3 }
 0x3cd   : > { %v1737_v15 = vpop.f32.mrf.mxu1 }
 0x3cf   : > { %v1697_v60 = vpop.f32.mrf.mxu3 }
 0x3d5   : > { %v1739_v31 = vpop.f32.mrf.mxu1 }
 0x3dc   : > { %v1632_v5 = vpop.f32.mrf.mxu0 }
 0x3dd   : > { %v1787_v39 = vpack.c.bf16 %v1653_v38, %v1632_v5 }
 0x3df   : > { %3476 = vmatmul.msk.bf16.gmra.mxu0 %vm665_vm0, %v1787_v39  ;;  %v3822_v39 = vld [vmem:[%s4123_s19 + $0x38] sm:$0xff] }
 0x3e4   : > { %v1634_v34 = vpop.f32.mrf.mxu0 }
 0x3e5   : > { %v1674_v42 = vpop.f32.mrf.mxu2 }
 0x3e6   : > { %v1788_v47 = vpack.c.bf16 %v1695_v59, %v1674_v42 }
 0x3ec   : > { %v1716_v45 = vpop.f32.mrf.mxu0 }
 0x3ed   : > { %v1676_v50 = vpop.f32.mrf.mxu2  ;;  %v1789_v18 = vpack.c.bf16 %v1737_v15, %v1716_v45 }
 0x3ef   : > { %3477 = vmatmul.msk.bf16.gmra.mxu0 %vm665_vm0, %v1788_v47 }
 0x3f4   : > { %v1718_v25 = vpop.f32.mrf.mxu0 }
 0x3f5   : > { %v3935_v25 = vmov 32.0  }
 0x3f6   : > { %3713 = vrcp.f32 %v3935_v25 }
 0x3fb   : > { %v1758_v14 = vpop.f32.mrf.mxu2 }
 0x3fc   : > { %v1844_v37 = vpop.f32.mrf.mxu0 }
 0x3fd   : > { %v1845_v17 = vadd.f32 %v4685_v46, %v1844_v37 }
 0x3ff   : > { %v4689_v30 = vadd.f32 %v3815_v56, %v1845_v17  ;;  %3478 = vmatmul.msk.bf16.gmra.mxu0 %vm665_vm0, %v1789_v18  ;;  %v3823_v18 = vld [vmem:[%s4123_s19 + $0x40] sm:$0xff]  ;;  %v3714_v56 = vpop.eup %3713 }
 0x400   : > { %vm1953_vm1 = vweird.f32 %v3714_v56 }
 0x401   : > { %v1900_v57 = vsel %vm665_vm0, %v4689_v30, 0.0  ;;  %v1971_v22 = vmul.f32 %v4689_v30, %v4689_v30 }
 0x402   : > { %1901 = vadd.xlane.f32.xlu1 %v1900_v57 }
 0x403   : > { %v1760_v4 = vpop.f32.mrf.mxu2  ;;  %v1987_v35 = vsel %vm665_vm0, %v1971_v22, 0.0 }
 0x404   : > { %v1846_v7 = vpop.f32.mrf.mxu0  ;;  %1988 = vadd.xlane.f32.xlu2 %v1987_v35  ;;  %v1949_v35 = vmul.f32 32.0, %v3714_v56 }
 0x405   : > { %v1847_v0 = vadd.f32 %v4685_v46, %v1846_v7  ;;  %v1779_v6 = vpop.f32.mrf.mxu3 }
 0x406   : > { %v1790_v8 = vpack.c.bf16 %v1779_v6, %v1758_v14  ;;  %v3824_v6 = vld [vmem:[%s4123_s19 + $0x48] sm:$0xff] }
 0x407   : > { %v4699_v24 = vadd.f32 %v3816_v63, %v1847_v0 }
 0x409   : > { %v1903_v62 = vsel %vm665_vm0, %v4699_v24, 0.0  ;;  %v1972_v1 = vmul.f32 %v4699_v24, %v4699_v24 }
 0x40a   : > { %1904 = vadd.xlane.f32.xlu0 %v1903_v62  ;;  %v1950_v62 = vsub.f32 1.0, %v1949_v35 }
 0x40b   : > { %v1990_v53 = vsel %vm665_vm0, %v1972_v1, 0.0 }
 0x40d   : > { %v1781_v58 = vpop.f32.mrf.mxu3 }
 0x40f   : > { %3479 = vmatmul.msk.bf16.gmra.mxu0 %vm665_vm0, %v1790_v8 }
 0x412   : > { %1991 = vadd.xlane.f32.xlu0 %v1990_v53  ;;  %v1951_v53 = vmul.f32 %v3714_v56, %v1950_v62 }
 0x41f   : > { %v1849_v9 = vpop.f32.mrf.mxu0 }
 0x420   : > { %v1850_v33 = vadd.f32 %v4685_v46, %v1849_v9 }
 0x422   : > { %v4709_v52 = vadd.f32 %v3817_v29, %v1850_v33  ;;  %v3825_v29 = vld [vmem:[%s4123_s19 + $0x50] sm:$0xff] }
 0x424   : > { %v1906_v13 = vsel %vm665_vm0, %v4709_v52, 0.0  ;;  %v1973_v43 = vmul.f32 %v4709_v52, %v4709_v52 }
 0x425   : > { %1907 = vadd.xlane.f32.xlu0 %v1906_v13 }
 0x426   : > { %v1993_v55 = vsel %vm665_vm0, %v1973_v43, 0.0 }
 0x427   : > { %v1851_v10 = vpop.f32.mrf.mxu0 }
 0x428   : > { %v1852_v40 = vadd.f32 %v4685_v46, %v1851_v10  ;;  %v1952_v10 = vadd.f32 %v3714_v56, %v1951_v53 }
 0x42a   : > { %v4715_v32 = vadd.f32 %v3818_v12, %v1852_v40 }
 0x42c   : > { %v1909_v20 = vsel %vm665_vm0, %v4715_v32, 0.0  ;;  %v1974_v23 = vmul.f32 %v4715_v32, %v4715_v32 }
 0x42d   : > { %1910 = vadd.xlane.f32.xlu0 %v1909_v20 }
 0x42e   : > { %v1996_v16 = vsel %vm665_vm0, %v1974_v23, 0.0  ;;  %v4788_v23 = vsel %vm1953_vm1, %v3714_v56, %v1952_v10 }
 0x42f   : > { %1997 = vadd.xlane.f32.xlu1 %v1996_v16  ;;  %v1854_v2 = vpop.f32.mrf.mxu0 }
 0x430   : > { %v1855_v61 = vadd.f32 %v4685_v46, %v1854_v2 }
 0x432   : > { %v4726_v3 = vadd.f32 %v3819_v19, %v1855_v61  ;;  %v3826_v19 = vld [vmem:[%s4123_s19 + $0x58] sm:$0xff] }
 0x434   : > { %v1975_v28 = vmul.f32 %v4726_v3, %v4726_v3  ;;  %v1912_v54 = vsel %vm665_vm0, %v4726_v3, 0.0 }
 0x435   : > { %1994 = vadd.xlane.f32.xlu0 %v1993_v55 }
 0x436   : > { %v1999_v41 = vsel %vm665_vm0, %v1975_v28, 0.0 }
 0x437   : > { %v1856_v49 = vpop.f32.mrf.mxu0  ;;  %2000 = vadd.xlane.f32.xlu2 %v1999_v41 }
 0x438   : > { %v1857_v48 = vadd.f32 %v4685_v46, %v1856_v49 }
 0x43a   : > { %v4734_v26 = vadd.f32 %v3820_v36, %v1857_v48 }
 0x43c   : > { %v1915_v51 = vsel %vm665_vm0, %v4734_v26, 0.0  ;;  %v1976_v21 = vmul.f32 %v4734_v26, %v4734_v26 }
 0x43d   : > { %1916 = vadd.xlane.f32.xlu1 %v1915_v51  ;;  %1913 = vadd.xlane.f32.xlu0 %v1912_v54 }
 0x43e   : > { %v2002_v15 = vsel %vm665_vm0, %v1976_v21, 0.0 }
 0x43f   : > { %v1859_v44 = vpop.f32.mrf.mxu0 }
 0x440   : > { %v1860_v38 = vadd.f32 %v4685_v46, %v1859_v44 }
 0x442   : > { %v4744_v27 = vadd.f32 %v3821_v11, %v1860_v38 }
 0x444   : > { %v1918_v59 = vsel %vm665_vm0, %v4744_v27, 0.0  ;;  %v1977_v5 = vmul.f32 %v4744_v27, %v4744_v27 }
 0x445   : > { %1919 = vadd.xlane.f32.xlu1 %v1918_v59  ;;  %2003 = vadd.xlane.f32.xlu0 %v2002_v15  ;;  %v3557_v59 = vld [vmem:[%s5733_s8 + $0x8] sm:$0xff]  ;;  %v3827_v15 = vld [vmem:[%s4123_s19 + $0x60] sm:$0xff] }
 0x446   : > { %v2005_v45 = vsel %vm665_vm0, %v1977_v5, 0.0  ;;  %2389 = vmatpush.bf16.msrb.mxu1 %v3557_v59 }
 0x447   : > { %v1861_v60 = vpop.f32.mrf.mxu0 }
 0x448   : > { %v1862_v31 = vadd.f32 %v4685_v46, %v1861_v60 }
 0x44a   : > { %v4753_v34 = vadd.f32 %v3822_v39, %v1862_v31 }
 0x44c   : > { %v1921_v42 = vsel %vm665_vm0, %v4753_v34, 0.0  ;;  %v1978_v47 = vmul.f32 %v4753_v34, %v4753_v34 }
 0x44d   : > { %1922 = vadd.xlane.f32.xlu2 %v1921_v42  ;;  %2006 = vadd.xlane.f32.xlu0 %v2005_v45  ;;  %v3556_v42 = vld [vmem:[%s5733_s8] sm:$0xff] }
 0x44e   : > { %v2008_v50 = vsel %vm665_vm0, %v1978_v47, 0.0  ;;  %2390 = vmatpush.bf16.msrb.mxu1 %v3556_v42 }
 0x44f   : > { %2009 = vadd.xlane.f32.xlu1 %v2008_v50 }
 0x45c   : > { %v1864_v14 = vpop.f32.mrf.mxu0 }
 0x45d   : > { %v1865_v37 = vadd.f32 %v4685_v46, %v1864_v14 }
 0x45f   : > { %v4763_v17 = vadd.f32 %v3823_v18, %v1865_v37 }
 0x461   : > { %v1924_v57 = vsel %vm665_vm0, %v4763_v17, 0.0  ;;  %v1979_v22 = vmul.f32 %v4763_v17, %v4763_v17 }
 0x462   : > { %1925 = vadd.xlane.f32.xlu2 %v1924_v57 }
 0x463   : > { %v2011_v4 = vsel %vm665_vm0, %v1979_v22, 0.0  ;;  %v3828_v22 = vld [vmem:[%s4123_s19 + $0x68] sm:$0xff] }
 0x464   : > { %v1866_v7 = vpop.f32.mrf.mxu0  ;;  %2012 = vadd.xlane.f32.xlu1 %v2011_v4 }
 0x465   : > { %v1867_v0 = vadd.f32 %v4685_v46, %v1866_v7 }
 0x467   : > { %v4772_v63 = vadd.f32 %v3824_v6, %v1867_v0 }
 0x469   : > { %v1927_v8 = vsel %vm665_vm0, %v4772_v63, 0.0  ;;  %v1980_v58 = vmul.f32 %v4772_v63, %v4772_v63 }
 0x46a   : > { %1928 = vadd.xlane.f32.xlu0 %v1927_v8 }
 0x46b   : > { %v2014_v1 = vsel %vm665_vm0, %v1980_v58, 0.0 }
 0x46c   : > { %2015 = vadd.xlane.f32.xlu2 %v2014_v1  ;;  %v1869_v9 = vpop.f32.mrf.mxu0 }
 0x46d   : > { %v1870_v33 = vadd.f32 %v4685_v46, %v1869_v9  ;;  %v3829_v9 = vld [vmem:[%s4123_s19 + $0x70] sm:$0xff] }
 0x46f   : > { %v4781_v13 = vadd.f32 %v3825_v29, %v1870_v33 }
 0x471   : > { %v1930_v40 = vsel %vm665_vm0, %v4781_v13, 0.0  ;;  %v1981_v12 = vmul.f32 %v4781_v13, %v4781_v13 }
 0x472   : > { %1931 = vadd.xlane.f32.xlu0 %v1930_v40 }
 0x473   : > { %v2017_v20 = vsel %vm665_vm0, %v1981_v12, 0.0 }
 0x474   : > { %v1871_v16 = vpop.f32.mrf.mxu0  ;;  %2018 = vadd.xlane.f32.xlu2 %v2017_v20 }
 0x475   : > { %v1872_v2 = vadd.f32 %v4685_v46, %v1871_v16  ;;  %v1902_v61 = vpop.xlane.xlu1 %1901 }
 0x476   : > { %v4792_v43 = vmul.f32 %v4788_v23, %v1902_v61 }
 0x477   : > { %v4795_v55 = vadd.f32 %v3826_v19, %v1872_v2  ;;  %v1989_v28 = vpop.xlane.xlu2 %1988 }
 0x478   : > { %v2051_v41 = vmul.f32 %v4792_v43, %v4792_v43  ;;  %v2035_v49 = vmul.f32 %v1989_v28, %v4788_v23 }
 0x479   : > { %v1933_v48 = vsel %vm665_vm0, %v4795_v55, 0.0  ;;  %v1982_v36 = vmul.f32 %v4795_v55, %v4795_v55 }
 0x47a   : > { %v2067_v51 = vsub.f32 %v2035_v49, %v2051_v41  ;;  %1934 = vadd.xlane.f32.xlu1 %v1933_v48  ;;  %v3830_v49 = vld [vmem:[%s4123_s19 + $0x78] sm:$0xff]  ;;  %s5791_s19 = sld [smem:[#allocation20_spill]] }
 0x47b   : > { %v2020_v54 = vsel %vm665_vm0, %v1982_v36, 0.0  ;;  %v2083_v36 = vsub.f32 %v4689_v30, %v4792_v43 }
 0x47c   : > { %v2099_v44 = vadd.f32 1e-12, %v2067_v51  ;;  %2021 = vadd.xlane.f32.xlu0 %v2020_v54  ;;  %v1874_v38 = vpop.f32.mrf.mxu0 }
 0x47d   : > { %v1875_v21 = vadd.f32 %v4685_v46, %v1874_v38  ;;  %v1905_v11 = vpop.xlane.xlu0 %1904 }
 0x47e   : > { %3715 = vrsqrt.f32 %v2099_v44  ;;  %v4817_v39 = vmul.f32 %v4788_v23, %v1905_v11  ;;  %vm2121_vm6 = vweird.f32 %v2099_v44 }
 0x47f   : > { %v4810_v60 = vadd.f32 %v3827_v15, %v1875_v21 }
 0x480   : > { %v2052_v18 = vmul.f32 %v4817_v39, %v4817_v39  ;;  %v2084_v43 = vsub.f32 %v4699_v24, %v4817_v39 }
 0x481   : > { %v1936_v31 = vsel %vm665_vm0, %v4810_v60, 0.0  ;;  %v1983_v5 = vmul.f32 %v4810_v60, %v4810_v60 }
 0x482   : > { %1937 = vadd.xlane.f32.xlu1 %v1936_v31 }
 0x483   : > { %v2023_v45 = vsel %vm665_vm0, %v1983_v5, 0.0  ;;  %v4866_v5 = vld [vmem:[%s5732_s7] ss:$0 sm:$0xff] }
 0x484   : > { %v3716_v47 = vpop.eup %3715  ;;  %v1876_v50 = vpop.f32.mrf.mxu0  ;;  %2024 = vadd.xlane.f32.xlu0 %v2023_v45 }
 0x485   : > { %v2116_v25 = vmul.f32 %v3716_v47, %v2099_v44  ;;  %v1877_v14 = vadd.f32 %v4685_v46, %v1876_v50  ;;  %v1992_v37 = vpop.xlane.xlu0 %1991  ;;  %vm2122_vm3 = vweird.f32 %v3716_v47 }
 0x486   : > { %v2036_v56 = vmul.f32 %v1992_v37, %v4788_v23  ;;  %vm2123_vm7 = vmor %vm2121_vm6, %vm2122_vm3 }
 0x487   : > { %v2117_v57 = vmul.f32 %v3716_v47, %v2116_v25  ;;  %v4828_v4 = vadd.f32 %v3828_v22, %v1877_v14 }
 0x488   : > { %v2068_v35 = vsub.f32 %v2036_v56, %v2052_v18 }
 0x489   : > { %v1939_v7 = vsel %vm665_vm0, %v4828_v4, 0.0  ;;  %v1984_v0 = vmul.f32 %v4828_v4, %v4828_v4  ;;  %v2118_v62 = vmul.f32 0.5, %v2117_v57 }
 0x48a   : > { %v2100_v6 = vadd.f32 1e-12, %v2068_v35  ;;  %1940 = vadd.xlane.f32.xlu2 %v1939_v7 }
 0x48b   : > { %v2026_v8 = vsel %vm665_vm0, %v1984_v0, 0.0  ;;  %v2119_v53 = vsub.f32 1.5, %v2118_v62 }
 0x48c   : > { %3717 = vrsqrt.f32 %v2100_v6  ;;  %2027 = vadd.xlane.f32.xlu1 %v2026_v8  ;;  %v1879_v58 = vpop.f32.mrf.mxu0  ;;  %vm2131_vm9 = vweird.f32 %v2100_v6 }
 0x48d   : > { %v1880_v1 = vadd.f32 %v4685_v46, %v1879_v58  ;;  %v2120_v12 = vmul.f32 %v3716_v47, %v2119_v53 }
 0x48f   : > { %v4837_v33 = vadd.f32 %v3829_v9, %v1880_v1  ;;  %v2124_v28 = vsel %vm2123_vm7, %v3716_v47, %v2120_v12 }
 0x490   : > { %v2275_v21 = vmul.f32 %v2124_v28, %v2083_v36 }
 0x491   : > { %v1942_v29 = vsel %vm665_vm0, %v4837_v33, 0.0  ;;  %v1985_v10 = vmul.f32 %v4837_v33, %v4837_v33 }
 0x492   : > { %v3718_v40 = vpop.eup %3717  ;;  %1943 = vadd.xlane.f32.xlu2 %v1942_v29 }
 0x493   : > { %v2126_v20 = vmul.f32 %v3718_v40, %v2100_v6  ;;  %v2029_v16 = vsel %vm665_vm0, %v1985_v10, 0.0  ;;  %vm2132_vm8 = vweird.f32 %v3718_v40 }
 0x494   : > { %v1881_v2 = vpop.f32.mrf.mxu0  ;;  %2030 = vadd.xlane.f32.xlu1 %v2029_v16  ;;  %vm2133_vm10 = vmor %vm2131_vm9, %vm2132_vm8 }
 0x495   : > { %v2127_v61 = vmul.f32 %v3718_v40, %v2126_v20  ;;  %v1882_v19 = vadd.f32 %v4685_v46, %v1881_v2  ;;  %v4857_v46 = vld [vmem:[%s5731_s6] ss:$0 sm:$0xff] }
 0x496   : > { %v2295_v15 = vmul.f32 %v4857_v46, %v2275_v21 }
 0x497   : > { %v2128_v41 = vmul.f32 0.5, %v2127_v61  ;;  %v4846_v48 = vadd.f32 %v3830_v49, %v1882_v19 }
 0x498   : > { %v1908_v54 = vpop.xlane.xlu0 %1907  ;;  %v4871_v50 = vadd.f32 %v4866_v5, %v2295_v15 }
 0x499   : > { %v2129_v51 = vsub.f32 1.5, %v2128_v41  ;;  %v1945_v38 = vsel %vm665_vm0, %v4846_v48, 0.0  ;;  %v1986_v44 = vmul.f32 %v4846_v48, %v4846_v48  ;;  %v1957_v18 = vmul.f32 %v4788_v23, %v1908_v54 }
 0x49a   : > { %1946 = vadd.xlane.f32.xlu0 %v1945_v38 }
 0x49b   : > { %v2130_v11 = vmul.f32 %v3718_v40, %v2129_v51  ;;  %v2032_v30 = vsel %vm665_vm0, %v1986_v44, 0.0  ;;  %v2053_v35 = vmul.f32 %v1957_v18, %v1957_v18 }
 0x49c   : > { %2033 = vadd.xlane.f32.xlu2 %v2032_v30 }
 0x49d   : > { %v2134_v59 = vsel %vm2133_vm10, %v3718_v40, %v2130_v11 }
 0x49e   : > { %v2276_v31 = vmul.f32 %v2134_v59, %v2084_v43 }
 0x4a0   : > { %v2296_v42 = vmul.f32 %v4857_v46, %v2276_v31  ;;  %v1911_v45 = vpop.xlane.xlu0 %1910 }
 0x4a1   : > { %v1958_v47 = vmul.f32 %v4788_v23, %v1911_v45 }
 0x4a2   : > { %v4874_v24 = vadd.f32 %v4866_v5, %v2296_v42  ;;  %v1998_v39 = vpop.xlane.xlu1 %1997 }
 0x4a3   : > { %v2054_v25 = vmul.f32 %v1958_v47, %v1958_v47  ;;  %v2038_v14 = vmul.f32 %v1998_v39, %v4788_v23  ;;  %v2086_v11 = vsub.f32 %v4715_v32, %v1958_v47  ;;  %v2085_v39 = vsub.f32 %v4709_v52, %v1957_v18 }
 0x4a4   : > { %v2331_v37 = vpack.c.bf16 %v4874_v24, %v4871_v50 }
 0x4a5   : > { %v2070_v56 = vsub.f32 %v2038_v14, %v2054_v25 }
 0x4a6   : > { %3488 = vmatmul.msk.bf16.vlgmr.msrb.gmra.mxu1 %vm665_vm0, %v2331_v37 }
 0x4a7   : > { %v2102_v57 = vadd.f32 1e-12, %v2070_v56 }
 0x4a8   : > { %v1995_v22 = vpop.xlane.xlu0 %1994 }
 0x4a9   : > { %3719 = vrsqrt.f32 %v2102_v57  ;;  %v2037_v7 = vmul.f32 %v1995_v22, %v4788_v23  ;;  %vm2151_vm12 = vweird.f32 %v2102_v57 }
 0x4aa   : > { %v2001_v8 = vpop.xlane.xlu2 %2000 }
 0x4ab   : > { %v2069_v0 = vsub.f32 %v2037_v7, %v2053_v35  ;;  %v2039_v10 = vmul.f32 %v2001_v8, %v4788_v23 }
 0x4ad   : > { %v2101_v6 = vadd.f32 1e-12, %v2069_v0 }
 0x4af   : > { %v3720_v62 = vpop.eup %3719  ;;  %3721 = vrsqrt.f32 %v2101_v6  ;;  %vm2141_vm15 = vweird.f32 %v2101_v6 }
 0x4b0   : > { %v2146_v58 = vmul.f32 %v3720_v62, %v2102_v57  ;;  %v1917_v1 = vpop.xlane.xlu1 %1916  ;;  %v1914_v53 = vpop.xlane.xlu0 %1913  ;;  %vm2152_vm11 = vweird.f32 %v3720_v62 }
 0x4b1   : > { %v4883_v9 = vmul.f32 %v4788_v23, %v1914_v53  ;;  %v4889_v16 = vmul.f32 %v4788_v23, %v1917_v1  ;;  %vm2153_vm13 = vmor %vm2151_vm12, %vm2152_vm11 }
 0x4b2   : > { %v2147_v29 = vmul.f32 %v3720_v62, %v2146_v58 }
 0x4b3   : > { %v2055_v40 = vmul.f32 %v4883_v9, %v4883_v9  ;;  %v2056_v51 = vmul.f32 %v4889_v16, %v4889_v16 }
 0x4b4   : > { %v2148_v12 = vmul.f32 0.5, %v2147_v29 }
 0x4b5   : > { %v3722_v20 = vpop.eup %3721  ;;  %v2071_v2 = vsub.f32 %v2039_v10, %v2055_v40 }
 0x4b6   : > { %v2149_v61 = vsub.f32 1.5, %v2148_v12  ;;  %v2136_v19 = vmul.f32 %v3722_v20, %v2101_v6  ;;  %vm2142_vm14 = vweird.f32 %v3722_v20 }
 0x4b7   : > { %v2103_v28 = vadd.f32 1e-12, %v2071_v2  ;;  %vm2143_vm2 = vmor %vm2141_vm15, %vm2142_vm14 }
 0x4b8   : > { %v2150_v41 = vmul.f32 %v3720_v62, %v2149_v61  ;;  %v2137_v49 = vmul.f32 %v3722_v20, %v2136_v19  ;;  %v2004_v36 = vpop.xlane.xlu0 %2003  ;;  %v1920_v54 = vpop.xlane.xlu1 %1919 }
 0x4b9   : > { %3723 = vrsqrt.f32 %v2103_v28  ;;  %v2040_v38 = vmul.f32 %v2004_v36, %v4788_v23  ;;  %v4896_v59 = vmul.f32 %v4788_v23, %v1920_v54  ;;  %vm2161_vm5 = vweird.f32 %v2103_v28 }
 0x4ba   : > { %v2154_v44 = vsel %vm2153_vm13, %v3720_v62, %v2150_v41  ;;  %v2138_v21 = vmul.f32 0.5, %v2137_v49  ;;  %v2087_v36 = vsub.f32 %v4726_v3, %v4883_v9 }
 0x4bb   : > { %v2072_v30 = vsub.f32 %v2040_v38, %v2056_v51  ;;  %v2278_v31 = vmul.f32 %v2154_v44, %v2086_v11  ;;  %v2057_v32 = vmul.f32 %v4896_v59, %v4896_v59  ;;  %v2088_v11 = vsub.f32 %v4734_v26, %v4889_v16 }
 0x4bc   : > { %v2139_v43 = vsub.f32 1.5, %v2138_v21 }
 0x4bd   : > { %v2104_v15 = vadd.f32 1e-12, %v2072_v30  ;;  %v2298_v35 = vmul.f32 %v4857_v46, %v2278_v31 }
 0x4be   : > { %v2140_v42 = vmul.f32 %v3722_v20, %v2139_v43 }
 0x4bf   : > { %v3724_v45 = vpop.eup %3723  ;;  %3725 = vrsqrt.f32 %v2104_v15  ;;  %v4911_v29 = vadd.f32 %v4866_v5, %v2298_v35  ;;  %vm2171_vm6 = vweird.f32 %v2104_v15 }
 0x4c0   : > { %v2144_v25 = vsel %vm2143_vm2, %v3722_v20, %v2140_v42  ;;  %v2156_v14 = vmul.f32 %v3724_v45, %v2103_v28  ;;  %v1923_v47 = vpop.xlane.xlu2 %1922  ;;  %v2007_v37 = vpop.xlane.xlu0 %2006  ;;  %vm2162_vm4 = vweird.f32 %v3724_v45 }
 0x4c1   : > { %v4902_v56 = vmul.f32 %v4788_v23, %v1923_v47  ;;  %v2041_v57 = vmul.f32 %v2007_v37, %v4788_v23  ;;  %v2277_v22 = vmul.f32 %v2144_v25, %v2085_v39  ;;  %vm2163_vm1 = vmor %vm2161_vm5, %vm2162_vm4 }
 0x4c2   : > { %v2157_v7 = vmul.f32 %v3724_v45, %v2156_v14  ;;  %v2010_v0 = vpop.xlane.xlu1 %2009 }
 0x4c3   : > { %v2058_v52 = vmul.f32 %v4902_v56, %v4902_v56  ;;  %v2073_v18 = vsub.f32 %v2041_v57, %v2057_v32  ;;  %v2042_v6 = vmul.f32 %v2010_v0, %v4788_v23  ;;  %v2297_v8 = vmul.f32 %v4857_v46, %v2277_v22 }
 0x4c4   : > { %v2158_v62 = vmul.f32 0.5, %v2157_v7 }
 0x4c5   : > { %v3726_v58 = vpop.eup %3725  ;;  %v2105_v1 = vadd.f32 1e-12, %v2073_v18  ;;  %v2074_v53 = vsub.f32 %v2042_v6, %v2058_v52  ;;  %v4914_v12 = vadd.f32 %v4866_v5, %v2297_v8  ;;  %v2090_v18 = vsub.f32 %v4753_v34, %v4902_v56 }
 0x4c6   : > { %v2159_v10 = vsub.f32 1.5, %v2158_v62  ;;  %v2166_v40 = vmul.f32 %v3726_v58, %v2104_v15  ;;  %vm2172_vm3 = vweird.f32 %v3726_v58 }
 0x4c7   : > { %3727 = vrsqrt.f32 %v2105_v1  ;;  %v2106_v20 = vadd.f32 1e-12, %v2074_v53  ;;  %v2332_v19 = vpack.c.bf16 %v4911_v29, %v4914_v12  ;;  %vm2173_vm7 = vmor %vm2171_vm6, %vm2172_vm3  ;;  %vm2181_vm11 = vweird.f32 %v2105_v1 }
 0x4c8   : > { %v2160_v2 = vmul.f32 %v3724_v45, %v2159_v10  ;;  %v2167_v61 = vmul.f32 %v3726_v58, %v2166_v40 }
 0x4c9   : > { %3729 = vrsqrt.f32 %v2106_v20  ;;  %3489 = vmatmul.msk.bf16.gmra.mxu1 %vm665_vm0, %v2332_v19  ;;  %vm2191_vm10 = vweird.f32 %v2106_v20 }
 0x4ca   : > { %v2164_v41 = vsel %vm2163_vm1, %v3724_v45, %v2160_v2  ;;  %v2168_v49 = vmul.f32 0.5, %v2167_v61 }
 0x4cb   : > { %v2279_v38 = vmul.f32 %v2164_v41, %v2087_v36 }
 0x4cc   : > { %v2169_v51 = vsub.f32 1.5, %v2168_v49 }
 0x4cd   : > { %v3728_v54 = vpop.eup %3727  ;;  %v2299_v42 = vmul.f32 %v4857_v46, %v2279_v38 }
 0x4ce   : > { %v2170_v44 = vmul.f32 %v3726_v58, %v2169_v51  ;;  %v2176_v28 = vmul.f32 %v3728_v54, %v2105_v1  ;;  %vm2182_vm8 = vweird.f32 %v3728_v54 }
 0x4cf   : > { %v3730_v21 = vpop.eup %3729  ;;  %v4929_v47 = vadd.f32 %v4866_v5, %v2299_v42  ;;  %vm2183_vm13 = vmor %vm2181_vm11, %vm2182_vm8 }
 0x4d0   : > { %v2174_v30 = vsel %vm2173_vm7, %v3726_v58, %v2170_v44  ;;  %v2177_v43 = vmul.f32 %v3728_v54, %v2176_v28  ;;  %v2186_v31 = vmul.f32 %v3730_v21, %v2106_v20  ;;  %vm2192_vm9 = vweird.f32 %v3730_v21 }
 0x4d1   : > { %v2280_v45 = vmul.f32 %v2174_v30, %v2088_v11  ;;  %vm2193_vm12 = vmor %vm2191_vm10, %vm2192_vm9  ;;  %v2089_v58 = vsub.f32 %v4744_v27, %v4896_v59 }
 0x4d2   : > { %v2178_v39 = vmul.f32 0.5, %v2177_v43  ;;  %v2187_v3 = vmul.f32 %v3730_v21, %v2186_v31 }
 0x4d3   : > { %v2300_v9 = vmul.f32 %v4857_v46, %v2280_v45 }
 0x4d4   : > { %v2179_v25 = vsub.f32 1.5, %v2178_v39  ;;  %v2188_v14 = vmul.f32 0.5, %v2187_v3 }
 0x4d5   : > { %v1926_v32 = vpop.xlane.xlu2 %1925  ;;  %v4932_v26 = vadd.f32 %v4866_v5, %v2300_v9 }
 0x4d6   : > { %v4926_v15 = vmul.f32 %v4788_v23, %v1926_v32  ;;  %v2189_v16 = vsub.f32 1.5, %v2188_v14  ;;  %v2180_v57 = vmul.f32 %v3728_v54, %v2179_v25 }
 0x4d7   : > { %v2013_v37 = vpop.xlane.xlu1 %2012  ;;  %v2333_v7 = vpack.c.bf16 %v4932_v26, %v4929_v47 }
 0x4d8   : > { %v2059_v22 = vmul.f32 %v4926_v15, %v4926_v15  ;;  %v2043_v35 = vmul.f32 %v2013_v37, %v4788_v23  ;;  %v2190_v0 = vmul.f32 %v3730_v21, %v2189_v16  ;;  %v2184_v62 = vsel %vm2183_vm13, %v3728_v54, %v2180_v57 }
 0x4d9   : > { %3490 = vmatmul.msk.bf16.gmra.mxu1 %vm665_vm0, %v2333_v7  ;;  %v2281_v1 = vmul.f32 %v2184_v62, %v2089_v58 }
 0x4da   : > { %v2075_v52 = vsub.f32 %v2043_v35, %v2059_v22  ;;  %v2194_v6 = vsel %vm2193_vm12, %v3730_v21, %v2190_v0  ;;  %v2091_v35 = vsub.f32 %v4763_v17, %v4926_v15 }
 0x4db   : > { %v2282_v53 = vmul.f32 %v2194_v6, %v2090_v18  ;;  %v2301_v19 = vmul.f32 %v4857_v46, %v2281_v1 }
 0x4dc   : > { %v2107_v8 = vadd.f32 1e-12, %v2075_v52 }
 0x4dd   : > { %v1929_v10 = vpop.xlane.xlu0 %1928  ;;  %v2302_v34 = vmul.f32 %v4857_v46, %v2282_v53  ;;  %v4955_v44 = vadd.f32 %v4866_v5, %v2301_v19 }
 0x4de   : > { %3731 = vrsqrt.f32 %v2107_v8  ;;  %v1964_v40 = vmul.f32 %v4788_v23, %v1929_v10  ;;  %vm2201_vm15 = vweird.f32 %v2107_v8 }
 0x4df   : > { %v2016_v20 = vpop.xlane.xlu2 %2015  ;;  %v4949_v27 = vadd.f32 %v4866_v5, %v2302_v34 }
 0x4e0   : > { %v2060_v2 = vmul.f32 %v1964_v40, %v1964_v40  ;;  %v2044_v61 = vmul.f32 %v2016_v20, %v4788_v23  ;;  %v2092_v53 = vsub.f32 %v4772_v63, %v1964_v40 }
 0x4e1   : > { %v2334_v30 = vpack.c.bf16 %v4949_v27, %v4955_v44 }
 0x4e2   : > { %v2076_v56 = vsub.f32 %v2044_v61, %v2060_v2 }
 0x4e4   : > { %v3732_v41 = vpop.eup %3731  ;;  %v2108_v49 = vadd.f32 1e-12, %v2076_v56 }
 0x4e5   : > { %v2196_v36 = vmul.f32 %v3732_v41, %v2107_v8  ;;  %v1932_v51 = vpop.xlane.xlu0 %1931  ;;  %vm2202_vm14 = vweird.f32 %v3732_v41 }
 0x4e6   : > { %3733 = vrsqrt.f32 %v2108_v49  ;;  %v4952_v59 = vmul.f32 %v4788_v23, %v1932_v51  ;;  %vm2203_vm2 = vmor %vm2201_vm15, %vm2202_vm14  ;;  %vm2211_vm5 = vweird.f32 %v2108_v49 }
 0x4e7   : > { %v2197_v54 = vmul.f32 %v3732_v41, %v2196_v36  ;;  %v2019_v38 = vpop.xlane.xlu2 %2018 }
 0x4e8   : > { %v2061_v28 = vmul.f32 %v4952_v59, %v4952_v59  ;;  %v2045_v21 = vmul.f32 %v2019_v38, %v4788_v23 }
 0x4e9   : > { %v2198_v11 = vmul.f32 0.5, %v2197_v54  ;;  %3491 = vmatmul.msk.bf16.gmra.mxu1 %vm665_vm0, %v2334_v30 }
 0x4ea   : > { %v2077_v43 = vsub.f32 %v2045_v21, %v2061_v28 }
 0x4eb   : > { %v2199_v31 = vsub.f32 1.5, %v2198_v11 }
 0x4ec   : > { %v3734_v42 = vpop.eup %3733  ;;  %v2109_v45 = vadd.f32 1e-12, %v2077_v43 }
 0x4ed   : > { %v2200_v39 = vmul.f32 %v3732_v41, %v2199_v31  ;;  %v2206_v3 = vmul.f32 %v3734_v42, %v2108_v49  ;;  %v1935_v9 = vpop.xlane.xlu1 %1934  ;;  %vm2212_vm4 = vweird.f32 %v3734_v42 }
 0x4ee   : > { %3735 = vrsqrt.f32 %v2109_v45  ;;  %v4964_v25 = vmul.f32 %v4788_v23, %v1935_v9  ;;  %vm2213_vm1 = vmor %vm2211_vm5, %vm2212_vm4  ;;  %vm2221_vm6 = vweird.f32 %v2109_v45  ;;  %v2093_v9 = vsub.f32 %v4781_v13, %v4952_v59 }
 0x4ef   : > { %v2207_v14 = vmul.f32 %v3734_v42, %v2206_v3  ;;  %v2022_v32 = vpop.xlane.xlu0 %2021  ;;  %v2204_v57 = vsel %vm2203_vm2, %v3732_v41, %v2200_v39 }
 0x4f0   : > { %v2062_v16 = vmul.f32 %v4964_v25, %v4964_v25  ;;  %v2046_v37 = vmul.f32 %v2022_v32, %v4788_v23  ;;  %v2283_v18 = vmul.f32 %v2204_v57, %v2091_v35 }
 0x4f1   : > { %v2208_v22 = vmul.f32 0.5, %v2207_v14 }
 0x4f2   : > { %v2078_v7 = vsub.f32 %v2046_v37, %v2062_v16  ;;  %v2303_v34 = vmul.f32 %v4857_v46, %v2283_v18 }
 0x4f3   : > { %v2209_v0 = vsub.f32 1.5, %v2208_v22 }
 0x4f4   : > { %v3736_v52 = vpop.eup %3735  ;;  %v2110_v6 = vadd.f32 1e-12, %v2078_v7  ;;  %v4983_v36 = vadd.f32 %v4866_v5, %v2303_v34  ;;  %v2094_v7 = vsub.f32 %v4795_v55, %v4964_v25  ;;  %v3565_v55 = vld [vmem:[%s5735_s10 + $0x38] sm:$0xff] }
 0x4f5   : > { %v2210_v62 = vmul.f32 %v3734_v42, %v2209_v0  ;;  %v2216_v8 = vmul.f32 %v3736_v52, %v2109_v45  ;;  %v1938_v58 = vpop.xlane.xlu1 %1937  ;;  %vm2222_vm3 = vweird.f32 %v3736_v52  ;;  %2652 = vmatpush.bf16.msra.mxu2 %v3565_v55  ;;  %3573 = vmatpush.bf16.msra.mxu3 %v3565_v55  ;;  %v5068_v55 = vld [vmem:[%s5734_s9] ss:$0 sm:$0xff] }
 0x4f6   : > { %3737 = vrsqrt.f32 %v2110_v6  ;;  %v4973_v10 = vmul.f32 %v4788_v23, %v1938_v58  ;;  %vm2223_vm7 = vmor %vm2221_vm6, %vm2222_vm3  ;;  %vm2231_vm9 = vweird.f32 %v2110_v6 }
 0x4f7   : > { %v2214_v1 = vsel %vm2213_vm1, %v3734_v42, %v2210_v62  ;;  %v2217_v20 = vmul.f32 %v3736_v52, %v2216_v8  ;;  %v2025_v17 = vpop.xlane.xlu0 %2024 }
 0x4f8   : > { %v2284_v15 = vmul.f32 %v2214_v1, %v2092_v53  ;;  %v2063_v2 = vmul.f32 %v4973_v10, %v4973_v10  ;;  %v2047_v61 = vmul.f32 %v2025_v17, %v4788_v23 }
 0x4f9   : > { %v2218_v56 = vmul.f32 0.5, %v2217_v20 }
 0x4fa   : > { %v2079_v19 = vsub.f32 %v2047_v61, %v2063_v2  ;;  %v2304_v63 = vmul.f32 %v4857_v46, %v2284_v15  ;;  %v3564_v61 = vld [vmem:[%s5735_s10 + $0x30] sm:$0xff] }
 0x4fb   : > { %v2219_v40 = vsub.f32 1.5, %v2218_v56  ;;  %2653 = vmatpush.bf16.msra.mxu2 %v3564_v61  ;;  %3574 = vmatpush.bf16.msra.mxu3 %v3564_v61  ;;  %v3558_v61 = vld [vmem:[%s5735_s10] sm:$0xff] }
 0x4fc   : > { %v3738_v41 = vpop.eup %3737  ;;  %v4980_v49 = vadd.f32 1e-12, %v2079_v19  ;;  %v4986_v51 = vadd.f32 %v4866_v5, %v2304_v63 }
 0x4fd   : > { %v2220_v54 = vmul.f32 %v3736_v52, %v2219_v40  ;;  %v2226_v38 = vmul.f32 %v3738_v41, %v2110_v6  ;;  %v1941_v28 = vpop.xlane.xlu2 %1940  ;;  %vm2232_vm8 = vweird.f32 %v3738_v41 }
 0x4fe   : > { %3739 = vrsqrt.f32 %v4980_v49  ;;  %v4990_v21 = vmul.f32 %v4788_v23, %v1941_v28  ;;  %v2335_v11 = vpack.c.bf16 %v4986_v51, %v4983_v36  ;;  %vm2233_vm10 = vmor %vm2231_vm9, %vm2232_vm8  ;;  %vm2241_vm12 = vweird.f32 %v4980_v49 }
 0x4ff   : > { %v2227_v30 = vmul.f32 %v3738_v41, %v2226_v38  ;;  %v2028_v43 = vpop.xlane.xlu1 %2027  ;;  %v2224_v39 = vsel %vm2223_vm7, %v3736_v52, %v2220_v54 }
 0x500   : > { %v2064_v31 = vmul.f32 %v4990_v21, %v4990_v21  ;;  %v2048_v42 = vmul.f32 %v2028_v43, %v4788_v23  ;;  %3492 = vmatmul.msk.bf16.gmra.mxu1 %vm665_vm0, %v2335_v11  ;;  %v2285_v45 = vmul.f32 %v2224_v39, %v2093_v9  ;;  %v3563_v11 = vld [vmem:[%s5735_s10 + $0x28] sm:$0xff] }
 0x501   : > { %v2228_v3 = vmul.f32 0.5, %v2227_v30  ;;  %2654 = vmatpush.bf16.msra.mxu2 %v3563_v11  ;;  %3575 = vmatpush.bf16.msra.mxu3 %v3563_v11 }
 0x502   : > { %v2080_v14 = vsub.f32 %v2048_v42, %v2064_v31  ;;  %v2305_v8 = vmul.f32 %v4857_v46, %v2285_v45  ;;  %v2095_v31 = vsub.f32 %v4810_v60, %v4973_v10  ;;  %v2096_v45 = vsub.f32 %v4828_v4, %v4990_v21 }
 0x503   : > { %v2229_v32 = vsub.f32 1.5, %v2228_v3 }
 0x504   : > { %v3740_v16 = vpop.eup %3739  ;;  %v2112_v37 = vadd.f32 1e-12, %v2080_v14  ;;  %v5017_v15 = vadd.f32 %v4866_v5, %v2305_v8  ;;  %v3562_v14 = vld [vmem:[%s5735_s10 + $0x20] sm:$0xff] }
 0x505   : > { %v2230_v57 = vmul.f32 %v3738_v41, %v2229_v32  ;;  %v2236_v22 = vmul.f32 %v3740_v16, %v4980_v49  ;;  %v1944_v35 = vpop.xlane.xlu2 %1943  ;;  %vm2242_vm11 = vweird.f32 %v3740_v16  ;;  %2655 = vmatpush.bf16.msra.mxu2 %v3562_v14  ;;  %3576 = vmatpush.bf16.msra.mxu3 %v3562_v14 }
 0x506   : > { %3741 = vrsqrt.f32 %v2112_v37  ;;  %v5004_v0 = vmul.f32 %v4788_v23, %v1944_v35  ;;  %vm2243_vm13 = vmor %vm2241_vm12, %vm2242_vm11  ;;  %vm2251_vm15 = vweird.f32 %v2112_v37  ;;  %v3561_v35 = vld [vmem:[%s5735_s10 + $0x18] sm:$0xff] }
 0x507   : > { %v2234_v13 = vsel %vm2233_vm10, %v3738_v41, %v2230_v57  ;;  %v2237_v59 = vmul.f32 %v3740_v16, %v2236_v22  ;;  %v2031_v52 = vpop.xlane.xlu1 %2030 }
 0x508   : > { %v2286_v18 = vmul.f32 %v2234_v13, %v2094_v7  ;;  %v2065_v62 = vmul.f32 %v5004_v0, %v5004_v0  ;;  %v2049_v6 = vmul.f32 %v2031_v52, %v4788_v23  ;;  %v3560_v52 = vld [vmem:[%s5735_s10 + $0x10] sm:$0xff] }
 0x509   : > { %v2238_v25 = vmul.f32 0.5, %v2237_v59  ;;  %2656 = vmatpush.bf16.msra.mxu2 %v3561_v35  ;;  %3577 = vmatpush.bf16.msra.mxu3 %v3561_v35 }
 0x50a   : > { %v2081_v58 = vsub.f32 %v2049_v6, %v2065_v62  ;;  %v2306_v53 = vmul.f32 %v4857_v46, %v2286_v18 }
 0x50b   : > { %v2239_v1 = vsub.f32 1.5, %v2238_v25  ;;  %v3559_v25 = vld [vmem:[%s5735_s10 + $0x8] sm:$0xff] }
 0x50c   : > { %v3742_v20 = vpop.eup %3741  ;;  %v5014_v17 = vadd.f32 1e-12, %v2081_v58  ;;  %v5020_v2 = vadd.f32 %v4866_v5, %v2306_v53 }
 0x50d   : > { %v2240_v34 = vmul.f32 %v3740_v16, %v2239_v1  ;;  %v2246_v56 = vmul.f32 %v3742_v20, %v2112_v37  ;;  %v1947_v19 = vpop.xlane.xlu0 %1946  ;;  %vm2252_vm14 = vweird.f32 %v3742_v20  ;;  %2657 = vmatpush.bf16.msra.mxu2 %v3560_v52  ;;  %3578 = vmatpush.bf16.msra.mxu3 %v3560_v52  ;;  %v2097_v1 = vsub.f32 %v4837_v33, %v5004_v0 }
 0x50e   : > { %3743 = vrsqrt.f32 %v5014_v17  ;;  %v5027_v63 = vmul.f32 %v4788_v23, %v1947_v19  ;;  %v2336_v40 = vpack.c.bf16 %v5020_v2, %v5017_v15  ;;  %vm2253_vm2 = vmor %vm2251_vm15, %vm2252_vm14  ;;  %vm2261_vm5 = vweird.f32 %v5014_v17 }
 0x50f   : > { %v2247_v41 = vmul.f32 %v3742_v20, %v2246_v56  ;;  %v2034_v54 = vpop.xlane.xlu2 %2033  ;;  %v2244_v30 = vsel %vm2243_vm13, %v3740_v16, %v2240_v34  ;;  %vm3198_vm14 = vcmask 1041409  }
 0x510   : > { %v2066_v38 = vmul.f32 %v5027_v63, %v5027_v63  ;;  %v2050_v28 = vmul.f32 %v2034_v54, %v4788_v23  ;;  %3493 = vmatmul.msk.bf16.gmra.mxu1 %vm665_vm0, %v2336_v40  ;;  %v2287_v3 = vmul.f32 %v2244_v30, %v2095_v31  ;;  %v2098_v40 = vsub.f32 %v4846_v48, %v5027_v63 }
 0x511   : > { %v2248_v43 = vmul.f32 0.5, %v2247_v41  ;;  %2658 = vmatpush.bf16.msra.mxu2 %v3559_v25  ;;  %3579 = vmatpush.bf16.msra.mxu3 %v3559_v25 }
 0x512   : > { %v2082_v49 = vsub.f32 %v2050_v28, %v2066_v38  ;;  %v2307_v22 = vmul.f32 %v4857_v46, %v2287_v3 }
 0x513   : > { %v2249_v42 = vsub.f32 1.5, %v2248_v43 }
 0x514   : > { %v3744_v39 = vpop.eup %3743  ;;  %v2114_v9 = vadd.f32 1e-12, %v2082_v49  ;;  %v5053_v21 = vadd.f32 %v4866_v5, %v2307_v22 }
 0x515   : > { %v2250_v32 = vmul.f32 %v3742_v20, %v2249_v42  ;;  %v2256_v16 = vmul.f32 %v3744_v39, %v5014_v17  ;;  %vm2262_vm4 = vweird.f32 %v3744_v39  ;;  %2659 = vmatpush.bf16.msra.mxu2 %v3558_v61  ;;  %3580 = vmatpush.bf16.msra.mxu3 %v3558_v61 }
 0x516   : > { %3745 = vrsqrt.f32 %v2114_v9  ;;  %vm2263_vm1 = vmor %vm2261_vm5, %vm2262_vm4  ;;  %vm2271_vm6 = vweird.f32 %v2114_v9  ;;  %vm3201_vm5 = vcmask 1042434  }
 0x517   : > { %v2254_v60 = vsel %vm2253_vm2, %v3742_v20, %v2250_v32  ;;  %v2257_v10 = vmul.f32 %v3744_v39, %v2256_v16 }
 0x518   : > { %v2288_v57 = vmul.f32 %v2254_v60, %v2096_v45 }
 0x519   : > { %v2258_v7 = vmul.f32 0.5, %v2257_v10 }
 0x51a   : > { %v2308_v37 = vmul.f32 %v4857_v46, %v2288_v57 }
 0x51b   : > { %v2259_v13 = vsub.f32 1.5, %v2258_v7 }
 0x51c   : > { %v3746_v4 = vpop.eup %3745  ;;  %v5056_v59 = vadd.f32 %v4866_v5, %v2308_v37 }
 0x51d   : > { %v2260_v18 = vmul.f32 %v3744_v39, %v2259_v13  ;;  %v2266_v62 = vmul.f32 %v3746_v4, %v2114_v9  ;;  %vm2272_vm3 = vweird.f32 %v3746_v4 }
 0x51e   : > { %v2337_v6 = vpack.c.bf16 %v5056_v59, %v5053_v21  ;;  %vm2273_vm7 = vmor %vm2271_vm6, %vm2272_vm3 }
 0x51f   : > { %v2267_v8 = vmul.f32 %v3746_v4, %v2266_v62  ;;  %v2264_v58 = vsel %vm2263_vm1, %v3744_v39, %v2260_v18 }
 0x520   : > { %3494 = vmatmul.msk.bf16.gmra.mxu1 %vm665_vm0, %v2337_v6  ;;  %v2289_v34 = vmul.f32 %v2264_v58, %v2097_v1 }
 0x521   : > { %v2268_v53 = vmul.f32 0.5, %v2267_v8 }
 0x522   : > { %v2309_v38 = vmul.f32 %v4857_v46, %v2289_v34 }
 0x523   : > { %v2269_v20 = vsub.f32 1.5, %v2268_v53  ;;  %v2392_v17 = vpop.f32.mrf.mxu1 }
 0x524   : > { %v2393_v56 = vadd.f32 %v5068_v55, %v2392_v17  ;;  %v5085_v49 = vadd.f32 %v4866_v5, %v2309_v38 }
 0x525   : > { %v2270_v19 = vmul.f32 %v3746_v4, %v2269_v20 }
 0x526   : > { %v2432_v41 = vmul.f32 %v2393_v56, %v2393_v56 }
 0x527   : > { %v2274_v33 = vsel %vm2273_vm7, %v3746_v4, %v2270_v19 }
 0x528   : > { %v2290_v0 = vmul.f32 %v2274_v33, %v2098_v40  ;;  %v2448_v54 = vmul.f32 %v2432_v41, %v2393_v56 }
 0x52a   : > { %v2464_v28 = vmul.f32 0.044715, %v2448_v54  ;;  %v2310_v11 = vmul.f32 %v4857_v46, %v2290_v0 }
 0x52b   : > { %v2394_v30 = vpop.f32.mrf.mxu1 }
 0x52c   : > { %v2480_v43 = vadd.f32 %v2464_v28, %v2393_v56  ;;  %v2395_v31 = vadd.f32 %v5068_v55, %v2394_v30  ;;  %v5088_v48 = vadd.f32 %v4866_v5, %v2310_v11 }
 0x52e   : > { %v2496_v63 = vmul.f32 0.7978846, %v2480_v43  ;;  %v2433_v42 = vmul.f32 %v2395_v31, %v2395_v31  ;;  %v2338_v39 = vpack.c.bf16 %v5088_v48, %v5085_v49 }
 0x530   : > { %v2449_v3 = vmul.f32 %v2433_v42, %v2395_v31  ;;  %3495 = vmatmul.msk.bf16.gmra.mxu1 %vm665_vm0, %v2338_v39  ;;  %3747 = vtanh.f32 %v2496_v63 }
 0x532   : > { %v2465_v46 = vmul.f32 0.044715, %v2449_v3 }
 0x534   : > { %v2481_v9 = vadd.f32 %v2465_v46, %v2395_v31 }
 0x536   : > { %v2497_v14 = vmul.f32 0.7978846, %v2481_v9  ;;  %v3748_v32 = vpop.eup %3747 }
 0x537   : > { %v2528_v16 = vadd.f32 1.0, %v3748_v32 }
 0x538   : > { %3749 = vtanh.f32 %v2497_v14 }
 0x539   : > { %v2544_v60 = vmul.f32 0.5, %v2528_v16 }
 0x53b   : > { %v2560_v57 = vmul.f32 %v2544_v60, %v2393_v56 }
 0x53e   : > { %v3750_v45 = vpop.eup %3749 }
 0x53f   : > { %v2529_v10 = vadd.f32 1.0, %v3750_v45 }
 0x541   : > { %v2545_v5 = vmul.f32 0.5, %v2529_v10 }
 0x543   : > { %v2561_v22 = vmul.f32 %v2545_v5, %v2395_v31 }
 0x545   : > { %v2576_v35 = vpack.c.bf16 %v2561_v22, %v2560_v57 }
 0x546   : > { %v2397_v7 = vpop.f32.mrf.mxu1 }
 0x547   : > { %2660 = vmatmul.bf16.vlgmr.msra.gmra.mxu2 %v2576_v35  ;;  %v2398_v37 = vadd.f32 %v5068_v55, %v2397_v7 }
 0x549   : > { %v2434_v13 = vmul.f32 %v2398_v37, %v2398_v37 }
 0x54b   : > { %v2450_v4 = vmul.f32 %v2434_v13, %v2398_v37 }
 0x54d   : > { %v2466_v52 = vmul.f32 0.044715, %v2450_v4 }
 0x54e   : > { %v2399_v18 = vpop.f32.mrf.mxu1 }
 0x54f   : > { %v2482_v62 = vadd.f32 %v2466_v52, %v2398_v37  ;;  %v2400_v6 = vadd.f32 %v5068_v55, %v2399_v18 }
 0x551   : > { %v2435_v8 = vmul.f32 %v2400_v6, %v2400_v6  ;;  %v2498_v25 = vmul.f32 0.7978846, %v2482_v62 }
 0x553   : > { %v2451_v58 = vmul.f32 %v2435_v8, %v2400_v6  ;;  %3751 = vtanh.f32 %v2498_v25 }
 0x555   : > { %v2467_v53 = vmul.f32 0.044715, %v2451_v58 }
 0x556   : > { %v2402_v1 = vpop.f32.mrf.mxu1 }
 0x557   : > { %v2483_v20 = vadd.f32 %v2467_v53, %v2400_v6  ;;  %v2403_v17 = vadd.f32 %v5068_v55, %v2402_v1 }
 0x559   : > { %v2436_v61 = vmul.f32 %v2403_v17, %v2403_v17  ;;  %v2499_v34 = vmul.f32 0.7978846, %v2483_v20  ;;  %v3752_v56 = vpop.eup %3751 }
 0x55a   : > { %v2530_v33 = vadd.f32 1.0, %v3752_v56 }
 0x55b   : > { %v2452_v19 = vmul.f32 %v2436_v61, %v2403_v17  ;;  %3753 = vtanh.f32 %v2499_v34 }
 0x55c   : > { %v2546_v43 = vmul.f32 0.5, %v2530_v33 }
 0x55d   : > { %v2468_v40 = vmul.f32 0.044715, %v2452_v19 }
 0x55e   : > { %v2404_v41 = vpop.f32.mrf.mxu1  ;;  %v2562_v3 = vmul.f32 %v2546_v43, %v2398_v37 }
 0x55f   : > { %v2484_v0 = vadd.f32 %v2468_v40, %v2403_v17  ;;  %v2405_v54 = vadd.f32 %v5068_v55, %v2404_v41 }
 0x561   : > { %v3754_v38 = vpop.eup %3753  ;;  %v2500_v28 = vmul.f32 0.7978846, %v2484_v0  ;;  %v2437_v11 = vmul.f32 %v2405_v54, %v2405_v54 }
 0x562   : > { %v2531_v30 = vadd.f32 1.0, %v3754_v38 }
 0x563   : > { %v2453_v31 = vmul.f32 %v2437_v11, %v2405_v54  ;;  %3755 = vtanh.f32 %v2500_v28 }
 0x564   : > { %v2547_v63 = vmul.f32 0.5, %v2531_v30 }
 0x565   : > { %v2469_v42 = vmul.f32 0.044715, %v2453_v31 }
 0x566   : > { %v2407_v39 = vpop.f32.mrf.mxu1  ;;  %v2563_v46 = vmul.f32 %v2547_v63, %v2400_v6 }
 0x567   : > { %v2485_v9 = vadd.f32 %v2469_v42, %v2405_v54  ;;  %v2408_v14 = vadd.f32 %v5068_v55, %v2407_v39 }
 0x568   : > { %v2577_v32 = vpack.c.bf16 %v2563_v46, %v2562_v3 }
 0x569   : > { %v2501_v16 = vmul.f32 0.7978846, %v2485_v9  ;;  %v2438_v45 = vmul.f32 %v2408_v14, %v2408_v14  ;;  %v3756_v60 = vpop.eup %3755 }
 0x56a   : > { %2665 = vmatmul.bf16.gmra.mxu2 %v2577_v32  ;;  %v2532_v22 = vadd.f32 1.0, %v3756_v60 }
 0x56b   : > { %3757 = vtanh.f32 %v2501_v16  ;;  %v2454_v10 = vmul.f32 %v2438_v45, %v2408_v14 }
 0x56c   : > { %v2548_v18 = vmul.f32 0.5, %v2532_v22 }
 0x56d   : > { %v2470_v5 = vmul.f32 0.044715, %v2454_v10 }
 0x56e   : > { %v2409_v57 = vpop.f32.mrf.mxu1  ;;  %v2564_v25 = vmul.f32 %v2548_v18, %v2403_v17 }
 0x56f   : > { %v2486_v35 = vadd.f32 %v2470_v5, %v2408_v14  ;;  %v2410_v7 = vadd.f32 %v5068_v55, %v2409_v57 }
 0x571   : > { %v3758_v13 = vpop.eup %3757  ;;  %v2502_v4 = vmul.f32 0.7978846, %v2486_v35  ;;  %v2439_v37 = vmul.f32 %v2410_v7, %v2410_v7 }
 0x572   : > { %v2533_v52 = vadd.f32 1.0, %v3758_v13 }
 0x573   : > { %v2455_v62 = vmul.f32 %v2439_v37, %v2410_v7  ;;  %3759 = vtanh.f32 %v2502_v4 }
 0x574   : > { %v2549_v6 = vmul.f32 0.5, %v2533_v52 }
 0x575   : > { %v2471_v8 = vmul.f32 0.044715, %v2455_v62 }
 0x576   : > { %v2565_v58 = vmul.f32 %v2549_v6, %v2405_v54 }
 0x577   : > { %v2487_v53 = vadd.f32 %v2471_v8, %v2410_v7 }
 0x578   : > { %v2578_v1 = vpack.c.bf16 %v2565_v58, %v2564_v25 }
 0x579   : > { %v2503_v20 = vmul.f32 0.7978846, %v2487_v53  ;;  %v3760_v61 = vpop.eup %3759 }
 0x57a   : > { %2670 = vmatmul.bf16.gmra.mxu2 %v2578_v1  ;;  %v2534_v40 = vadd.f32 1.0, %v3760_v61 }
 0x57b   : > { %3761 = vtanh.f32 %v2503_v20 }
 0x57c   : > { %v2550_v28 = vmul.f32 0.5, %v2534_v40 }
 0x57d   : > { %v2412_v34 = vpop.f32.mrf.mxu1 }
 0x57e   : > { %v2413_v56 = vadd.f32 %v5068_v55, %v2412_v34  ;;  %v2566_v63 = vmul.f32 %v2550_v28, %v2408_v14 }
 0x580   : > { %v2440_v19 = vmul.f32 %v2413_v56, %v2413_v56 }
 0x581   : > { %v3762_v33 = vpop.eup %3761 }
 0x582   : > { %v2456_v41 = vmul.f32 %v2440_v19, %v2413_v56  ;;  %v2535_v38 = vadd.f32 1.0, %v3762_v33 }
 0x584   : > { %v2472_v0 = vmul.f32 0.044715, %v2456_v41  ;;  %v2551_v54 = vmul.f32 0.5, %v2535_v38 }
 0x585   : > { %v2414_v11 = vpop.f32.mrf.mxu1 }
 0x586   : > { %v2488_v30 = vadd.f32 %v2472_v0, %v2413_v56  ;;  %v2415_v17 = vadd.f32 %v5068_v55, %v2414_v11  ;;  %v2567_v42 = vmul.f32 %v2551_v54, %v2410_v7 }
 0x588   : > { %v2504_v43 = vmul.f32 0.7978846, %v2488_v30  ;;  %v2441_v31 = vmul.f32 %v2415_v17, %v2415_v17  ;;  %v2579_v3 = vpack.c.bf16 %v2567_v42, %v2566_v63 }
 0x58a   : > { %v2457_v39 = vmul.f32 %v2441_v31, %v2415_v17  ;;  %3763 = vtanh.f32 %v2504_v43  ;;  %2675 = vmatmul.bf16.gmra.mxu2 %v2579_v3 }
 0x58c   : > { %v2473_v46 = vmul.f32 0.044715, %v2457_v39 }
 0x58d   : > { %v2417_v9 = vpop.f32.mrf.mxu1 }
 0x58e   : > { %v2489_v32 = vadd.f32 %v2473_v46, %v2415_v17  ;;  %v2418_v16 = vadd.f32 %v5068_v55, %v2417_v9 }
 0x590   : > { %v2505_v45 = vmul.f32 0.7978846, %v2489_v32  ;;  %v2442_v60 = vmul.f32 %v2418_v16, %v2418_v16  ;;  %v3764_v10 = vpop.eup %3763 }
 0x591   : > { %v2536_v35 = vadd.f32 1.0, %v3764_v10 }
 0x592   : > { %3765 = vtanh.f32 %v2505_v45  ;;  %v2458_v5 = vmul.f32 %v2442_v60, %v2418_v16 }
 0x593   : > { %v2552_v18 = vmul.f32 0.5, %v2536_v35 }
 0x594   : > { %v2474_v57 = vmul.f32 0.044715, %v2458_v5 }
 0x595   : > { %v2419_v22 = vpop.f32.mrf.mxu1  ;;  %v2568_v58 = vmul.f32 %v2552_v18, %v2413_v56 }
 0x596   : > { %v2490_v13 = vadd.f32 %v2474_v57, %v2418_v16  ;;  %v2420_v14 = vadd.f32 %v5068_v55, %v2419_v22 }
 0x598   : > { %v3766_v7 = vpop.eup %3765  ;;  %v2506_v4 = vmul.f32 0.7978846, %v2490_v13  ;;  %v2443_v37 = vmul.f32 %v2420_v14, %v2420_v14 }
 0x599   : > { %v2537_v52 = vadd.f32 1.0, %v3766_v7 }
 0x59a   : > { %v2459_v62 = vmul.f32 %v2443_v37, %v2420_v14  ;;  %3767 = vtanh.f32 %v2506_v4 }
 0x59b   : > { %v2553_v6 = vmul.f32 0.5, %v2537_v52 }
 0x59c   : > { %v2475_v8 = vmul.f32 0.044715, %v2459_v62 }
 0x59d   : > { %v2422_v25 = vpop.f32.mrf.mxu1  ;;  %v2569_v53 = vmul.f32 %v2553_v6, %v2415_v17 }
 0x59e   : > { %v2491_v1 = vadd.f32 %v2475_v8, %v2420_v14  ;;  %v2423_v20 = vadd.f32 %v5068_v55, %v2422_v25 }
 0x59f   : > { %v2580_v61 = vpack.c.bf16 %v2569_v53, %v2568_v58 }
 0x5a0   : > { %v2507_v34 = vmul.f32 0.7978846, %v2491_v1  ;;  %v2444_v19 = vmul.f32 %v2423_v20, %v2423_v20  ;;  %v3768_v40 = vpop.eup %3767 }
 0x5a1   : > { %2680 = vmatmul.bf16.gmra.mxu2 %v2580_v61  ;;  %v2538_v38 = vadd.f32 1.0, %v3768_v40 }
 0x5a2   : > { %3769 = vtanh.f32 %v2507_v34  ;;  %v2460_v41 = vmul.f32 %v2444_v19, %v2423_v20 }
 0x5a3   : > { %v2554_v43 = vmul.f32 0.5, %v2538_v38 }
 0x5a4   : > { %v2476_v33 = vmul.f32 0.044715, %v2460_v41 }
 0x5a5   : > { %v2424_v0 = vpop.f32.mrf.mxu1  ;;  %v2570_v3 = vmul.f32 %v2554_v43, %v2418_v16 }
 0x5a6   : > { %v2492_v28 = vadd.f32 %v2476_v33, %v2423_v20  ;;  %v2425_v11 = vadd.f32 %v5068_v55, %v2424_v0 }
 0x5a8   : > { %v3770_v30 = vpop.eup %3769  ;;  %v2508_v54 = vmul.f32 0.7978846, %v2492_v28  ;;  %v2445_v56 = vmul.f32 %v2425_v11, %v2425_v11 }
 0x5a9   : > { %v2539_v17 = vadd.f32 1.0, %v3770_v30 }
 0x5aa   : > { %v2461_v31 = vmul.f32 %v2445_v56, %v2425_v11  ;;  %3771 = vtanh.f32 %v2508_v54 }
 0x5ab   : > { %v2555_v63 = vmul.f32 0.5, %v2539_v17 }
 0x5ac   : > { %v2477_v42 = vmul.f32 0.044715, %v2461_v31 }
 0x5ad   : > { %v2427_v39 = vpop.f32.mrf.mxu1  ;;  %v2571_v46 = vmul.f32 %v2555_v63, %v2420_v14 }
 0x5ae   : > { %v2493_v9 = vadd.f32 %v2477_v42, %v2425_v11  ;;  %v2428_v32 = vadd.f32 %v5068_v55, %v2427_v39 }
 0x5af   : > { %v2581_v45 = vpack.c.bf16 %v2571_v46, %v2570_v3 }
 0x5b0   : > { %v2509_v60 = vmul.f32 0.7978846, %v2493_v9  ;;  %v2446_v10 = vmul.f32 %v2428_v32, %v2428_v32  ;;  %v3772_v5 = vpop.eup %3771 }
 0x5b1   : > { %2685 = vmatmul.bf16.gmra.mxu2 %v2581_v45  ;;  %v2540_v35 = vadd.f32 1.0, %v3772_v5 }
 0x5b2   : > { %3773 = vtanh.f32 %v2509_v60  ;;  %v2462_v57 = vmul.f32 %v2446_v10, %v2428_v32 }
 0x5b3   : > { %v2556_v14 = vmul.f32 0.5, %v2540_v35 }
 0x5b4   : > { %v2478_v22 = vmul.f32 0.044715, %v2462_v57 }
 0x5b5   : > { %v2429_v13 = vpop.f32.mrf.mxu1  ;;  %v2572_v25 = vmul.f32 %v2556_v14, %v2423_v20 }
 0x5b6   : > { %v2494_v7 = vadd.f32 %v2478_v22, %v2428_v32  ;;  %v2430_v4 = vadd.f32 %v5068_v55, %v2429_v13  ;;  %v5110_v55 = vld [vmem:[%s5736_s11] ss:$0 sm:$0xff] }
 0x5b8   : > { %v3774_v37 = vpop.eup %3773  ;;  %v2510_v52 = vmul.f32 0.7978846, %v2494_v7  ;;  %v2447_v16 = vmul.f32 %v2430_v4, %v2430_v4 }
 0x5b9   : > { %v2541_v18 = vadd.f32 1.0, %v3774_v37 }
 0x5ba   : > { %v2463_v62 = vmul.f32 %v2447_v16, %v2430_v4  ;;  %3775 = vtanh.f32 %v2510_v52 }
 0x5bb   : > { %v2557_v6 = vmul.f32 0.5, %v2541_v18 }
 0x5bc   : > { %v2479_v8 = vmul.f32 0.044715, %v2463_v62 }
 0x5bd   : > { %v2573_v58 = vmul.f32 %v2557_v6, %v2425_v11 }
 0x5be   : > { %v2495_v53 = vadd.f32 %v2479_v8, %v2430_v4 }
 0x5bf   : > { %v2582_v1 = vpack.c.bf16 %v2573_v58, %v2572_v25 }
 0x5c0   : > { %v2511_v61 = vmul.f32 0.7978846, %v2495_v53  ;;  %v3776_v34 = vpop.eup %3775 }
 0x5c1   : > { %2690 = vmatmul.bf16.vlgmr.msra.gmra.mxu3 %v2582_v1  ;;  %v2542_v19 = vadd.f32 1.0, %v3776_v34 }
 0x5c2   : > { %3777 = vtanh.f32 %v2511_v61 }
 0x5c3   : > { %v2558_v33 = vmul.f32 0.5, %v2542_v19 }
 0x5c5   : > { %v2574_v11 = vmul.f32 %v2558_v33, %v2428_v32 }
 0x5c8   : > { %v3778_v40 = vpop.eup %3777 }
 0x5c9   : > { %v2543_v41 = vadd.f32 1.0, %v3778_v40 }
 0x5ca   : > { %v2661_v0 = vpop.f32.mrf.mxu2 }
 0x5cb   : > { %v2662_v38 = vadd.f32 %v5110_v55, %v2661_v0  ;;  %v2559_v20 = vmul.f32 0.5, %v2543_v41 }
 0x5cd   : > { %v5114_v28 = vadd.f32 %v2662_v38, %v4871_v50  ;;  %v2575_v30 = vmul.f32 %v2559_v20, %v2430_v4 }
 0x5cf   : > { %v2717_v54 = vsel %vm665_vm0, %v5114_v28, 0.0  ;;  %v2583_v56 = vpack.c.bf16 %v2575_v30, %v2574_v11  ;;  %v2781_v31 = vmul.f32 %v5114_v28, %v5114_v28 }
 0x5d0   : > { %2718 = vadd.xlane.f32.xlu1 %v2717_v54 }
 0x5d1   : > { %2695 = vmatmul.bf16.gmra.mxu3 %v2583_v56  ;;  %v2797_v42 = vsel %vm665_vm0, %v2781_v31, 0.0 }
 0x5d2   : > { %v2663_v17 = vpop.f32.mrf.mxu2 }
 0x5d3   : > { %v2664_v43 = vadd.f32 %v5110_v55, %v2663_v17 }
 0x5d5   : > { %v5122_v63 = vadd.f32 %v2664_v43, %v4874_v24 }
 0x5d7   : > { %v2720_v50 = vsel %vm665_vm0, %v5122_v63, 0.0  ;;  %v2782_v39 = vmul.f32 %v5122_v63, %v5122_v63 }
 0x5d8   : > { %2721 = vadd.xlane.f32.xlu0 %v2720_v50  ;;  %2798 = vadd.xlane.f32.xlu1 %v2797_v42 }
 0x5d9   : > { %v2800_v3 = vsel %vm665_vm0, %v2782_v39, 0.0 }
 0x5da   : > { %2801 = vadd.xlane.f32.xlu2 %v2800_v3 }
 0x5ed   : > { %v2666_v46 = vpop.f32.mrf.mxu2 }
 0x5ee   : > { %v2667_v9 = vadd.f32 %v5110_v55, %v2666_v46 }
 0x5f0   : > { %v5132_v32 = vadd.f32 %v2667_v9, %v4914_v12 }
 0x5f2   : > { %v2723_v24 = vsel %vm665_vm0, %v5132_v32, 0.0  ;;  %v2783_v45 = vmul.f32 %v5132_v32, %v5132_v32 }
 0x5f3   : > { %2724 = vadd.xlane.f32.xlu2 %v2723_v24 }
 0x5f4   : > { %v2803_v60 = vsel %vm665_vm0, %v2783_v45, 0.0 }
 0x5f5   : > { %v2668_v10 = vpop.f32.mrf.mxu2  ;;  %2804 = vadd.xlane.f32.xlu0 %v2803_v60 }
 0x5f6   : > { %v2669_v5 = vadd.f32 %v5110_v55, %v2668_v10 }
 0x5f8   : > { %v5141_v57 = vadd.f32 %v2669_v5, %v4911_v29 }
 0x5fa   : > { %v2726_v12 = vsel %vm665_vm0, %v5141_v57, 0.0  ;;  %v2784_v13 = vmul.f32 %v5141_v57, %v5141_v57 }
 0x5fb   : > { %2727 = vadd.xlane.f32.xlu2 %v2726_v12 }
 0x5fc   : > { %v2806_v4 = vsel %vm665_vm0, %v2784_v13, 0.0 }
 0x5fd   : > { %v2671_v22 = vpop.f32.mrf.mxu2 }
 0x5fe   : > { %v2672_v35 = vadd.f32 %v5110_v55, %v2671_v22 }
 0x600   : > { %v5149_v7 = vadd.f32 %v2672_v35, %v4929_v47 }
 0x602   : > { %v2729_v37 = vsel %vm665_vm0, %v5149_v7, 0.0  ;;  %v2785_v16 = vmul.f32 %v5149_v7, %v5149_v7 }
 0x603   : > { %2807 = vadd.xlane.f32.xlu2 %v2806_v4  ;;  %2730 = vadd.xlane.f32.xlu1 %v2729_v37 }
 0x604   : > { %v2809_v18 = vsel %vm665_vm0, %v2785_v16, 0.0 }
 0x605   : > { %v2673_v29 = vpop.f32.mrf.mxu2 }
 0x606   : > { %v2674_v52 = vadd.f32 %v5110_v55, %v2673_v29 }
 0x608   : > { %v5158_v14 = vadd.f32 %v2674_v52, %v4932_v26 }
 0x60a   : > { %v2732_v47 = vsel %vm665_vm0, %v5158_v14, 0.0  ;;  %v2786_v8 = vmul.f32 %v5158_v14, %v5158_v14 }
 0x60b   : > { %2733 = vadd.xlane.f32.xlu2 %v2732_v47  ;;  %2810 = vadd.xlane.f32.xlu1 %v2809_v18 }
 0x60c   : > { %v2812_v58 = vsel %vm665_vm0, %v2786_v8, 0.0 }
 0x60d   : > { %v2676_v62 = vpop.f32.mrf.mxu2 }
 0x60e   : > { %v2677_v6 = vadd.f32 %v5110_v55, %v2676_v62 }
 0x610   : > { %v5167_v25 = vadd.f32 %v2677_v6, %v4955_v44 }
 0x612   : > { %v2787_v26 = vmul.f32 %v5167_v25, %v5167_v25  ;;  %v2735_v44 = vsel %vm665_vm0, %v5167_v25, 0.0 }
 0x613   : > { %2813 = vadd.xlane.f32.xlu2 %v2812_v58 }
 0x614   : > { %v2815_v53 = vsel %vm665_vm0, %v2787_v26, 0.0 }
 0x615   : > { %v2678_v1 = vpop.f32.mrf.mxu2  ;;  %2816 = vadd.xlane.f32.xlu1 %v2815_v53 }
 0x616   : > { %v2679_v61 = vadd.f32 %v5110_v55, %v2678_v1 }
 0x618   : > { %v5175_v34 = vadd.f32 %v2679_v61, %v4949_v27 }
 0x61a   : > { %v2738_v19 = vsel %vm665_vm0, %v5175_v34, 0.0 }
 0x61b   : > { %2739 = vadd.xlane.f32.xlu0 %v2738_v19  ;;  %2736 = vadd.xlane.f32.xlu2 %v2735_v44 }
 0x624   : > { %v2681_v40 = vpop.f32.mrf.mxu2 }
 0x625   : > { %v2682_v41 = vadd.f32 %v5110_v55, %v2681_v40 }
 0x627   : > { %v5183_v33 = vadd.f32 %v2682_v41, %v4983_v36 }
 0x629   : > { %v2741_v0 = vsel %vm665_vm0, %v5183_v33, 0.0  ;;  %v2789_v20 = vmul.f32 %v5183_v33, %v5183_v33 }
 0x62a   : > { %2742 = vadd.xlane.f32.xlu0 %v2741_v0 }
 0x62b   : > { %v2821_v54 = vsel %vm665_vm0, %v2789_v20, 0.0 }
 0x62c   : > { %v2683_v27 = vpop.f32.mrf.mxu2 }
 0x62d   : > { %v2684_v38 = vadd.f32 %v5110_v55, %v2683_v27 }
 0x62f   : > { %v5191_v11 = vadd.f32 %v2684_v38, %v4986_v51 }
 0x631   : > { %v2744_v30 = vsel %vm665_vm0, %v5191_v11, 0.0  ;;  %v2790_v17 = vmul.f32 %v5191_v11, %v5191_v11 }
 0x632   : > { %2745 = vadd.xlane.f32.xlu1 %v2744_v30  ;;  %2822 = vadd.xlane.f32.xlu0 %v2821_v54 }
 0x633   : > { %v2824_v31 = vsel %vm665_vm0, %v2790_v17, 0.0 }
 0x634   : > { %v2686_v36 = vpop.f32.mrf.mxu2 }
 0x635   : > { %v2687_v56 = vadd.f32 %v5110_v55, %v2686_v36 }
 0x637   : > { %v5200_v43 = vadd.f32 %v2687_v56, %v5017_v15 }
 0x639   : > { %v2791_v51 = vmul.f32 %v5200_v43, %v5200_v43  ;;  %v2747_v46 = vsel %vm665_vm0, %v5200_v43, 0.0 }
 0x63a   : > { %2825 = vadd.xlane.f32.xlu0 %v2824_v31 }
 0x63b   : > { %v2827_v50 = vsel %vm665_vm0, %v2791_v51, 0.0 }
 0x63c   : > { %v2688_v42 = vpop.f32.mrf.mxu2  ;;  %2828 = vadd.xlane.f32.xlu1 %v2827_v50 }
 0x63d   : > { %v2689_v39 = vadd.f32 %v5110_v55, %v2688_v42 }
 0x63f   : > { %v5208_v3 = vadd.f32 %v2689_v39, %v5020_v2 }
 0x641   : > { %v2750_v9 = vsel %vm665_vm0, %v5208_v3, 0.0  ;;  %v2792_v10 = vmul.f32 %v5208_v3, %v5208_v3 }
 0x642   : > { %2748 = vadd.xlane.f32.xlu0 %v2747_v46 }
 0x643   : > { %v2719_v15 = vpop.xlane.xlu1 %2718  ;;  %v2830_v35 = vsel %vm665_vm0, %v2792_v10, 0.0 }
 0x644   : > { %2751 = vadd.xlane.f32.xlu1 %v2750_v9  ;;  %v2691_v24 = vpop.f32.mrf.mxu3  ;;  %v5221_v2 = vmul.f32 %v2719_v15, %v4788_v23 }
 0x645   : > { %v2692_v45 = vadd.f32 %v5110_v55, %v2691_v24 }
 0x646   : > { %v2861_v13 = vmul.f32 %v5221_v2, %v5221_v2  ;;  %v2893_v9 = vsub.f32 %v5114_v28, %v5221_v2 }
 0x647   : > { %v5216_v60 = vadd.f32 %v2692_v45, %v5053_v21  ;;  %v5272_v45 = vld [vmem:[%s5738_s13] ss:$0 sm:$0xff] }
 0x649   : > { %v2753_v5 = vsel %vm665_vm0, %v5216_v60, 0.0  ;;  %v2793_v16 = vmul.f32 %v5216_v60, %v5216_v60 }
 0x64a   : > { %2754 = vadd.xlane.f32.xlu2 %v2753_v5 }
 0x64b   : > { %v2799_v12 = vpop.xlane.xlu1 %2798  ;;  %v2722_v22 = vpop.xlane.xlu0 %2721  ;;  %v2833_v53 = vsel %vm665_vm0, %v2793_v16, 0.0 }
 0x64c   : > { %v2845_v21 = vmul.f32 %v2799_v12, %v4788_v23  ;;  %v5230_v4 = vmul.f32 %v2722_v22, %v4788_v23  ;;  %2831 = vadd.xlane.f32.xlu1 %v2830_v35  ;;  %v2693_v37 = vpop.f32.mrf.mxu3  ;;  %v2788_v12 = vmul.f32 %v5175_v34, %v5175_v34 }
 0x64d   : > { %v2694_v29 = vadd.f32 %v5110_v55, %v2693_v37  ;;  %v2802_v52 = vpop.xlane.xlu2 %2801 }
 0x64e   : > { %v2877_v47 = vsub.f32 %v2845_v21, %v2861_v13  ;;  %v2862_v18 = vmul.f32 %v5230_v4, %v5230_v4  ;;  %v2846_v62 = vmul.f32 %v2802_v52, %v4788_v23  ;;  %v2894_v28 = vsub.f32 %v5122_v63, %v5230_v4 }
 0x64f   : > { %v5239_v6 = vadd.f32 %v2694_v29, %v5056_v59  ;;  %v2818_v4 = vsel %vm665_vm0, %v2788_v12, 0.0 }
 0x650   : > { %v2909_v8 = vadd.f32 1e-12, %v2877_v47  ;;  %v2878_v58 = vsub.f32 %v2846_v62, %v2862_v18 }
 0x651   : > { %v2756_v26 = vsel %vm665_vm0, %v5239_v6, 0.0  ;;  %v2794_v44 = vmul.f32 %v5239_v6, %v5239_v6 }
 0x652   : > { %3779 = vrsqrt.f32 %v2909_v8  ;;  %v2910_v1 = vadd.f32 1e-12, %v2878_v58  ;;  %2757 = vadd.xlane.f32.xlu0 %v2756_v26  ;;  %2834 = vadd.xlane.f32.xlu2 %v2833_v53  ;;  %vm2931_vm9 = vweird.f32 %v2909_v8 }
 0x653   : > { %v2836_v0 = vsel %vm665_vm0, %v2794_v44, 0.0 }
 0x654   : > { %3781 = vrsqrt.f32 %v2910_v1  ;;  %v2696_v61 = vpop.f32.mrf.mxu3  ;;  %vm2941_vm12 = vweird.f32 %v2910_v1 }
 0x655   : > { %v2697_v19 = vadd.f32 %v5110_v55, %v2696_v61 }
 0x657   : > { %v5248_v59 = vadd.f32 %v2697_v19, %v5085_v49 }
 0x658   : > { %v3780_v40 = vpop.eup %3779 }
 0x659   : > { %v2926_v41 = vmul.f32 %v3780_v40, %v2909_v8  ;;  %v2795_v27 = vmul.f32 %v5248_v59, %v5248_v59  ;;  %vm2932_vm8 = vweird.f32 %v3780_v40  ;;  %v2759_v42 = vsel %vm665_vm0, %v5248_v59, 0.0 }
 0x65a   : > { %v3782_v38 = vpop.eup %3781  ;;  %2837 = vadd.xlane.f32.xlu0 %v2836_v0  ;;  %vm2933_vm11 = vmor %vm2931_vm9, %vm2932_vm8 }
 0x65b   : > { %v2927_v20 = vmul.f32 %v3780_v40, %v2926_v41  ;;  %v2936_v30 = vmul.f32 %v3782_v38, %v2910_v1  ;;  %v2839_v54 = vsel %vm665_vm0, %v2795_v27, 0.0  ;;  %vm2942_vm10 = vweird.f32 %v3782_v38 }
 0x65c   : > { %v2698_v36 = vpop.f32.mrf.mxu3  ;;  %2840 = vadd.xlane.f32.xlu2 %v2839_v54  ;;  %vm2943_vm13 = vmor %vm2941_vm12, %vm2942_vm10 }
 0x65d   : > { %v2928_v56 = vmul.f32 0.5, %v2927_v20  ;;  %v2937_v17 = vmul.f32 %v3782_v38, %v2936_v30  ;;  %v2699_v49 = vadd.f32 %v5110_v55, %v2698_v36  ;;  %v5267_v55 = vld [vmem:[%s5737_s12] ss:$0 sm:$0xff] }
 0x65f   : > { %v2929_v31 = vsub.f32 1.5, %v2928_v56  ;;  %v2938_v51 = vmul.f32 0.5, %v2937_v17  ;;  %v5256_v50 = vadd.f32 %v2699_v49, %v5088_v48 }
 0x661   : > { %v2930_v39 = vmul.f32 %v3780_v40, %v2929_v31  ;;  %v2939_v46 = vsub.f32 1.5, %v2938_v51  ;;  %v2762_v15 = vsel %vm665_vm0, %v5256_v50, 0.0  ;;  %v2796_v5 = vmul.f32 %v5256_v50, %v5256_v50 }
 0x662   : > { %2763 = vadd.xlane.f32.xlu1 %v2762_v15  ;;  %2760 = vadd.xlane.f32.xlu0 %v2759_v42 }
 0x663   : > { %v2934_v48 = vsel %vm2933_vm11, %v3780_v40, %v2930_v39  ;;  %v2940_v24 = vmul.f32 %v3782_v38, %v2939_v46  ;;  %v2842_v63 = vsel %vm665_vm0, %v2796_v5, 0.0 }
 0x664   : > { %v3085_v10 = vmul.f32 %v2934_v48, %v2893_v9 }
 0x665   : > { %v2944_v2 = vsel %vm2943_vm13, %v3782_v38, %v2940_v24 }
 0x666   : > { %v3105_v22 = vmul.f32 %v5267_v55, %v3085_v10  ;;  %v3086_v35 = vmul.f32 %v2944_v2, %v2894_v28  ;;  %v2725_v37 = vpop.xlane.xlu2 %2724 }
 0x667   : > { %v2767_v29 = vmul.f32 %v2725_v37, %v4788_v23 }
 0x668   : > { %v3125_v13 = vadd.f32 %v5272_v45, %v3105_v22  ;;  %v3106_v21 = vmul.f32 %v5267_v55, %v3086_v35  ;;  %v2805_v16 = vpop.xlane.xlu0 %2804 }
 0x669   : > { %v2863_v47 = vmul.f32 %v2767_v29, %v2767_v29  ;;  %v2847_v18 = vmul.f32 %v2805_v16, %v4788_v23  ;;  %v2895_v30 = vsub.f32 %v5132_v32, %v2767_v29 }
 0x66a   : > { %v3126_v52 = vadd.f32 %v5272_v45, %v3106_v21  ;;  %2843 = vadd.xlane.f32.xlu1 %v2842_v63  ;;  %2819 = vadd.xlane.f32.xlu0 %v2818_v4  ;;  %v3141_v62 = vpack.c.bf16 %v3125_v13, %v3125_v13 }
 0x66b   : > { %v2879_v58 = vsub.f32 %v2847_v18, %v2863_v47 }
 0x66c   : > { %v3142_v8 = vpack.c.bf16 %v3126_v52, %v3126_v52  ;;  %v3181_v1 = vunpack.c.l.b16 %v3141_v62 }
 0x66d   : > { %v2911_v53 = vadd.f32 1e-12, %v2879_v58 }
 0x66e   : > { %v3182_v26 = vunpack.c.l.b16 %v3142_v8  ;;  %v2728_v20 = vpop.xlane.xlu2 %2727 }
 0x66f   : > { %3783 = vrsqrt.f32 %v2911_v53  ;;  %vm2951_vm2 = vweird.f32 %v2911_v53  ;;  %v5298_v10 = vmul.f32 %v2728_v20, %v4788_v23 }
 0x670   : > { %v3197_v61 = vrot.slane %v3182_v26, 7 }
 0x671   : > { %v2864_v5 = vmul.f32 %v5298_v10, %v5298_v10 }
 0x672   : > { %v3199_v19 = vsel %vm3198_vm14, %v3197_v61, %v3181_v1 }
 0x675   : > { %v3784_v44 = vpop.eup %3783 }
 0x676   : > { %v2946_v40 = vmul.f32 %v3784_v44, %v2911_v53  ;;  %vm2952_vm15 = vweird.f32 %v3784_v44  ;;  %v2808_v31 = vpop.xlane.xlu2 %2807  ;;  %v2731_v39 = vpop.xlane.xlu1 %2730 }
 0x677   : > { %vm2953_vm4 = vmor %vm2951_vm2, %vm2952_vm15  ;;  %v2848_v2 = vmul.f32 %v2808_v31, %v4788_v23  ;;  %v5304_v12 = vmul.f32 %v2731_v39, %v4788_v23 }
 0x678   : > { %v2947_v41 = vmul.f32 %v3784_v44, %v2946_v40 }
 0x679   : > { %v2880_v22 = vsub.f32 %v2848_v2, %v2864_v5  ;;  %v2865_v63 = vmul.f32 %v5304_v12, %v5304_v12 }
 0x67a   : > { %v2948_v0 = vmul.f32 0.5, %v2947_v41 }
 0x67b   : > { %v5313_v52 = vadd.f32 1e-12, %v2880_v22 }
 0x67c   : > { %v2949_v27 = vsub.f32 1.5, %v2948_v0 }
 0x67d   : > { %3785 = vrsqrt.f32 %v5313_v52  ;;  %vm2961_vm3 = vweird.f32 %v5313_v52 }
 0x67e   : > { %v2950_v38 = vmul.f32 %v3784_v44, %v2949_v27  ;;  %v2734_v15 = vpop.xlane.xlu2 %2733  ;;  %v2811_v32 = vpop.xlane.xlu1 %2810 }
 0x67f   : > { %v5307_v35 = vmul.f32 %v2734_v15, %v4788_v23  ;;  %v2849_v21 = vmul.f32 %v2811_v32, %v4788_v23 }
 0x680   : > { %v2954_v54 = vsel %vm2953_vm4, %v3784_v44, %v2950_v38 }
 0x681   : > { %v3087_v36 = vmul.f32 %v2954_v54, %v2895_v30  ;;  %v2866_v16 = vmul.f32 %v5307_v35, %v5307_v35  ;;  %v2881_v47 = vsub.f32 %v2849_v21, %v2865_v63 }
 0x683   : > { %v3107_v56 = vmul.f32 %v5267_v55, %v3087_v36  ;;  %v5321_v58 = vadd.f32 1e-12, %v2881_v47  ;;  %v5332_v44 = vpop.eup %3785 }
 0x684   : > { %v2956_v38 = vmul.f32 %v5332_v44, %v5313_v52  ;;  %vm2962_vm1 = vweird.f32 %v5332_v44  ;;  %v2896_v52 = vsub.f32 %v5141_v57, %v5298_v10 }
 0x685   : > { %v3127_v17 = vadd.f32 %v5272_v45, %v3107_v56  ;;  %3787 = vrsqrt.f32 %v5321_v58  ;;  %vm2963_vm6 = vmor %vm2961_vm3, %vm2962_vm1  ;;  %vm2971_vm9 = vweird.f32 %v5321_v58 }
 0x686   : > { %v2814_v24 = vpop.xlane.xlu2 %2813  ;;  %v2957_v39 = vmul.f32 %v5332_v44, %v2956_v38 }
 0x687   : > { %v3143_v49 = vpack.c.bf16 %v3127_v17, %v3127_v17  ;;  %v2850_v37 = vmul.f32 %v2814_v24, %v4788_v23 }
 0x688   : > { %v2817_v28 = vpop.xlane.xlu1 %2816 }
 0x689   : > { %v3183_v51 = vunpack.c.l.b16 %v3143_v49  ;;  %v2882_v18 = vsub.f32 %v2850_v37, %v2866_v16  ;;  %v2851_v61 = vmul.f32 %v2817_v28, %v4788_v23 }
 0x68b   : > { %v3200_v42 = vrot.slane %v3183_v51, 6  ;;  %v5323_v26 = vadd.f32 1e-12, %v2882_v18  ;;  %v5349_v17 = vpop.eup %3787 }
 0x68c   : > { %v2966_v15 = vmul.f32 %v5349_v17, %v5321_v58  ;;  %vm2972_vm7 = vweird.f32 %v5349_v17  ;;  %v2897_v58 = vsub.f32 %v5149_v7, %v5304_v12  ;;  %v2898_v7 = vsub.f32 %v5158_v14, %v5307_v35 }
 0x68d   : > { %v5293_v46 = vsel %vm3201_vm5, %v3200_v42, %v3199_v19  ;;  %3789 = vrsqrt.f32 %v5323_v26  ;;  %vm5425_vm10 = vmor %vm2971_vm9, %vm2972_vm7  ;;  %vm2981_vm11 = vweird.f32 %v5323_v26 }
 0x68e   : > { %v5295_v9 = vpop.xlane.xlu0 %2739  ;;  %v2737_v4 = vpop.xlane.xlu2 %2736  ;;  %v2967_v21 = vmul.f32 %v5349_v17, %v2966_v15 }
 0x68f   : > { %v5318_v62 = vmul.f32 %v2737_v4, %v4788_v23  ;;  %v5451_v12 = vmul.f32 %v5295_v9, %v4788_v23 }
 0x691   : > { %v2867_v53 = vmul.f32 %v5318_v62, %v5318_v62 }
 0x693   : > { %v2883_v40 = vsub.f32 %v2851_v61, %v2867_v53  ;;  %v5351_v31 = vpop.eup %3789 }
 0x694   : > { %v2976_v24 = vmul.f32 %v5351_v31, %v5323_v26  ;;  %vm2982_vm8 = vweird.f32 %v5351_v31 }
 0x695   : > { %v5346_v54 = vadd.f32 1e-12, %v2883_v40  ;;  %vm2983_vm12 = vmor %vm2981_vm11, %vm2982_vm8 }
 0x696   : > { %v2977_v63 = vmul.f32 %v5351_v31, %v2976_v24 }
 0x697   : > { %3791 = vrsqrt.f32 %v5346_v54  ;;  %vm2991_vm15 = vweird.f32 %v5346_v54 }
 0x698   : > { %v2978_v40 = vmul.f32 0.5, %v2977_v63 }
 0x69d   : > { %v2743_v48 = vpop.xlane.xlu0 %2742  ;;  %v5377_v47 = vpop.eup %3791 }
 0x69e   : > { %v5337_v0 = vmul.f32 %v2743_v48, %v4788_v23  ;;  %vm2992_vm13 = vweird.f32 %v5377_v47 }
 0x69f   : > { %vm5488_vm2 = vmor %vm2991_vm15, %vm2992_vm13 }
 0x6a0   : > { %v2869_v51 = vmul.f32 %v5337_v0, %v5337_v0 }
 0x6a5   : > { %v2823_v13 = vpop.xlane.xlu0 %2822  ;;  %v2746_v29 = vpop.xlane.xlu1 %2745 }
 0x6a6   : > { %v5330_v19 = vmul.f32 %v2746_v29, %v4788_v23  ;;  %v2853_v36 = vmul.f32 %v2823_v13, %v4788_v23  ;;  %v2958_v13 = vmul.f32 0.5, %v2957_v39  ;;  %v2979_v39 = vsub.f32 1.5, %v2978_v40 }
 0x6a8   : > { %v2870_v20 = vmul.f32 %v5330_v19, %v5330_v19  ;;  %v2885_v32 = vsub.f32 %v2853_v36, %v2869_v51 }
 0x6aa   : > { %v5370_v37 = vadd.f32 1e-12, %v2885_v32 }
 0x6ac   : > { %vm3011_vm1 = vweird.f32 %v5370_v37 }
 0x6ad   : > { %v2826_v8 = vpop.xlane.xlu0 %2825 }
 0x6ae   : > { %v2854_v41 = vmul.f32 %v2826_v8, %v4788_v23  ;;  %v2959_v8 = vsub.f32 1.5, %v2958_v13 }
 0x6af   : > { %v2829_v1 = vpop.xlane.xlu1 %2828 }
 0x6b0   : > { %v2886_v49 = vsub.f32 %v2854_v41, %v2870_v20  ;;  %v2855_v48 = vmul.f32 %v2829_v1, %v4788_v23  ;;  %v2968_v1 = vmul.f32 0.5, %v2967_v21  ;;  %v2986_v41 = vmul.f32 %v5377_v47, %v5346_v54 }
 0x6b1   : > { %v2901_v54 = vsub.f32 %v5183_v33, %v5337_v0 }
 0x6b2   : > { %v5364_v28 = vadd.f32 1e-12, %v2886_v49  ;;  %v2969_v49 = vsub.f32 1.5, %v2968_v1  ;;  %v2987_v15 = vmul.f32 %v5377_v47, %v2986_v41 }
 0x6b4   : > { %3793 = vrsqrt.f32 %v5364_v28  ;;  %v2970_v21 = vmul.f32 %v5349_v17, %v2969_v49 }
 0x6b5   : > { %v2749_v27 = vpop.xlane.xlu0 %2748  ;;  %3795 = vrsqrt.f32 %v5370_v37 }
 0x6b6   : > { %v5344_v30 = vmul.f32 %v2749_v27, %v4788_v23 }
 0x6b7   : > { %v2752_v56 = vpop.xlane.xlu1 %2751 }
 0x6b8   : > { %v2871_v42 = vmul.f32 %v5344_v30, %v5344_v30  ;;  %v5367_v2 = vmul.f32 %v2752_v56, %v4788_v23  ;;  %v2960_v56 = vmul.f32 %v5332_v44, %v2959_v8 }
 0x6ba   : > { %v2887_v5 = vsub.f32 %v2855_v48, %v2871_v42  ;;  %v2872_v4 = vmul.f32 %v5367_v2, %v5367_v2  ;;  %v5390_v36 = vpop.eup %3793 }
 0x6bb   : > { %v5400_v32 = vpop.eup %3795  ;;  %v3016_v48 = vmul.f32 %v5390_v36, %v5364_v28  ;;  %vm3022_vm4 = vweird.f32 %v5390_v36 }
 0x6bc   : > { %v5379_v18 = vadd.f32 1e-12, %v2887_v5  ;;  %v2964_v5 = vsel %vm2963_vm6, %v5332_v44, %v2960_v56  ;;  %v2988_v44 = vmul.f32 0.5, %v2987_v15  ;;  %vm3012_vm3 = vweird.f32 %v5400_v32 }
 0x6bd   : > { %v2755_v22 = vpop.xlane.xlu2 %2754  ;;  %v3088_v8 = vmul.f32 %v2964_v5, %v2896_v52  ;;  %v3017_v57 = vmul.f32 %v5390_v36, %v3016_v48  ;;  %vm3021_vm6 = vweird.f32 %v5364_v28  ;;  %vm5545_vm11 = vmor %vm3011_vm1, %vm3012_vm3 }
 0x6be   : > { %v5383_v61 = vmul.f32 %v2755_v22, %v4788_v23  ;;  %3797 = vrsqrt.f32 %v5379_v18  ;;  %v2989_v56 = vsub.f32 1.5, %v2988_v44  ;;  %vm5516_vm7 = vmor %vm3021_vm6, %vm3022_vm4  ;;  %vm3031_vm8 = vweird.f32 %v5379_v18 }
 0x6bf   : > { %v2832_v29 = vpop.xlane.xlu1 %2831 }
 0x6c0   : > { %v2856_v16 = vmul.f32 %v2832_v29, %v4788_v23  ;;  %v2873_v51 = vmul.f32 %v5383_v61, %v5383_v61  ;;  %v5461_v52 = vmul.f32 %v5377_v47, %v2989_v56 }
 0x6c2   : > { %v2888_v53 = vsub.f32 %v2856_v16, %v2872_v4  ;;  %v2980_v4 = vmul.f32 %v5351_v31, %v2979_v39  ;;  %v3006_v16 = vmul.f32 %v5400_v32, %v5370_v37 }
 0x6c4   : > { %v5387_v27 = vadd.f32 1e-12, %v2888_v53  ;;  %v5408_v13 = vpop.eup %3797  ;;  %v3007_v49 = vmul.f32 %v5400_v32, %v3006_v16 }
 0x6c5   : > { %v2835_v38 = vpop.xlane.xlu2 %2834  ;;  %v2758_v20 = vpop.xlane.xlu0 %2757  ;;  %v3026_v1 = vmul.f32 %v5408_v13, %v5379_v18  ;;  %vm3032_vm9 = vweird.f32 %v5408_v13 }
 0x6c6   : > { %3799 = vrsqrt.f32 %v5387_v27  ;;  %v2857_v42 = vmul.f32 %v2835_v38, %v4788_v23  ;;  %v5406_v22 = vmul.f32 %v2758_v20, %v4788_v23  ;;  %v2974_v38 = vsel %vm5425_vm10, %v5349_v17, %v2970_v21  ;;  %vm5556_vm13 = vmor %vm3031_vm8, %vm3032_vm9 }
 0x6c7   : > { %v2984_v20 = vsel %vm2983_vm12, %v5351_v31, %v2980_v4  ;;  %v3018_v17 = vmul.f32 0.5, %v3017_v57  ;;  %v3027_v39 = vmul.f32 %v5408_v13, %v3026_v1  ;;  %v3089_v31 = vmul.f32 %v2974_v38, %v2897_v58 }
 0x6c8   : > { %v2889_v24 = vsub.f32 %v2857_v42, %v2873_v51  ;;  %v2874_v40 = vmul.f32 %v5406_v22, %v5406_v22  ;;  %v3108_v42 = vmul.f32 %v5267_v55, %v3088_v8  ;;  %v3008_v14 = vmul.f32 0.5, %v3007_v49 }
 0x6c9   : > { %v2899_v21 = vsub.f32 %v5167_v25, %v5318_v62  ;;  %v5473_v4 = vmul.f32 %v5451_v12, %v5451_v12  ;;  %v3019_v44 = vsub.f32 1.5, %v3018_v17  ;;  %v3028_v57 = vmul.f32 0.5, %v3027_v39 }
 0x6ca   : > { %v5414_v29 = vadd.f32 1e-12, %v2889_v24  ;;  %v3090_v24 = vmul.f32 %v2984_v20, %v2898_v7  ;;  %v5467_v35 = vadd.f32 %v5272_v45, %v3108_v42  ;;  %v2902_v20 = vsub.f32 %v5191_v11, %v5330_v19 }
 0x6cb   : > { %v3009_v56 = vsub.f32 1.5, %v3008_v14  ;;  %v3029_v39 = vsub.f32 1.5, %v3028_v57  ;;  %vm3041_vm15 = vweird.f32 %v5387_v27  ;;  %v2900_v25 = vsub.f32 %v5175_v34, %v5451_v12 }
 0x6cc   : > { %v5416_v63 = vpop.eup %3799  ;;  %3801 = vrsqrt.f32 %v5414_v29  ;;  %vm3051_vm3 = vweird.f32 %v5414_v29 }
 0x6cd   : > { %v2838_v10 = vpop.xlane.xlu0 %2837  ;;  %v3036_v26 = vmul.f32 %v5416_v63, %v5387_v27  ;;  %vm3042_vm10 = vweird.f32 %v5416_v63 }
 0x6ce   : > { %v2858_v41 = vmul.f32 %v2838_v10, %v4788_v23  ;;  %vm5570_vm1 = vmor %vm3041_vm15, %vm3042_vm10  ;;  %vm3204_vm15 = vcmask 1043459  }
 0x6cf   : > { %v3037_v5 = vmul.f32 %v5416_v63, %v3036_v26  ;;  %v2841_v53 = vpop.xlane.xlu2 %2840  ;;  %v2994_v26 = vsel %vm5488_vm2, %v5377_v47, %v5461_v52  ;;  %v3144_v52 = vpack.c.bf16 %v5467_v35, %v5467_v35 }
 0x6d0   : > { %v2890_v51 = vsub.f32 %v2858_v41, %v2874_v40  ;;  %v5481_v40 = vmul.f32 %v5267_v55, %v3089_v31  ;;  %v5484_v41 = vmul.f32 %v5267_v55, %v3090_v24  ;;  %v2859_v42 = vmul.f32 %v2841_v53, %v4788_v23 }
 0x6d1   : > { %v3038_v38 = vmul.f32 0.5, %v3037_v5  ;;  %v3010_v5 = vmul.f32 %v5400_v32, %v3009_v56  ;;  %v3030_v53 = vmul.f32 %v5408_v13, %v3029_v39 }
 0x6d2   : > { %v5454_v15 = vadd.f32 1e-12, %v2890_v51  ;;  %v5456_v48 = vpop.eup %3801  ;;  %v3020_v51 = vmul.f32 %v5390_v36, %v3019_v44 }
 0x6d3   : > { %v3046_v9 = vmul.f32 %v5456_v48, %v5414_v29  ;;  %v3039_v19 = vsub.f32 1.5, %v3038_v38  ;;  %vm3052_vm12 = vweird.f32 %v5456_v48  ;;  %v3014_v29 = vsel %vm5545_vm11, %v5400_v32, %v3010_v5 }
 0x6d4   : > { %3803 = vrsqrt.f32 %v5454_v15  ;;  %v3024_v28 = vsel %vm5516_vm7, %v5390_v36, %v3020_v51  ;;  %vm5586_vm6 = vmor %vm3051_vm3, %vm3052_vm12  ;;  %vm3061_vm7 = vweird.f32 %v5454_v15  ;;  %v2906_v32 = vsub.f32 %v5239_v6, %v5406_v22 }
 0x6d5   : > { %v2764_v16 = vpop.xlane.xlu1 %2763  ;;  %v2761_v8 = vpop.xlane.xlu0 %2760  ;;  %v3047_v10 = vmul.f32 %v5456_v48, %v3046_v9  ;;  %v2903_v9 = vsub.f32 %v5200_v43, %v5344_v30  ;;  %v3040_v56 = vmul.f32 %v5416_v63, %v3039_v19  ;;  %v3094_v39 = vmul.f32 %v3024_v28, %v2902_v20 }
 0x6d6   : > { %v5478_v1 = vmul.f32 %v2761_v8, %v4788_v23  ;;  %v5510_v11 = vmul.f32 %v2764_v16, %v4788_v23  ;;  %v5626_v6 = vadd.f32 %v5272_v45, %v5484_v41  ;;  %vm3207_vm3 = vcmask 1044484  }
 0x6d7   : > { %v3048_v49 = vmul.f32 0.5, %v3047_v10  ;;  %v3044_v14 = vsel %vm5570_vm1, %v5416_v63, %v3040_v56  ;;  %v3114_v28 = vmul.f32 %v5267_v55, %v3094_v39 }
 0x6d8   : > { %v2875_v7 = vmul.f32 %v5478_v1, %v5478_v1  ;;  %v2876_v43 = vmul.f32 %v5510_v11, %v5510_v11  ;;  %v2907_v39 = vsub.f32 %v5248_v59, %v5478_v1 }
 0x6d9   : > { %v3049_v44 = vsub.f32 1.5, %v3048_v49  ;;  %v3567_v49 = vld [vmem:[%s5791_s19 + $0x8] sm:$0xff]  ;;  %v3134_v62 = vadd.f32 %v5272_v45, %v3114_v28 }
 0x6da   : > { %v5505_v17 = vpop.eup %3803  ;;  %v2891_v24 = vsub.f32 %v2859_v42, %v2875_v7  ;;  %3254 = vmatpush.bf16.msrb.mxu3 %v3567_v49 }
 0x6db   : > { %v3056_v31 = vmul.f32 %v5505_v17, %v5454_v15  ;;  %vm3062_vm4 = vweird.f32 %v5505_v17 }
 0x6dc   : > { %v5528_v8 = vadd.f32 1e-12, %v2891_v24  ;;  %v2904_v24 = vsub.f32 %v5208_v3, %v5367_v2  ;;  %v2905_v3 = vsub.f32 %v5216_v60, %v5383_v61  ;;  %vm3063_vm8 = vmor %vm3061_vm7, %vm3062_vm4  ;;  %v5608_v60 = vadd.f32 %v5272_v45, %v5481_v40 }
 0x6dd   : > { %v3057_v16 = vmul.f32 %v5505_v17, %v3056_v31  ;;  %v2844_v57 = vpop.xlane.xlu1 %2843  ;;  %v2820_v10 = vpop.xlane.xlu0 %2819  ;;  %v3566_v31 = vld [vmem:[%s5791_s19] sm:$0xff]  ;;  %v3093_v40 = vmul.f32 %v3014_v29, %v2901_v54  ;;  %vm3210_vm7 = vcmask 1045509  }
 0x6de   : > { %v2860_v30 = vmul.f32 %v2844_v57, %v4788_v23  ;;  %v2852_v38 = vmul.f32 %v2820_v10, %v4788_v23  ;;  %3805 = vrsqrt.f32 %v5528_v8  ;;  %v3050_v23 = vmul.f32 %v5456_v48, %v3049_v44  ;;  %3255 = vmatpush.bf16.msrb.mxu3 %v3566_v31 }
 0x6df   : > { %v3058_v36 = vmul.f32 0.5, %v3057_v16  ;;  %v3096_v61 = vmul.f32 %v3044_v14, %v2904_v24  ;;  %v3145_v33 = vpack.c.bf16 %v5608_v60, %v5608_v60  ;;  %v3113_v54 = vmul.f32 %v5267_v55, %v3093_v40 }
 0x6e0   : > { %v2892_v42 = vsub.f32 %v2860_v30, %v2876_v43  ;;  %v2884_v7 = vsub.f32 %v2852_v38, %v5473_v4  ;;  %v3034_v4 = vsel %vm5556_vm13, %v5408_v13, %v3030_v53  ;;  %v3054_v2 = vsel %vm5586_vm6, %v5456_v48, %v3050_v23 }
 0x6e1   : > { %v3059_v37 = vsub.f32 1.5, %v3058_v36  ;;  %v3095_v15 = vmul.f32 %v3034_v4, %v2903_v9  ;;  %v3097_v5 = vmul.f32 %v3054_v2, %v2905_v3  ;;  %v3116_v0 = vmul.f32 %v5267_v55, %v3096_v61 }
 0x6e2   : > { %v5575_v27 = vadd.f32 1e-12, %v2892_v42  ;;  %v5577_v20 = vadd.f32 1e-12, %v2884_v7  ;;  %v3146_v30 = vpack.c.bf16 %v5626_v6, %v5626_v6  ;;  %v3150_v38 = vpack.c.bf16 %v3134_v62, %v3134_v62 }
 0x6e3   : > { %v3060_v44 = vmul.f32 %v5505_v17, %v3059_v37  ;;  %v3115_v22 = vmul.f32 %v5267_v55, %v3095_v15  ;;  %v3136_v49 = vadd.f32 %v5272_v45, %v3116_v0  ;;  %vm3071_vm9 = vweird.f32 %v5528_v8 }
 0x6e4   : > { %3807 = vrsqrt.f32 %v5575_v27  ;;  %v3806_v63 = vpop.eup %3805  ;;  %v3133_v37 = vadd.f32 %v5272_v45, %v3113_v54  ;;  %vm3081_vm13 = vweird.f32 %v5575_v27  ;;  %vm3001_vm1 = vweird.f32 %v5577_v20 }
 0x6e5   : > { %v3064_v16 = vsel %vm3063_vm8, %v5505_v17, %v3060_v44  ;;  %3809 = vrsqrt.f32 %v5577_v20  ;;  %v3066_v48 = vmul.f32 %v3806_v63, %v5528_v8  ;;  %v3091_v17 = vmul.f32 %v2994_v26, %v2899_v21 }
 0x6e6   : > { %v3098_v9 = vmul.f32 %v3064_v16, %v2906_v32  ;;  %v3117_v26 = vmul.f32 %v5267_v55, %v3097_v5  ;;  %vm3072_vm2 = vweird.f32 %v3806_v63  ;;  %v3135_v56 = vadd.f32 %v5272_v45, %v3115_v22 }
 0x6e7   : > { %v3067_v57 = vmul.f32 %v3806_v63, %v3066_v48  ;;  %v3111_v41 = vmul.f32 %v5267_v55, %v3091_v17  ;;  %vm3073_vm10 = vmor %vm3071_vm9, %vm3072_vm2  ;;  %v3190_v8 = vunpack.c.l.b16 %v3150_v38  ;;  %v3152_v44 = vpack.c.bf16 %v3136_v49, %v3136_v49 }
 0x6e8   : > { %v3118_v53 = vmul.f32 %v5267_v55, %v3098_v9  ;;  %v3137_v7 = vadd.f32 %v5272_v45, %v3117_v26  ;;  %v3151_v24 = vpack.c.bf16 %v3135_v56, %v3135_v56  ;;  %v3149_v32 = vpack.c.bf16 %v3133_v37, %v3133_v37 }
 0x6e9   : > { %v3068_v21 = vmul.f32 0.5, %v3067_v57  ;;  %v3131_v42 = vadd.f32 %v5272_v45, %v3111_v41  ;;  %v3192_v48 = vunpack.c.l.b16 %v3152_v44  ;;  %v3184_v40 = vunpack.c.l.b16 %v3144_v52 }
 0x6ea   : > { %v3808_v47 = vpop.eup %3807  ;;  %v3138_v31 = vadd.f32 %v5272_v45, %v3118_v53  ;;  %v3153_v3 = vpack.c.bf16 %v3137_v7, %v3137_v7  ;;  %v3191_v16 = vunpack.c.l.b16 %v3151_v24  ;;  %v3186_v62 = vunpack.c.l.b16 %v3146_v30  ;;  %v3568_v24 = vld [vmem:[%s5800_s23] sm:$0xff] }
 0x6eb   : > { %v3810_v58 = vpop.eup %3809  ;;  %v3076_v10 = vmul.f32 %v3808_v47, %v5575_v27  ;;  %v3069_v43 = vsub.f32 1.5, %v3068_v21  ;;  %vm3082_vm11 = vweird.f32 %v3808_v47  ;;  %v3147_v15 = vpack.c.bf16 %v3131_v42, %v3131_v42 }
 0x6ec   : > { %v2996_v35 = vmul.f32 %v3810_v58, %v5577_v20  ;;  %vm3002_vm12 = vweird.f32 %v3810_v58  ;;  %v3154_v1 = vpack.c.bf16 %v3138_v31, %v3138_v31  ;;  %vm3083_vm4 = vmor %vm3081_vm13, %vm3082_vm11  ;;  %v3193_v5 = vunpack.c.l.b16 %v3153_v3 }
 0x6ed   : > { %v3077_v36 = vmul.f32 %v3808_v47, %v3076_v10  ;;  %v3070_v51 = vmul.f32 %v3806_v63, %v3069_v43  ;;  %vm3003_vm6 = vmor %vm3001_vm1, %vm3002_vm12  ;;  %v3218_v20 = vrot.slane %v3190_v8, 7  ;;  %v3220_v22 = vrot.slane %v3191_v16, 6 }
 0x6ee   : > { %v2997_v23 = vmul.f32 %v3810_v58, %v2996_v35  ;;  %v3194_v57 = vunpack.c.l.b16 %v3154_v1  ;;  %v3187_v21 = vunpack.c.l.b16 %v3147_v15  ;;  %v3189_v41 = vunpack.c.l.b16 %v3149_v32  ;;  %v3648_v1 = vld [vmem:[%s5802_s14] ss:$0 sm:$0xff]  ;;  %s3881_s14 = scalar_lea.hbm %s5804_s22, 32 }
 0x6ef   : > { %v3078_v19 = vmul.f32 0.5, %v3077_v36  ;;  %v3074_v4 = vsel %vm3073_vm10, %v3806_v63, %v3070_v51  ;;  %v2908_v63 = vsub.f32 %v5256_v50, %v5510_v11  ;;  %v3185_v11 = vunpack.c.l.b16 %v3145_v33  ;;  %p3883_p3 = scmp.lt.s32.totalorder %s3881_s14, %s3877_s25 }
 0x6f0   : > { %v2998_v18 = vmul.f32 0.5, %v2997_v23  ;;  %v3099_v14 = vmul.f32 %v3074_v4, %v2907_v39  ;;  %v3203_v54 = vrot.slane %v3184_v40, 5  ;;  %v3224_v26 = vrot.slane %v3193_v5, 4 }
 0x6f1   : > { %v3079_v13 = vsub.f32 1.5, %v3078_v19  ;;  %v3206_v12 = vrot.slane %v3185_v11, 4  ;;  %v3226_v33 = vrot.slane %v3194_v57, 3  ;;  %v3209_v53 = vrot.slane %v3186_v62, 3  ;;  %p3884_p4 = por %p3883_p3, %p3882_p1 }
 0x6f2   : > { %v2999_v29 = vsub.f32 1.5, %v2998_v18  ;;  %v3119_v2 = vmul.f32 %v5267_v55, %v3099_v14  ;;  %vm3213_vm8 = vcmask 1046534   ;;  %v3212_v30 = vrot.slane %v3187_v21, 2 }
 0x6f3   : > { %v3080_v59 = vmul.f32 %v3808_v47, %v3079_v13  ;;  %v3205_v36 = vsel %vm3204_vm15, %v3203_v54, %v5293_v46  ;;  %vm3216_vm2 = vcmask 1047559   ;;  %v3569_v46 = vld [vmem:[%s5800_s23 + $0x8] sm:$0xff]  ;;  %v3647_v13 = vld [vmem:[%s5801_s26] ss:$0 sm:$0xff]  ;;  %s3317_s26 = sshll.u32 %s611_s17, 4  ;;  %p3885_p7 = pnand %p3884_p4, %p3880_p0  ;;  %s3318_s26 = int_to_ptr.vmem [resolvable:$true] %s3317_s26 }
 0x6f4   : > { %v3000_v28 = vmul.f32 %v3810_v58, %v2999_v29  ;;  %v3139_v60 = vadd.f32 %v5272_v45, %v3119_v2  ;;  %v3208_v51 = vsel %vm3207_vm3, %v3206_v12, %v3205_v36  ;;  %3294 = vmatpush.bf16.msra.mxu3 %v3569_v46 }
 0x6f5   : > { %v3084_v61 = vsel %vm3083_vm4, %v3808_v47, %v3080_v59  ;;  %v3211_v7 = vsel %vm3210_vm7, %v3209_v53, %v3208_v51 }
 0x6f6   : > { %v3100_v27 = vmul.f32 %v3084_v61, %v2908_v63  ;;  %v3004_v17 = vsel %vm3003_vm6, %v3810_v58, %v3000_v28  ;;  %v3155_v9 = vpack.c.bf16 %v3139_v60, %v3139_v60  ;;  %v3222_v58 = vrot.slane %v3192_v48, 5 }
 0x6f7   : > { %v3092_v50 = vmul.f32 %v3004_v17, %v2900_v25  ;;  %v3219_v25 = vsel %vm3198_vm14, %v3218_v20, %v3189_v41  ;;  %v3214_v37 = vsel %vm3213_vm8, %v3212_v30, %v3211_v7 }
 0x6f8   : > { %v3120_v6 = vmul.f32 %v5267_v55, %v3100_v27  ;;  %v3195_v47 = vunpack.c.l.b16 %v3155_v9  ;;  %v3221_v43 = vsel %vm3201_vm5, %v3220_v22, %v3219_v25  ;;  %3295 = vmatpush.bf16.msra.mxu3 %v3568_v24 }
 0x6f9   : > { %v3112_v0 = vmul.f32 %v5267_v55, %v3092_v50  ;;  %v3223_v38 = vsel %vm3204_vm15, %v3222_v58, %v3221_v43 }
 0x6fa   : > { %v3140_v52 = vadd.f32 %v5272_v45, %v3120_v6  ;;  %v3228_v35 = vrot.slane %v3195_v47, 2 }
 0x6fb   : > { %v3132_v34 = vadd.f32 %v5272_v45, %v3112_v0  ;;  %v3225_v45 = vsel %vm3207_vm3, %v3224_v26, %v3223_v38 }
 0x6fc   : > { %v3156_v10 = vpack.c.bf16 %v3140_v52, %v3140_v52  ;;  %v3227_v23 = vsel %vm3210_vm7, %v3226_v33, %v3225_v45 }
 0x6fd   : > { %v3148_v55 = vpack.c.bf16 %v3132_v34, %v3132_v34  ;;  %v3229_v39 = vsel %vm3213_vm8, %v3228_v35, %v3227_v23 }
 0x6fe   : > { %v3196_v56 = vunpack.c.l.b16 %v3156_v10 }
 0x6ff   : > { %v3188_v49 = vunpack.c.l.b16 %v3148_v55 }
 0x700   : > { %v3230_v42 = vrot.slane %v3196_v56, 1 }
 0x701   : > { %v3215_v19 = vrot.slane %v3188_v49, 1 }
 0x702   : > { %v3231_v31 = vsel %vm3216_vm2, %v3230_v42, %v3229_v39 }
 0x703   : > { %v3217_v4 = vsel %vm3216_vm2, %v3215_v19, %v3214_v37 }
 0x704   : > { %v3232_v18 = vpack.c.b16 %v3231_v31, %v3217_v4 }
 0x706   : > { %3536 = vmatmul.msk.bf16.vlgmr.msrb.gmra.mxu3 %vm665_vm0, %v3232_v18 }
 0x789   : > { %v3257_v14 = vpop.f32.mrf.mxu3 }
 0x78a   : > { %v3258_v8 = vadd.f32 %v3647_v13, %v3257_v14 }
 0x78c   : > { %3811 = vtanh.f32 %v3258_v8 }
 0x791   : > { %v3259_v44 = vpop.f32.mrf.mxu3 }
 0x792   : > { %v3260_v29 = vadd.f32 %v3647_v13, %v3259_v44  ;;  %v3812_v3 = vpop.eup %3811 }
 0x794   : > { %3813 = vtanh.f32 %v3260_v29 }
 0x79a   : > { %v3814_v2 = vpop.eup %3813 }
 0x79b   : > { %v3264_v59 = vpack.c.bf16 %v3814_v2, %v3812_v3 }
 0x79d   : > { %3545 = vmatmul.msk.bf16.vlgmr.msra.gmra.mxu3 %vm665_vm0, %v3264_v59 }
 0x820   : > { %v3297_v63 = vpop.f32.mrf.mxu3 }
 0x821   : > { %v3298_v28 = vadd.f32 %v3648_v1, %v3297_v63 }
 0x823   : > { %3302 = vst [vmem:[%s611_s17] sm:$0xff] %v3298_v28 }
 0x828   : > { %v3299_v15 = vpop.f32.mrf.mxu3 }
 0x829   : > { %v3300_v16 = vadd.f32 %v3648_v1, %v3299_v15 }
 0x82b   : > { %3303 = vst [vmem:[%s611_s17 + $0x8] sm:$0xff] %v3300_v16 }
 0x82c   : > { %3888 = shalt.err (!%p3885_p7)
}
 0x82d   : > { %s3936_s21 = smov 128   ;;  %s3937_s17 = smov 8  }
 0x82e   : > { %3583 = dma.vmem_to_hbm [thread:$0]  (%p4083_p11), %s3318_s26, 256, %s3320_s3, %s3305_s4, %s3936_s21, %s3936_s21, %s3937_s17  }
 0x82f PF: > { %s5805_s1 = sld [smem:[#allocation8_spill]]  ;;  %p5807_p5 = scmp.ge.s32.totalorder %s3927_s30, 2 }
 0x831   : > { %p3590_p8 = pnand %p5807_p5, %p4087_p12 }
 0x833   : > { %p3591_p10 = pneg %p3590_p8 }
 0x835   : > { %s3334_s5 = sand.u32 1, %s5805_s1  }
 0x836   : > { %s3335_s0 = scalar_lea.sflag [#allocation4], %s3334_s5 }
 0x837   : > { %3910 = dma.done.wait (%p3591_p10), %s3335_s0, 256  }
 0x838   : > { %3912 = vsyncadd (%p3591_p10), %s3335_s0, 4294967040  ;;  %s5808_s30 = sld [smem:[#allocation10_spill]]  ;;  %s5811_s27 = smov %s3919_s28 }
 0x839   : > { %s5809_s24 = sld [smem:[#allocation9_spill]] }
 0x83a   : > { %s5810_s29 = sld [smem:[#allocation11_spill]] }
 0x83e   : > { %p31_p2 = scmp.ge.s32.totalorder %s5808_s30, 4  }
 0x83f   : > { %s5812_s28 = smov %s5809_s24 }
 0x840   :  { %33 = sbr.rel (!%p31_p2) target bundleno = 17 (0x11), region = 140 }
 0x845   :  { %3341 = vsyncpa [#allocation3], 1 }
 0x846   :  { %3343 = vsyncpa [#allocation3 + $0x1], 1 }
 0x847   :  { %3344 = vsyncpa [#allocation4], 1 }
 0x848   :  { %3346 = vsyncpa [#allocation4 + $0x1], 1 }

</bundles_post_ra>
